<compile_context>
chip_gen: v7x
topology: tpu7x:2x2x1
jax: 0.10.0
libtpu: 0.0.40
codegen_flags: <defaults>
</compile_context>

<pallas_src>
import functools

import jax
import jax.numpy as jnp
from jax import lax
from jax.experimental import pallas as pl
from jax.experimental.pallas import tpu as pltpu


# ---------------------------------------------------------------------------
# Shared 27-tap direct-conv accumulation (bf16 MXU matmuls, f32 accumulation)
# ---------------------------------------------------------------------------
def _accum_conv_taps(planes, w_ref, H, W, Cin):
    """planes: 3 refs (1, 1, H+2, W+2, Cin) for depth taps 0/1/2.
    w_ref: (27*Cin, Cout).  Returns (H*W, Cout) f32."""
    HW = H * W
    acc = None
    for kd in range(3):
        xv = planes[kd][0, 0]                                  # (H+2, W+2, Cin)
        for kh in range(3):
            for kw in range(3):
                tap = (kd * 3 + kh) * 3 + kw
                slab = xv[kh:kh + H, kw:kw + W, :].reshape(HW, Cin)
                wt = w_ref[tap * Cin:(tap + 1) * Cin, :]       # (Cin, Cout)
                d = jnp.dot(slab, wt, preferred_element_type=jnp.float32)
                acc = d if acc is None else acc + d
    return acc


# ---------------------------------------------------------------------------
# Kernel A: conv3x3x3 (direct) + folded BN + optional ReLU
# ---------------------------------------------------------------------------
def _conv_bn_kernel(x0_ref, x1_ref, x2_ref, w_ref, s_ref, b_ref, o_ref,
                    *, H, W, Cin, relu):
    acc = _accum_conv_taps((x0_ref, x1_ref, x2_ref), w_ref, H, W, Cin)
    y = acc * s_ref[...] + b_ref[...]                          # folded BN
    if relu:
        y = jnp.maximum(y, 0.0)
    o_ref[0, 0] = y.astype(o_ref.dtype)


def _conv_bn(x_pad, w_mat, scale, bias, *, relu):
    N, Dp2, Hp2, Wp2, Cin = x_pad.shape
    D, H, W = Dp2 - 2, Hp2 - 2, Wp2 - 2
    HW = H * W
    Cout = w_mat.shape[1]
    flops = 2 * N * D * HW * 27 * Cin * Cout
    bytes_accessed = (3 * N * D * Hp2 * Wp2 * Cin + N * D * HW * Cout) * 2 \
        + int(w_mat.size) * 2
    return pl.pallas_call(
        functools.partial(_conv_bn_kernel, H=H, W=W, Cin=Cin, relu=relu),
        out_shape=jax.ShapeDtypeStruct((N, D, HW, Cout), jnp.bfloat16),
        grid=(N, D),
        in_specs=[
            # three shifted halo planes of the same padded activation
            pl.BlockSpec((1, 1, Hp2, Wp2, Cin), lambda n, d: (n, d, 0, 0, 0)),
            pl.BlockSpec((1, 1, Hp2, Wp2, Cin), lambda n, d: (n, d + 1, 0, 0, 0)),
            pl.BlockSpec((1, 1, Hp2, Wp2, Cin), lambda n, d: (n, d + 2, 0, 0, 0)),
            # weights / BN stay resident (constant block index)
            pl.BlockSpec((27 * Cin, Cout), lambda n, d: (0, 0)),
            pl.BlockSpec((1, Cout), lambda n, d: (0, 0)),
            pl.BlockSpec((1, Cout), lambda n, d: (0, 0)),
        ],
        out_specs=pl.BlockSpec((1, 1, HW, Cout), lambda n, d: (n, d, 0, 0)),
        compiler_params=pltpu.CompilerParams(
            dimension_semantics=("parallel", "parallel"),
            vmem_limit_bytes=32 * 1024 * 1024),
        cost_estimate=pl.CostEstimate(flops=flops, transcendentals=0,
                                      bytes_accessed=bytes_accessed),
    )(x_pad, x_pad, x_pad, w_mat, scale.reshape(1, Cout), bias.reshape(1, Cout))


# ---------------------------------------------------------------------------
# Kernel B: conv3x3x3 + BN fused with channel-attention pooling + MLP gate
# ---------------------------------------------------------------------------
def _conv_bn_ca_kernel(x0_ref, x1_ref, x2_ref, w_ref, s_ref, b_ref,
                       w1_ref, w2_ref, y_ref, gate_ref, sum_sc, max_sc,
                       *, H, W, Cin, inv_S):
    d = pl.program_id(1)
    acc = _accum_conv_taps((x0_ref, x1_ref, x2_ref), w_ref, H, W, Cin)
    y = acc * s_ref[...] + b_ref[...]                          # (HW, Cout) f32
    y_ref[0, 0] = y.astype(y_ref.dtype)

    psum = jnp.sum(y, axis=0, keepdims=True)                   # (1, Cout)
    pmax = jnp.max(y, axis=0, keepdims=True)                   # (1, Cout)

    @pl.when(d == 0)
    def _():
        sum_sc[...] = psum
        max_sc[...] = pmax

    @pl.when(d != 0)
    def _():
        sum_sc[...] = sum_sc[...] + psum
        max_sc[...] = jnp.maximum(max_sc[...], pmax)

    @pl.when(d == pl.num_programs(1) - 1)
    def _():
        avg = sum_sc[...] * inv_S                              # global avg-pool
        mx = max_sc[...]                                       # global max-pool

        def mlp(v):                                            # shared 2-layer MLP
            h = jnp.maximum(jnp.sum(w1_ref[...] * v, axis=1, keepdims=True), 0.0)
            return jnp.sum(h * w2_ref[...], axis=0, keepdims=True)

        gate_ref[0] = jax.nn.sigmoid(mlp(avg) + mlp(mx))       # (1, Cout)


def _conv_bn_ca(x_pad, w_mat, scale, bias, w_ca1, w_ca2):
    N, Dp2, Hp2, Wp2, Cin = x_pad.shape
    D, H, W = Dp2 - 2, Hp2 - 2, Wp2 - 2
    HW = H * W
    Cout = w_mat.shape[1]
    hidden = w_ca1.shape[0]
    flops = 2 * N * D * HW * 27 * Cin * Cout
    bytes_accessed = (3 * N * D * Hp2 * Wp2 * Cin + N * D * HW * Cout) * 2 \
        + int(w_mat.size) * 2
    return pl.pallas_call(
        functools.partial(_conv_bn_ca_kernel, H=H, W=W, Cin=Cin,
                          inv_S=1.0 / float(D * HW)),
        out_shape=(
            jax.ShapeDtypeStruct((N, D, HW, Cout), jnp.bfloat16),   # y2
            jax.ShapeDtypeStruct((N, 1, Cout), jnp.float32),        # channel gate
        ),
        grid=(N, D),
        in_specs=[
            pl.BlockSpec((1, 1, Hp2, Wp2, Cin), lambda n, d: (n, d, 0, 0, 0)),
            pl.BlockSpec((1, 1, Hp2, Wp2, Cin), lambda n, d: (n, d + 1, 0, 0, 0)),
            pl.BlockSpec((1, 1, Hp2, Wp2, Cin), lambda n, d: (n, d + 2, 0, 0, 0)),
            pl.BlockSpec((27 * Cin, Cout), lambda n, d: (0, 0)),
            pl.BlockSpec((1, Cout), lambda n, d: (0, 0)),
            pl.BlockSpec((1, Cout), lambda n, d: (0, 0)),
            pl.BlockSpec((hidden, Cout), lambda n, d: (0, 0)),
            pl.BlockSpec((hidden, Cout), lambda n, d: (0, 0)),
        ],
        out_specs=(
            pl.BlockSpec((1, 1, HW, Cout), lambda n, d: (n, d, 0, 0)),
            pl.BlockSpec((1, 1, Cout), lambda n, d: (n, 0, 0)),
        ),
        scratch_shapes=[pltpu.VMEM((1, Cout), jnp.float32),
                        pltpu.VMEM((1, Cout), jnp.float32)],
        compiler_params=pltpu.CompilerParams(
            dimension_semantics=("parallel", "arbitrary"),
            vmem_limit_bytes=32 * 1024 * 1024),
        cost_estimate=pl.CostEstimate(flops=flops, transcendentals=0,
                                      bytes_accessed=bytes_accessed),
    )(x_pad, x_pad, x_pad, w_mat, scale.reshape(1, Cout), bias.reshape(1, Cout),
      w_ca1, w_ca2)


# ---------------------------------------------------------------------------
# Kernel C: channel-gated mean/max map -> single (N, S, 2) buffer
# ---------------------------------------------------------------------------
def _gated_maps_kernel(y_ref, gate_ref, mm_ref, *, inv_C):
    y = y_ref[0, 0].astype(jnp.float32) * gate_ref[0]          # (HW, C) gated
    mean_c = jnp.sum(y, axis=1, keepdims=True) * inv_C         # (HW, 1)
    max_c = jnp.max(y, axis=1, keepdims=True)                  # (HW, 1)
    mm_ref[0, 0] = jnp.concatenate([mean_c, max_c], axis=1)    # (HW, 2)


def _gated_maps(y2, gate):
    N, D, HW, C = y2.shape
    return pl.pallas_call(
        functools.partial(_gated_maps_kernel, inv_C=1.0 / float(C)),
        out_shape=jax.ShapeDtypeStruct((N, D, HW, 2), jnp.float32),
        grid=(N, D),
        in_specs=[
            pl.BlockSpec((1, 1, HW, C), lambda n, d: (n, d, 0, 0)),
            pl.BlockSpec((1, 1, C), lambda n, d: (n, 0, 0)),
        ],
        out_specs=pl.BlockSpec((1, 1, HW, 2), lambda n, d: (n, d, 0, 0)),
        compiler_params=pltpu.CompilerParams(
            dimension_semantics=("parallel", "parallel")),
    )(y2, gate)


# ---------------------------------------------------------------------------
# Kernel D: sigmoid(SA) * channel-gate * y2 + residual, final ReLU
# ---------------------------------------------------------------------------
def _epilogue_kernel(y_ref, gate_ref, sa_ref, r_ref, o_ref):
    y = y_ref[0, 0].astype(jnp.float32)                        # (HW, C)
    sgate = jax.nn.sigmoid(sa_ref[0, 0])                       # (HW, 1)
    out = jnp.maximum(y * gate_ref[0] * sgate + r_ref[0, 0], 0.0)
    o_ref[0, 0] = out.astype(o_ref.dtype)


def _epilogue(y2, gate, sa_logits, residual):
    N, D, HW, C = y2.shape
    return pl.pallas_call(
        _epilogue_kernel,
        out_shape=jax.ShapeDtypeStruct((N, D, HW, C), jnp.float32),
        grid=(N, D),
        in_specs=[
            pl.BlockSpec((1, 1, HW, C), lambda n, d: (n, d, 0, 0)),
            pl.BlockSpec((1, 1, C), lambda n, d: (n, 0, 0)),
            pl.BlockSpec((1, 1, HW, 1), lambda n, d: (n, d, 0, 0)),
            pl.BlockSpec((1, 1, HW, C), lambda n, d: (n, d, 0, 0)),
        ],
        out_specs=pl.BlockSpec((1, 1, HW, C), lambda n, d: (n, d, 0, 0)),
        compiler_params=pltpu.CompilerParams(
            dimension_semantics=("parallel", "parallel")),
    )(y2, gate, sa_logits, residual)


# ---------------------------------------------------------------------------
# Full CBAM forward (NCDHW in / NCDHW out)
# ---------------------------------------------------------------------------
def cbam_forward(x_ncdhw, params):
    x = jnp.transpose(x_ncdhw, (0, 2, 3, 4, 1)).astype(jnp.float32)   # NDHWC
    N, D, H, W, Cin = x.shape
    HW = H * W
    Cout = params["w_conv1"].shape[-1]
    pad3 = ((0, 0), (1, 1), (1, 1), (1, 1), (0, 0))

    # conv1 + bn1 + relu  (bf16 operands, f32 accumulation, bf16 intermediate)
    x_pad = jnp.pad(x.astype(jnp.bfloat16), pad3)
    w1 = params["w_conv1"].reshape(27 * Cin, Cout).astype(jnp.bfloat16)
    y1 = _conv_bn(x_pad, w1, params["bn1_scale"], params["bn1_bias"], relu=True)

    # conv2 + bn2 fused with channel-attention pooling + MLP + sigmoid gate
    y1_pad = jnp.pad(y1.reshape(N, D, H, W, Cout), pad3)
    w2 = params["w_conv2"].reshape(27 * Cout, Cout).astype(jnp.bfloat16)
    y2, gate = _conv_bn_ca(y1_pad, w2, params["bn2_scale"], params["bn2_bias"],
                           params["w_ca1"], params["w_ca2"])

    # channel-gated mean/max map (single (N, S, 2) buffer; no width-1 outputs)
    mm = _gated_maps(y2, gate)

    # 7x7x7 spatial-attention conv on the tiny 2-channel map: negligible FLOPs,
    # left to XLA instead of a 343x im2col (per perf review).
    sa = lax.conv_general_dilated(
        mm.reshape(N, D, H, W, 2), params["w_sa"][..., None],
        (1, 1, 1), [(3, 3)] * 3, dimension_numbers=("NDHWC", "DHWIO", "NDHWC"))
    sa = sa.reshape(N, D, HW, 1)

    # downsample=None => residual is the input itself (requires Cin == Cout)
    out = _epilogue(y2, gate, sa, x.reshape(N, D, HW, Cin))
    return jnp.transpose(out.reshape(N, D, H, W, Cout), (0, 4, 1, 2, 3))


# ---------------------------------------------------------------------------
# Deterministic synthetic parameters
# ---------------------------------------------------------------------------
def init_params(key, inplanes, planes):
    keys = jax.random.split(key, 16)
    eps = 1e-5
    hidden = planes // 16

    def bn_fold(kg, kb, km, kv, c):
        gamma = jax.random.uniform(kg, (c,), minval=0.5, maxval=1.5)
        beta = 0.1 * jax.random.normal(kb, (c,))
        rmean = 0.1 * jax.random.normal(km, (c,))
        rvar = jax.random.uniform(kv, (c,), minval=0.5, maxval=1.5)
        scale = gamma / jnp.sqrt(rvar + eps)
        return scale.astype(jnp.float32), (beta - rmean * scale).astype(jnp.float32)

    p = {
        # conv weights stored DHWIO (kd, kh, kw, Cin, Cout)
        "w_conv1": 0.05 * jax.random.normal(keys[0], (3, 3, 3, inplanes, planes), jnp.float32),
        "w_conv2": 0.05 * jax.random.normal(keys[1], (3, 3, 3, planes, planes), jnp.float32),
        # channel-attention MLP: fc1 as (hidden, C), fc2 as (hidden, C)
        "w_ca1": 0.2 * jax.random.normal(keys[2], (hidden, planes), jnp.float32),
        "w_ca2": 0.2 * jax.random.normal(keys[3], (hidden, planes), jnp.float32),
        # spatial-attention conv: (7, 7, 7, 2) for [mean, max] input channels
        "w_sa": 0.05 * jax.random.normal(keys[4], (7, 7, 7, 2), jnp.float32),
    }
    p["bn1_scale"], p["bn1_bias"] = bn_fold(keys[5], keys[6], keys[7], keys[8], planes)
    p["bn2_scale"], p["bn2_bias"] = bn_fold(keys[9], keys[10], keys[11], keys[12], planes)
    return p


# ---------------------------------------------------------------------------
# Pure-JAX reference (numerical sanity check)
# ---------------------------------------------------------------------------
def ref_forward(x_ncdhw, p):
    x = jnp.transpose(x_ncdhw, (0, 2, 3, 4, 1)).astype(jnp.float32)
    dn = ("NDHWC", "DHWIO", "NDHWC")
    conv = lambda a, w, pad: lax.conv_general_dilated(
        a, w, (1, 1, 1), [(pad, pad)] * 3, dimension_numbers=dn)

    y = jnp.maximum(conv(x, p["w_conv1"], 1) * p["bn1_scale"] + p["bn1_bias"], 0.0)
    y = conv(y, p["w_conv2"], 1) * p["bn2_scale"] + p["bn2_bias"]

    avg = jnp.mean(y, axis=(1, 2, 3), keepdims=True)
    mx = jnp.max(y, axis=(1, 2, 3), keepdims=True)

    def mlp(v):
        h = jnp.maximum(jnp.einsum("ndhwc,rc->ndhwr", v, p["w_ca1"]), 0.0)
        return jnp.einsum("ndhwr,rc->ndhwc", h, p["w_ca2"])

    y = y * jax.nn.sigmoid(mlp(avg) + mlp(mx))

    m2 = jnp.concatenate([jnp.mean(y, axis=-1, keepdims=True),
                          jnp.max(y, axis=-1, keepdims=True)], axis=-1)
    sa = jax.nn.sigmoid(conv(m2, p["w_sa"][..., None], 3))
    out = jnp.maximum(y * sa + x, 0.0)
    return jnp.transpose(out, (0, 4, 1, 2, 3))


if __name__ == "__main__":
    key = jax.random.PRNGKey(0)
    k_x, k_p = jax.random.split(key)

    N, C, D, H, W = 2, 32, 4, 8, 8          # planes // 16 = 2 attention channels
    x = jax.random.normal(k_x, (N, C, D, H, W), jnp.float32)
    params = init_params(k_p, inplanes=C, planes=C)

    out = jax.jit(cbam_forward)(x, params)
    out = jax.block_until_ready(out)
    assert out.shape == (N, C, D, H, W), out.shape

    ref = jax.block_until_ready(ref_forward(x, params))
    max_err = float(jnp.max(jnp.abs(out - ref)))
    assert max_err < 5e-2, f"max abs error too large: {max_err}"

    print("KERNEL_OK")
</pallas_src>

<mosaic_0001>
module attributes {stable_mosaic.version = 11 : i64} {
  func.func @_conv_bn_kernel(%arg0: i32, %arg1: i32, %arg2: memref<1x1x10x10x32xbf16, #tpu.memory_space<vmem>>, %arg3: memref<1x1x10x10x32xbf16, #tpu.memory_space<vmem>>, %arg4: memref<1x1x10x10x32xbf16, #tpu.memory_space<vmem>>, %arg5: memref<864x32xbf16, #tpu.memory_space<vmem>>, %arg6: memref<1x32xf32, #tpu.memory_space<vmem>>, %arg7: memref<1x32xf32, #tpu.memory_space<vmem>>, %arg8: memref<1x1x64x32xbf16, #tpu.memory_space<vmem>>) attributes {dimension_semantics = [#tpu.dimension_semantics<parallel>, #tpu.dimension_semantics<parallel>], iteration_bounds = array<i64: 2, 4>, scalar_prefetch = 0 : i64, scratch_operands = 0 : i64, tpu.core_type = #tpu.core_type<tc>, window_params = [{transform_indices = @transform_0, window_bounds = array<i64: 1, 1, 10, 10, 32>}, {transform_indices = @transform_1, window_bounds = array<i64: 1, 1, 10, 10, 32>}, {transform_indices = @transform_2, window_bounds = array<i64: 1, 1, 10, 10, 32>}, {pipeline_mode = #tpu.pipeline_mode<synchronous>, transform_indices = @transform_3, window_bounds = array<i64: 864, 32>}, {pipeline_mode = #tpu.pipeline_mode<synchronous>, transform_indices = @transform_4, window_bounds = array<i64: 1, 32>}, {pipeline_mode = #tpu.pipeline_mode<synchronous>, transform_indices = @transform_5, window_bounds = array<i64: 1, 32>}, {transform_indices = @transform_6, window_bounds = array<i64: 1, 1, 64, 32>}]} {
    %c0 = arith.constant 0 : index
    %c0_0 = arith.constant 0 : index
    %c0_1 = arith.constant 0 : index
    %c0_2 = arith.constant 0 : index
    %c0_3 = arith.constant 0 : index
    %0 = vector.load %arg2[%c0, %c0_0, %c0_1, %c0_2, %c0_3] : memref<1x1x10x10x32xbf16, #tpu.memory_space<vmem>>, vector<1x1x10x10x32xbf16>
    %1 = vector.shape_cast %0 : vector<1x1x10x10x32xbf16> to vector<10x10x32xbf16>
    %2 = vector.extract_strided_slice %1 {offsets = [0, 0, 0], sizes = [8, 8, 32], strides = [1, 1, 1]} : vector<10x10x32xbf16> to vector<8x8x32xbf16>
    %3 = vector.shape_cast %2 : vector<8x8x32xbf16> to vector<64x32xbf16>
    %c0_4 = arith.constant 0 : index
    %c0_5 = arith.constant 0 : index
    %4 = vector.load %arg5[%c0_4, %c0_5] : memref<864x32xbf16, #tpu.memory_space<vmem>>, vector<32x32xbf16>
    %cst = arith.constant dense<0.000000e+00> : vector<64x32xf32>
    %5 = tpu.matmul %3, %4, %cst {dimension_numbers = #tpu.dot_dimension_numbers<[1], [0], [0], [1], [0, 0, 1, 1], [], []>} : vector<64x32xbf16>, vector<32x32xbf16>, vector<64x32xf32> -> vector<64x32xf32>
    %6 = vector.extract_strided_slice %1 {offsets = [0, 1, 0], sizes = [8, 8, 32], strides = [1, 1, 1]} : vector<10x10x32xbf16> to vector<8x8x32xbf16>
    %7 = vector.shape_cast %6 : vector<8x8x32xbf16> to vector<64x32xbf16>
    %c32 = arith.constant 32 : index
    %c0_6 = arith.constant 0 : index
    %8 = vector.load %arg5[%c32, %c0_6] : memref<864x32xbf16, #tpu.memory_space<vmem>>, vector<32x32xbf16>
    %cst_7 = arith.constant dense<0.000000e+00> : vector<64x32xf32>
    %9 = tpu.matmul %7, %8, %cst_7 {dimension_numbers = #tpu.dot_dimension_numbers<[1], [0], [0], [1], [0, 0, 1, 1], [], []>} : vector<64x32xbf16>, vector<32x32xbf16>, vector<64x32xf32> -> vector<64x32xf32>
    %10 = arith.addf %5, %9 : vector<64x32xf32>
    %11 = vector.extract_strided_slice %1 {offsets = [0, 2, 0], sizes = [8, 8, 32], strides = [1, 1, 1]} : vector<10x10x32xbf16> to vector<8x8x32xbf16>
    %12 = vector.shape_cast %11 : vector<8x8x32xbf16> to vector<64x32xbf16>
    %c64 = arith.constant 64 : index
    %c0_8 = arith.constant 0 : index
    %13 = vector.load %arg5[%c64, %c0_8] : memref<864x32xbf16, #tpu.memory_space<vmem>>, vector<32x32xbf16>
    %cst_9 = arith.constant dense<0.000000e+00> : vector<64x32xf32>
    %14 = tpu.matmul %12, %13, %cst_9 {dimension_numbers = #tpu.dot_dimension_numbers<[1], [0], [0], [1], [0, 0, 1, 1], [], []>} : vector<64x32xbf16>, vector<32x32xbf16>, vector<64x32xf32> -> vector<64x32xf32>
    %15 = arith.addf %10, %14 : vector<64x32xf32>
    %16 = vector.extract_strided_slice %1 {offsets = [1, 0, 0], sizes = [8, 8, 32], strides = [1, 1, 1]} : vector<10x10x32xbf16> to vector<8x8x32xbf16>
    %17 = vector.shape_cast %16 : vector<8x8x32xbf16> to vector<64x32xbf16>
    %c96 = arith.constant 96 : index
    %c0_10 = arith.constant 0 : index
    %18 = vector.load %arg5[%c96, %c0_10] : memref<864x32xbf16, #tpu.memory_space<vmem>>, vector<32x32xbf16>
    %cst_11 = arith.constant dense<0.000000e+00> : vector<64x32xf32>
    %19 = tpu.matmul %17, %18, %cst_11 {dimension_numbers = #tpu.dot_dimension_numbers<[1], [0], [0], [1], [0, 0, 1, 1], [], []>} : vector<64x32xbf16>, vector<32x32xbf16>, vector<64x32xf32> -> vector<64x32xf32>
    %20 = arith.addf %15, %19 : vector<64x32xf32>
    %21 = vector.extract_strided_slice %1 {offsets = [1, 1, 0], sizes = [8, 8, 32], strides = [1, 1, 1]} : vector<10x10x32xbf16> to vector<8x8x32xbf16>
    %22 = vector.shape_cast %21 : vector<8x8x32xbf16> to vector<64x32xbf16>
    %c128 = arith.constant 128 : index
    %c0_12 = arith.constant 0 : index
    %23 = vector.load %arg5[%c128, %c0_12] : memref<864x32xbf16, #tpu.memory_space<vmem>>, vector<32x32xbf16>
    %cst_13 = arith.constant dense<0.000000e+00> : vector<64x32xf32>
    %24 = tpu.matmul %22, %23, %cst_13 {dimension_numbers = #tpu.dot_dimension_numbers<[1], [0], [0], [1], [0, 0, 1, 1], [], []>} : vector<64x32xbf16>, vector<32x32xbf16>, vector<64x32xf32> -> vector<64x32xf32>
    %25 = arith.addf %20, %24 : vector<64x32xf32>
    %26 = vector.extract_strided_slice %1 {offsets = [1, 2, 0], sizes = [8, 8, 32], strides = [1, 1, 1]} : vector<10x10x32xbf16> to vector<8x8x32xbf16>
    %27 = vector.shape_cast %26 : vector<8x8x32xbf16> to vector<64x32xbf16>
    %c160 = arith.constant 160 : index
    %c0_14 = arith.constant 0 : index
    %28 = vector.load %arg5[%c160, %c0_14] : memref<864x32xbf16, #tpu.memory_space<vmem>>, vector<32x32xbf16>
    %cst_15 = arith.constant dense<0.000000e+00> : vector<64x32xf32>
    %29 = tpu.matmul %27, %28, %cst_15 {dimension_numbers = #tpu.dot_dimension_numbers<[1], [0], [0], [1], [0, 0, 1, 1], [], []>} : vector<64x32xbf16>, vector<32x32xbf16>, vector<64x32xf32> -> vector<64x32xf32>
    %30 = arith.addf %25, %29 : vector<64x32xf32>
    %31 = vector.extract_strided_slice %1 {offsets = [2, 0, 0], sizes = [8, 8, 32], strides = [1, 1, 1]} : vector<10x10x32xbf16> to vector<8x8x32xbf16>
    %32 = vector.shape_cast %31 : vector<8x8x32xbf16> to vector<64x32xbf16>
    %c192 = arith.constant 192 : index
    %c0_16 = arith.constant 0 : index
    %33 = vector.load %arg5[%c192, %c0_16] : memref<864x32xbf16, #tpu.memory_space<vmem>>, vector<32x32xbf16>
    %cst_17 = arith.constant dense<0.000000e+00> : vector<64x32xf32>
    %34 = tpu.matmul %32, %33, %cst_17 {dimension_numbers = #tpu.dot_dimension_numbers<[1], [0], [0], [1], [0, 0, 1, 1], [], []>} : vector<64x32xbf16>, vector<32x32xbf16>, vector<64x32xf32> -> vector<64x32xf32>
    %35 = arith.addf %30, %34 : vector<64x32xf32>
    %36 = vector.extract_strided_slice %1 {offsets = [2, 1, 0], sizes = [8, 8, 32], strides = [1, 1, 1]} : vector<10x10x32xbf16> to vector<8x8x32xbf16>
    %37 = vector.shape_cast %36 : vector<8x8x32xbf16> to vector<64x32xbf16>
    %c224 = arith.constant 224 : index
    %c0_18 = arith.constant 0 : index
    %38 = vector.load %arg5[%c224, %c0_18] : memref<864x32xbf16, #tpu.memory_space<vmem>>, vector<32x32xbf16>
    %cst_19 = arith.constant dense<0.000000e+00> : vector<64x32xf32>
    %39 = tpu.matmul %37, %38, %cst_19 {dimension_numbers = #tpu.dot_dimension_numbers<[1], [0], [0], [1], [0, 0, 1, 1], [], []>} : vector<64x32xbf16>, vector<32x32xbf16>, vector<64x32xf32> -> vector<64x32xf32>
    %40 = arith.addf %35, %39 : vector<64x32xf32>
    %41 = vector.extract_strided_slice %1 {offsets = [2, 2, 0], sizes = [8, 8, 32], strides = [1, 1, 1]} : vector<10x10x32xbf16> to vector<8x8x32xbf16>
    %42 = vector.shape_cast %41 : vector<8x8x32xbf16> to vector<64x32xbf16>
    %c256 = arith.constant 256 : index
    %c0_20 = arith.constant 0 : index
    %43 = vector.load %arg5[%c256, %c0_20] : memref<864x32xbf16, #tpu.memory_space<vmem>>, vector<32x32xbf16>
    %cst_21 = arith.constant dense<0.000000e+00> : vector<64x32xf32>
    %44 = tpu.matmul %42, %43, %cst_21 {dimension_numbers = #tpu.dot_dimension_numbers<[1], [0], [0], [1], [0, 0, 1, 1], [], []>} : vector<64x32xbf16>, vector<32x32xbf16>, vector<64x32xf32> -> vector<64x32xf32>
    %45 = arith.addf %40, %44 : vector<64x32xf32>
    %c0_22 = arith.constant 0 : index
    %c0_23 = arith.constant 0 : index
    %c0_24 = arith.constant 0 : index
    %c0_25 = arith.constant 0 : index
    %c0_26 = arith.constant 0 : index
    %46 = vector.load %arg3[%c0_22, %c0_23, %c0_24, %c0_25, %c0_26] : memref<1x1x10x10x32xbf16, #tpu.memory_space<vmem>>, vector<1x1x10x10x32xbf16>
    %47 = vector.shape_cast %46 : vector<1x1x10x10x32xbf16> to vector<10x10x32xbf16>
    %48 = vector.extract_strided_slice %47 {offsets = [0, 0, 0], sizes = [8, 8, 32], strides = [1, 1, 1]} : vector<10x10x32xbf16> to vector<8x8x32xbf16>
    %49 = vector.shape_cast %48 : vector<8x8x32xbf16> to vector<64x32xbf16>
    %c288 = arith.constant 288 : index
    %c0_27 = arith.constant 0 : index
    %50 = vector.load %arg5[%c288, %c0_27] : memref<864x32xbf16, #tpu.memory_space<vmem>>, vector<32x32xbf16>
    %cst_28 = arith.constant dense<0.000000e+00> : vector<64x32xf32>
    %51 = tpu.matmul %49, %50, %cst_28 {dimension_numbers = #tpu.dot_dimension_numbers<[1], [0], [0], [1], [0, 0, 1, 1], [], []>} : vector<64x32xbf16>, vector<32x32xbf16>, vector<64x32xf32> -> vector<64x32xf32>
    %52 = arith.addf %45, %51 : vector<64x32xf32>
    %53 = vector.extract_strided_slice %47 {offsets = [0, 1, 0], sizes = [8, 8, 32], strides = [1, 1, 1]} : vector<10x10x32xbf16> to vector<8x8x32xbf16>
    %54 = vector.shape_cast %53 : vector<8x8x32xbf16> to vector<64x32xbf16>
    %c320 = arith.constant 320 : index
    %c0_29 = arith.constant 0 : index
    %55 = vector.load %arg5[%c320, %c0_29] : memref<864x32xbf16, #tpu.memory_space<vmem>>, vector<32x32xbf16>
    %cst_30 = arith.constant dense<0.000000e+00> : vector<64x32xf32>
    %56 = tpu.matmul %54, %55, %cst_30 {dimension_numbers = #tpu.dot_dimension_numbers<[1], [0], [0], [1], [0, 0, 1, 1], [], []>} : vector<64x32xbf16>, vector<32x32xbf16>, vector<64x32xf32> -> vector<64x32xf32>
    %57 = arith.addf %52, %56 : vector<64x32xf32>
    %58 = vector.extract_strided_slice %47 {offsets = [0, 2, 0], sizes = [8, 8, 32], strides = [1, 1, 1]} : vector<10x10x32xbf16> to vector<8x8x32xbf16>
    %59 = vector.shape_cast %58 : vector<8x8x32xbf16> to vector<64x32xbf16>
    %c352 = arith.constant 352 : index
    %c0_31 = arith.constant 0 : index
    %60 = vector.load %arg5[%c352, %c0_31] : memref<864x32xbf16, #tpu.memory_space<vmem>>, vector<32x32xbf16>
    %cst_32 = arith.constant dense<0.000000e+00> : vector<64x32xf32>
    %61 = tpu.matmul %59, %60, %cst_32 {dimension_numbers = #tpu.dot_dimension_numbers<[1], [0], [0], [1], [0, 0, 1, 1], [], []>} : vector<64x32xbf16>, vector<32x32xbf16>, vector<64x32xf32> -> vector<64x32xf32>
    %62 = arith.addf %57, %61 : vector<64x32xf32>
    %63 = vector.extract_strided_slice %47 {offsets = [1, 0, 0], sizes = [8, 8, 32], strides = [1, 1, 1]} : vector<10x10x32xbf16> to vector<8x8x32xbf16>
    %64 = vector.shape_cast %63 : vector<8x8x32xbf16> to vector<64x32xbf16>
    %c384 = arith.constant 384 : index
    %c0_33 = arith.constant 0 : index
    %65 = vector.load %arg5[%c384, %c0_33] : memref<864x32xbf16, #tpu.memory_space<vmem>>, vector<32x32xbf16>
    %cst_34 = arith.constant dense<0.000000e+00> : vector<64x32xf32>
    %66 = tpu.matmul %64, %65, %cst_34 {dimension_numbers = #tpu.dot_dimension_numbers<[1], [0], [0], [1], [0, 0, 1, 1], [], []>} : vector<64x32xbf16>, vector<32x32xbf16>, vector<64x32xf32> -> vector<64x32xf32>
    %67 = arith.addf %62, %66 : vector<64x32xf32>
    %68 = vector.extract_strided_slice %47 {offsets = [1, 1, 0], sizes = [8, 8, 32], strides = [1, 1, 1]} : vector<10x10x32xbf16> to vector<8x8x32xbf16>
    %69 = vector.shape_cast %68 : vector<8x8x32xbf16> to vector<64x32xbf16>
    %c416 = arith.constant 416 : index
    %c0_35 = arith.constant 0 : index
    %70 = vector.load %arg5[%c416, %c0_35] : memref<864x32xbf16, #tpu.memory_space<vmem>>, vector<32x32xbf16>
    %cst_36 = arith.constant dense<0.000000e+00> : vector<64x32xf32>
    %71 = tpu.matmul %69, %70, %cst_36 {dimension_numbers = #tpu.dot_dimension_numbers<[1], [0], [0], [1], [0, 0, 1, 1], [], []>} : vector<64x32xbf16>, vector<32x32xbf16>, vector<64x32xf32> -> vector<64x32xf32>
    %72 = arith.addf %67, %71 : vector<64x32xf32>
    %73 = vector.extract_strided_slice %47 {offsets = [1, 2, 0], sizes = [8, 8, 32], strides = [1, 1, 1]} : vector<10x10x32xbf16> to vector<8x8x32xbf16>
    %74 = vector.shape_cast %73 : vector<8x8x32xbf16> to vector<64x32xbf16>
    %c448 = arith.constant 448 : index
    %c0_37 = arith.constant 0 : index
    %75 = vector.load %arg5[%c448, %c0_37] : memref<864x32xbf16, #tpu.memory_space<vmem>>, vector<32x32xbf16>
    %cst_38 = arith.constant dense<0.000000e+00> : vector<64x32xf32>
    %76 = tpu.matmul %74, %75, %cst_38 {dimension_numbers = #tpu.dot_dimension_numbers<[1], [0], [0], [1], [0, 0, 1, 1], [], []>} : vector<64x32xbf16>, vector<32x32xbf16>, vector<64x32xf32> -> vector<64x32xf32>
    %77 = arith.addf %72, %76 : vector<64x32xf32>
    %78 = vector.extract_strided_slice %47 {offsets = [2, 0, 0], sizes = [8, 8, 32], strides = [1, 1, 1]} : vector<10x10x32xbf16> to vector<8x8x32xbf16>
    %79 = vector.shape_cast %78 : vector<8x8x32xbf16> to vector<64x32xbf16>
    %c480 = arith.constant 480 : index
    %c0_39 = arith.constant 0 : index
    %80 = vector.load %arg5[%c480, %c0_39] : memref<864x32xbf16, #tpu.memory_space<vmem>>, vector<32x32xbf16>
    %cst_40 = arith.constant dense<0.000000e+00> : vector<64x32xf32>
    %81 = tpu.matmul %79, %80, %cst_40 {dimension_numbers = #tpu.dot_dimension_numbers<[1], [0], [0], [1], [0, 0, 1, 1], [], []>} : vector<64x32xbf16>, vector<32x32xbf16>, vector<64x32xf32> -> vector<64x32xf32>
    %82 = arith.addf %77, %81 : vector<64x32xf32>
    %83 = vector.extract_strided_slice %47 {offsets = [2, 1, 0], sizes = [8, 8, 32], strides = [1, 1, 1]} : vector<10x10x32xbf16> to vector<8x8x32xbf16>
    %84 = vector.shape_cast %83 : vector<8x8x32xbf16> to vector<64x32xbf16>
    %c512 = arith.constant 512 : index
    %c0_41 = arith.constant 0 : index
    %85 = vector.load %arg5[%c512, %c0_41] : memref<864x32xbf16, #tpu.memory_space<vmem>>, vector<32x32xbf16>
    %cst_42 = arith.constant dense<0.000000e+00> : vector<64x32xf32>
    %86 = tpu.matmul %84, %85, %cst_42 {dimension_numbers = #tpu.dot_dimension_numbers<[1], [0], [0], [1], [0, 0, 1, 1], [], []>} : vector<64x32xbf16>, vector<32x32xbf16>, vector<64x32xf32> -> vector<64x32xf32>
    %87 = arith.addf %82, %86 : vector<64x32xf32>
    %88 = vector.extract_strided_slice %47 {offsets = [2, 2, 0], sizes = [8, 8, 32], strides = [1, 1, 1]} : vector<10x10x32xbf16> to vector<8x8x32xbf16>
    %89 = vector.shape_cast %88 : vector<8x8x32xbf16> to vector<64x32xbf16>
    %c544 = arith.constant 544 : index
    %c0_43 = arith.constant 0 : index
    %90 = vector.load %arg5[%c544, %c0_43] : memref<864x32xbf16, #tpu.memory_space<vmem>>, vector<32x32xbf16>
    %cst_44 = arith.constant dense<0.000000e+00> : vector<64x32xf32>
    %91 = tpu.matmul %89, %90, %cst_44 {dimension_numbers = #tpu.dot_dimension_numbers<[1], [0], [0], [1], [0, 0, 1, 1], [], []>} : vector<64x32xbf16>, vector<32x32xbf16>, vector<64x32xf32> -> vector<64x32xf32>
    %92 = arith.addf %87, %91 : vector<64x32xf32>
    %c0_45 = arith.constant 0 : index
    %c0_46 = arith.constant 0 : index
    %c0_47 = arith.constant 0 : index
    %c0_48 = arith.constant 0 : index
    %c0_49 = arith.constant 0 : index
    %93 = vector.load %arg4[%c0_45, %c0_46, %c0_47, %c0_48, %c0_49] : memref<1x1x10x10x32xbf16, #tpu.memory_space<vmem>>, vector<1x1x10x10x32xbf16>
    %94 = vector.shape_cast %93 : vector<1x1x10x10x32xbf16> to vector<10x10x32xbf16>
    %95 = vector.extract_strided_slice %94 {offsets = [0, 0, 0], sizes = [8, 8, 32], strides = [1, 1, 1]} : vector<10x10x32xbf16> to vector<8x8x32xbf16>
    %96 = vector.shape_cast %95 : vector<8x8x32xbf16> to vector<64x32xbf16>
    %c576 = arith.constant 576 : index
    %c0_50 = arith.constant 0 : index
    %97 = vector.load %arg5[%c576, %c0_50] : memref<864x32xbf16, #tpu.memory_space<vmem>>, vector<32x32xbf16>
    %cst_51 = arith.constant dense<0.000000e+00> : vector<64x32xf32>
    %98 = tpu.matmul %96, %97, %cst_51 {dimension_numbers = #tpu.dot_dimension_numbers<[1], [0], [0], [1], [0, 0, 1, 1], [], []>} : vector<64x32xbf16>, vector<32x32xbf16>, vector<64x32xf32> -> vector<64x32xf32>
    %99 = arith.addf %92, %98 : vector<64x32xf32>
    %100 = vector.extract_strided_slice %94 {offsets = [0, 1, 0], sizes = [8, 8, 32], strides = [1, 1, 1]} : vector<10x10x32xbf16> to vector<8x8x32xbf16>
    %101 = vector.shape_cast %100 : vector<8x8x32xbf16> to vector<64x32xbf16>
    %c608 = arith.constant 608 : index
    %c0_52 = arith.constant 0 : index
    %102 = vector.load %arg5[%c608, %c0_52] : memref<864x32xbf16, #tpu.memory_space<vmem>>, vector<32x32xbf16>
    %cst_53 = arith.constant dense<0.000000e+00> : vector<64x32xf32>
    %103 = tpu.matmul %101, %102, %cst_53 {dimension_numbers = #tpu.dot_dimension_numbers<[1], [0], [0], [1], [0, 0, 1, 1], [], []>} : vector<64x32xbf16>, vector<32x32xbf16>, vector<64x32xf32> -> vector<64x32xf32>
    %104 = arith.addf %99, %103 : vector<64x32xf32>
    %105 = vector.extract_strided_slice %94 {offsets = [0, 2, 0], sizes = [8, 8, 32], strides = [1, 1, 1]} : vector<10x10x32xbf16> to vector<8x8x32xbf16>
    %106 = vector.shape_cast %105 : vector<8x8x32xbf16> to vector<64x32xbf16>
    %c640 = arith.constant 640 : index
    %c0_54 = arith.constant 0 : index
    %107 = vector.load %arg5[%c640, %c0_54] : memref<864x32xbf16, #tpu.memory_space<vmem>>, vector<32x32xbf16>
    %cst_55 = arith.constant dense<0.000000e+00> : vector<64x32xf32>
    %108 = tpu.matmul %106, %107, %cst_55 {dimension_numbers = #tpu.dot_dimension_numbers<[1], [0], [0], [1], [0, 0, 1, 1], [], []>} : vector<64x32xbf16>, vector<32x32xbf16>, vector<64x32xf32> -> vector<64x32xf32>
    %109 = arith.addf %104, %108 : vector<64x32xf32>
    %110 = vector.extract_strided_slice %94 {offsets = [1, 0, 0], sizes = [8, 8, 32], strides = [1, 1, 1]} : vector<10x10x32xbf16> to vector<8x8x32xbf16>
    %111 = vector.shape_cast %110 : vector<8x8x32xbf16> to vector<64x32xbf16>
    %c672 = arith.constant 672 : index
    %c0_56 = arith.constant 0 : index
    %112 = vector.load %arg5[%c672, %c0_56] : memref<864x32xbf16, #tpu.memory_space<vmem>>, vector<32x32xbf16>
    %cst_57 = arith.constant dense<0.000000e+00> : vector<64x32xf32>
    %113 = tpu.matmul %111, %112, %cst_57 {dimension_numbers = #tpu.dot_dimension_numbers<[1], [0], [0], [1], [0, 0, 1, 1], [], []>} : vector<64x32xbf16>, vector<32x32xbf16>, vector<64x32xf32> -> vector<64x32xf32>
    %114 = arith.addf %109, %113 : vector<64x32xf32>
    %115 = vector.extract_strided_slice %94 {offsets = [1, 1, 0], sizes = [8, 8, 32], strides = [1, 1, 1]} : vector<10x10x32xbf16> to vector<8x8x32xbf16>
    %116 = vector.shape_cast %115 : vector<8x8x32xbf16> to vector<64x32xbf16>
    %c704 = arith.constant 704 : index
    %c0_58 = arith.constant 0 : index
    %117 = vector.load %arg5[%c704, %c0_58] : memref<864x32xbf16, #tpu.memory_space<vmem>>, vector<32x32xbf16>
    %cst_59 = arith.constant dense<0.000000e+00> : vector<64x32xf32>
    %118 = tpu.matmul %116, %117, %cst_59 {dimension_numbers = #tpu.dot_dimension_numbers<[1], [0], [0], [1], [0, 0, 1, 1], [], []>} : vector<64x32xbf16>, vector<32x32xbf16>, vector<64x32xf32> -> vector<64x32xf32>
    %119 = arith.addf %114, %118 : vector<64x32xf32>
    %120 = vector.extract_strided_slice %94 {offsets = [1, 2, 0], sizes = [8, 8, 32], strides = [1, 1, 1]} : vector<10x10x32xbf16> to vector<8x8x32xbf16>
    %121 = vector.shape_cast %120 : vector<8x8x32xbf16> to vector<64x32xbf16>
    %c736 = arith.constant 736 : index
    %c0_60 = arith.constant 0 : index
    %122 = vector.load %arg5[%c736, %c0_60] : memref<864x32xbf16, #tpu.memory_space<vmem>>, vector<32x32xbf16>
    %cst_61 = arith.constant dense<0.000000e+00> : vector<64x32xf32>
    %123 = tpu.matmul %121, %122, %cst_61 {dimension_numbers = #tpu.dot_dimension_numbers<[1], [0], [0], [1], [0, 0, 1, 1], [], []>} : vector<64x32xbf16>, vector<32x32xbf16>, vector<64x32xf32> -> vector<64x32xf32>
    %124 = arith.addf %119, %123 : vector<64x32xf32>
    %125 = vector.extract_strided_slice %94 {offsets = [2, 0, 0], sizes = [8, 8, 32], strides = [1, 1, 1]} : vector<10x10x32xbf16> to vector<8x8x32xbf16>
    %126 = vector.shape_cast %125 : vector<8x8x32xbf16> to vector<64x32xbf16>
    %c768 = arith.constant 768 : index
    %c0_62 = arith.constant 0 : index
    %127 = vector.load %arg5[%c768, %c0_62] : memref<864x32xbf16, #tpu.memory_space<vmem>>, vector<32x32xbf16>
    %cst_63 = arith.constant dense<0.000000e+00> : vector<64x32xf32>
    %128 = tpu.matmul %126, %127, %cst_63 {dimension_numbers = #tpu.dot_dimension_numbers<[1], [0], [0], [1], [0, 0, 1, 1], [], []>} : vector<64x32xbf16>, vector<32x32xbf16>, vector<64x32xf32> -> vector<64x32xf32>
    %129 = arith.addf %124, %128 : vector<64x32xf32>
    %130 = vector.extract_strided_slice %94 {offsets = [2, 1, 0], sizes = [8, 8, 32], strides = [1, 1, 1]} : vector<10x10x32xbf16> to vector<8x8x32xbf16>
    %131 = vector.shape_cast %130 : vector<8x8x32xbf16> to vector<64x32xbf16>
    %c800 = arith.constant 800 : index
    %c0_64 = arith.constant 0 : index
    %132 = vector.load %arg5[%c800, %c0_64] : memref<864x32xbf16, #tpu.memory_space<vmem>>, vector<32x32xbf16>
    %cst_65 = arith.constant dense<0.000000e+00> : vector<64x32xf32>
    %133 = tpu.matmul %131, %132, %cst_65 {dimension_numbers = #tpu.dot_dimension_numbers<[1], [0], [0], [1], [0, 0, 1, 1], [], []>} : vector<64x32xbf16>, vector<32x32xbf16>, vector<64x32xf32> -> vector<64x32xf32>
    %134 = arith.addf %129, %133 : vector<64x32xf32>
    %135 = vector.extract_strided_slice %94 {offsets = [2, 2, 0], sizes = [8, 8, 32], strides = [1, 1, 1]} : vector<10x10x32xbf16> to vector<8x8x32xbf16>
    %136 = vector.shape_cast %135 : vector<8x8x32xbf16> to vector<64x32xbf16>
    %c832 = arith.constant 832 : index
    %c0_66 = arith.constant 0 : index
    %137 = vector.load %arg5[%c832, %c0_66] : memref<864x32xbf16, #tpu.memory_space<vmem>>, vector<32x32xbf16>
    %cst_67 = arith.constant dense<0.000000e+00> : vector<64x32xf32>
    %138 = tpu.matmul %136, %137, %cst_67 {dimension_numbers = #tpu.dot_dimension_numbers<[1], [0], [0], [1], [0, 0, 1, 1], [], []>} : vector<64x32xbf16>, vector<32x32xbf16>, vector<64x32xf32> -> vector<64x32xf32>
    %139 = arith.addf %134, %138 : vector<64x32xf32>
    %c0_68 = arith.constant 0 : index
    %c0_69 = arith.constant 0 : index
    %140 = vector.load %arg6[%c0_68, %c0_69] : memref<1x32xf32, #tpu.memory_space<vmem>>, vector<1x32xf32>
    %141 = vector.broadcast %140 : vector<1x32xf32> to vector<64x32xf32>
    %142 = arith.mulf %139, %141 : vector<64x32xf32>
    %c0_70 = arith.constant 0 : index
    %c0_71 = arith.constant 0 : index
    %143 = vector.load %arg7[%c0_70, %c0_71] : memref<1x32xf32, #tpu.memory_space<vmem>>, vector<1x32xf32>
    %144 = vector.broadcast %143 : vector<1x32xf32> to vector<64x32xf32>
    %145 = arith.addf %142, %144 : vector<64x32xf32>
    %cst_72 = arith.constant 0.000000e+00 : f32
    %146 = vector.broadcast %cst_72 : f32 to vector<64x32xf32>
    %147 = arith.maximumf %145, %146 : vector<64x32xf32>
    %148 = arith.truncf %147 : vector<64x32xf32> to vector<64x32xbf16>
    %c0_73 = arith.constant 0 : index
    %c0_74 = arith.constant 0 : index
    %c0_75 = arith.constant 0 : index
    %c0_76 = arith.constant 0 : index
    %149 = vector.load %arg8[%c0_73, %c0_74, %c0_75, %c0_76] : memref<1x1x64x32xbf16, #tpu.memory_space<vmem>>, vector<1x1x64x32xbf16>
    %150 = vector.shape_cast %149 : vector<1x1x64x32xbf16> to vector<64x32xbf16>
    %151 = vector.shape_cast %148 : vector<64x32xbf16> to vector<1x1x64x32xbf16>
    tpu.vector_store %arg8[%c0_73, %c0_74, %c0_75, %c0_76], %151 {strides = array<i32>} : memref<1x1x64x32xbf16, #tpu.memory_space<vmem>>, vector<1x1x64x32xbf16>,
    return
  }
  func.func @transform_0(%arg0: i32, %arg1: i32) -> (i32, i32, i32, i32, i32) {
    %c0_i32 = arith.constant 0 : i32
    %c0_i32_0 = arith.constant 0 : i32
    %c0_i32_1 = arith.constant 0 : i32
    %c0_i32_2 = arith.constant 0 : i32
    return %arg0, %arg1, %c0_i32, %c0_i32_0, %c0_i32_1 : i32, i32, i32, i32, i32
  }
  func.func @transform_1(%arg0: i32, %arg1: i32) -> (i32, i32, i32, i32, i32) {
    %c1_i32 = arith.constant 1 : i32
    %0 = arith.addi %arg1, %c1_i32 : i32
    %c0_i32 = arith.constant 0 : i32
    %c0_i32_0 = arith.constant 0 : i32
    %c0_i32_1 = arith.constant 0 : i32
    %c0_i32_2 = arith.constant 0 : i32
    return %arg0, %0, %c0_i32, %c0_i32_0, %c0_i32_1 : i32, i32, i32, i32, i32
  }
  func.func @transform_2(%arg0: i32, %arg1: i32) -> (i32, i32, i32, i32, i32) {
    %c2_i32 = arith.constant 2 : i32
    %0 = arith.addi %arg1, %c2_i32 : i32
    %c0_i32 = arith.constant 0 : i32
    %c0_i32_0 = arith.constant 0 : i32
    %c0_i32_1 = arith.constant 0 : i32
    %c0_i32_2 = arith.constant 0 : i32
    return %arg0, %0, %c0_i32, %c0_i32_0, %c0_i32_1 : i32, i32, i32, i32, i32
  }
  func.func @transform_3(%arg0: i32, %arg1: i32) -> (i32, i32) {
    %c0_i32 = arith.constant 0 : i32
    %c0_i32_0 = arith.constant 0 : i32
    %c0_i32_1 = arith.constant 0 : i32
    return %c0_i32, %c0_i32_0 : i32, i32
  }
  func.func @transform_4(%arg0: i32, %arg1: i32) -> (i32, i32) {
    %c0_i32 = arith.constant 0 : i32
    %c0_i32_0 = arith.constant 0 : i32
    %c0_i32_1 = arith.constant 0 : i32
    return %c0_i32, %c0_i32_0 : i32, i32
  }
  func.func @transform_5(%arg0: i32, %arg1: i32) -> (i32, i32) {
    %c0_i32 = arith.constant 0 : i32
    %c0_i32_0 = arith.constant 0 : i32
    %c0_i32_1 = arith.constant 0 : i32
    return %c0_i32, %c0_i32_0 : i32, i32
  }
  func.func @transform_6(%arg0: i32, %arg1: i32) -> (i32, i32, i32, i32) {
    %c0_i32 = arith.constant 0 : i32
    %c0_i32_0 = arith.constant 0 : i32
    %c0_i32_1 = arith.constant 0 : i32
    return %arg0, %arg1, %c0_i32, %c0_i32_0 : i32, i32, i32, i32
  }
}

module attributes {stable_mosaic.version = 11 : i64} {
  func.func @_gated_maps_kernel(%arg0: i32, %arg1: i32, %arg2: memref<1x1x64x32xbf16, #tpu.memory_space<vmem>>, %arg3: memref<1x1x32xf32, #tpu.memory_space<vmem>>, %arg4: memref<1x1x64x2xf32, #tpu.memory_space<vmem>>) attributes {dimension_semantics = [#tpu.dimension_semantics<parallel>, #tpu.dimension_semantics<parallel>], iteration_bounds = array<i64: 2, 4>, scalar_prefetch = 0 : i64, scratch_operands = 0 : i64, tpu.core_type = #tpu.core_type<tc>, window_params = [{transform_indices = @transform_0, window_bounds = array<i64: 1, 1, 64, 32>}, {transform_indices = @transform_1, window_bounds = array<i64: 1, 1, 32>}, {transform_indices = @transform_2, window_bounds = array<i64: 1, 1, 64, 2>}]} {
    %c0 = arith.constant 0 : index
    %c0_0 = arith.constant 0 : index
    %c0_1 = arith.constant 0 : index
    %c0_2 = arith.constant 0 : index
    %0 = vector.load %arg2[%c0, %c0_0, %c0_1, %c0_2] : memref<1x1x64x32xbf16, #tpu.memory_space<vmem>>, vector<1x1x64x32xbf16>
    %1 = vector.shape_cast %0 : vector<1x1x64x32xbf16> to vector<64x32xbf16>
    %2 = arith.extf %1 : vector<64x32xbf16> to vector<64x32xf32>
    %c0_3 = arith.constant 0 : index
    %c0_4 = arith.constant 0 : index
    %c0_5 = arith.constant 0 : index
    %3 = vector.load %arg3[%c0_3, %c0_4, %c0_5] : memref<1x1x32xf32, #tpu.memory_space<vmem>>, vector<1x1x32xf32>
    %4 = vector.shape_cast %3 : vector<1x1x32xf32> to vector<1x32xf32>
    %5 = vector.broadcast %4 : vector<1x32xf32> to vector<64x32xf32>
    %6 = arith.mulf %2, %5 : vector<64x32xf32>
    %cst = arith.constant dense<0.000000e+00> : vector<64xf32>
    %7 = vector.multi_reduction <add>, %6, %cst [1] : vector<64x32xf32> to vector<64xf32>
    %8 = vector.shape_cast %7 : vector<64xf32> to vector<64x1xf32>
    %cst_6 = arith.constant 3.125000e-02 : f32
    %9 = vector.broadcast %cst_6 : f32 to vector<64x1xf32>
    %10 = arith.mulf %8, %9 : vector<64x1xf32>
    %cst_7 = arith.constant dense<0xFF800000> : vector<64xf32>
    %11 = vector.multi_reduction <maximumf>, %6, %cst_7 [1] : vector<64x32xf32> to vector<64xf32>
    %12 = vector.shape_cast %11 : vector<64xf32> to vector<64x1xf32>
    %13 = tpu.concatenate %10, %12 in 1 : vector<64x1xf32>, vector<64x1xf32> -> vector<64x2xf32>
    %c0_8 = arith.constant 0 : index
    %c0_9 = arith.constant 0 : index
    %c0_10 = arith.constant 0 : index
    %c0_11 = arith.constant 0 : index
    %14 = vector.load %arg4[%c0_8, %c0_9, %c0_10, %c0_11] : memref<1x1x64x2xf32, #tpu.memory_space<vmem>>, vector<1x1x64x2xf32>
    %15 = vector.shape_cast %14 : vector<1x1x64x2xf32> to vector<64x2xf32>
    %16 = vector.shape_cast %13 : vector<64x2xf32> to vector<1x1x64x2xf32>
    tpu.vector_store %arg4[%c0_8, %c0_9, %c0_10, %c0_11], %16 {strides = array<i32>} : memref<1x1x64x2xf32, #tpu.memory_space<vmem>>, vector<1x1x64x2xf32>,
    return
  }
  func.func @transform_0(%arg0: i32, %arg1: i32) -> (i32, i32, i32, i32) {
    %c0_i32 = arith.constant 0 : i32
    %c0_i32_0 = arith.constant 0 : i32
    %c0_i32_1 = arith.constant 0 : i32
    return %arg0, %arg1, %c0_i32, %c0_i32_0 : i32, i32, i32, i32
  }
  func.func @transform_1(%arg0: i32, %arg1: i32) -> (i32, i32, i32) {
    %c0_i32 = arith.constant 0 : i32
    %c0_i32_0 = arith.constant 0 : i32
    %c0_i32_1 = arith.constant 0 : i32
    return %arg0, %c0_i32, %c0_i32_0 : i32, i32, i32
  }
  func.func @transform_2(%arg0: i32, %arg1: i32) -> (i32, i32, i32, i32) {
    %c0_i32 = arith.constant 0 : i32
    %c0_i32_0 = arith.constant 0 : i32
    %c0_i32_1 = arith.constant 0 : i32
    return %arg0, %arg1, %c0_i32, %c0_i32_0 : i32, i32, i32, i32
  }
}

module attributes {stable_mosaic.version = 11 : i64} {
  func.func @_conv_bn_ca_kernel(%arg0: i32, %arg1: i32, %arg2: memref<1x1x10x10x32xbf16, #tpu.memory_space<vmem>>, %arg3: memref<1x1x10x10x32xbf16, #tpu.memory_space<vmem>>, %arg4: memref<1x1x10x10x32xbf16, #tpu.memory_space<vmem>>, %arg5: memref<864x32xbf16, #tpu.memory_space<vmem>>, %arg6: memref<1x32xf32, #tpu.memory_space<vmem>>, %arg7: memref<1x32xf32, #tpu.memory_space<vmem>>, %arg8: memref<2x32xf32, #tpu.memory_space<vmem>>, %arg9: memref<2x32xf32, #tpu.memory_space<vmem>>, %arg10: memref<1x1x64x32xbf16, #tpu.memory_space<vmem>>, %arg11: memref<1x1x32xf32, #tpu.memory_space<vmem>>, %arg12: memref<1x32xf32, #tpu.memory_space<vmem>>, %arg13: memref<1x32xf32, #tpu.memory_space<vmem>>) attributes {dimension_semantics = [#tpu.dimension_semantics<parallel>, #tpu.dimension_semantics<arbitrary>], iteration_bounds = array<i64: 2, 4>, scalar_prefetch = 0 : i64, scratch_operands = 2 : i64, tpu.core_type = #tpu.core_type<tc>, window_params = [{transform_indices = @transform_0, window_bounds = array<i64: 1, 1, 10, 10, 32>}, {transform_indices = @transform_1, window_bounds = array<i64: 1, 1, 10, 10, 32>}, {transform_indices = @transform_2, window_bounds = array<i64: 1, 1, 10, 10, 32>}, {pipeline_mode = #tpu.pipeline_mode<synchronous>, transform_indices = @transform_3, window_bounds = array<i64: 864, 32>}, {pipeline_mode = #tpu.pipeline_mode<synchronous>, transform_indices = @transform_4, window_bounds = array<i64: 1, 32>}, {pipeline_mode = #tpu.pipeline_mode<synchronous>, transform_indices = @transform_5, window_bounds = array<i64: 1, 32>}, {pipeline_mode = #tpu.pipeline_mode<synchronous>, transform_indices = @transform_6, window_bounds = array<i64: 2, 32>}, {pipeline_mode = #tpu.pipeline_mode<synchronous>, transform_indices = @transform_7, window_bounds = array<i64: 2, 32>}, {transform_indices = @transform_8, window_bounds = array<i64: 1, 1, 64, 32>}, {transform_indices = @transform_9, window_bounds = array<i64: 1, 1, 32>}]} {
    %c0 = arith.constant 0 : index
    %c0_0 = arith.constant 0 : index
    %c0_1 = arith.constant 0 : index
    %c0_2 = arith.constant 0 : index
    %c0_3 = arith.constant 0 : index
    %0 = vector.load %arg2[%c0, %c0_0, %c0_1, %c0_2, %c0_3] : memref<1x1x10x10x32xbf16, #tpu.memory_space<vmem>>, vector<1x1x10x10x32xbf16>
    %1 = vector.shape_cast %0 : vector<1x1x10x10x32xbf16> to vector<10x10x32xbf16>
    %2 = vector.extract_strided_slice %1 {offsets = [0, 0, 0], sizes = [8, 8, 32], strides = [1, 1, 1]} : vector<10x10x32xbf16> to vector<8x8x32xbf16>
    %3 = vector.shape_cast %2 : vector<8x8x32xbf16> to vector<64x32xbf16>
    %c0_4 = arith.constant 0 : index
    %c0_5 = arith.constant 0 : index
    %4 = vector.load %arg5[%c0_4, %c0_5] : memref<864x32xbf16, #tpu.memory_space<vmem>>, vector<32x32xbf16>
    %cst = arith.constant dense<0.000000e+00> : vector<64x32xf32>
    %5 = tpu.matmul %3, %4, %cst {dimension_numbers = #tpu.dot_dimension_numbers<[1], [0], [0], [1], [0, 0, 1, 1], [], []>} : vector<64x32xbf16>, vector<32x32xbf16>, vector<64x32xf32> -> vector<64x32xf32>
    %6 = vector.extract_strided_slice %1 {offsets = [0, 1, 0], sizes = [8, 8, 32], strides = [1, 1, 1]} : vector<10x10x32xbf16> to vector<8x8x32xbf16>
    %7 = vector.shape_cast %6 : vector<8x8x32xbf16> to vector<64x32xbf16>
    %c32 = arith.constant 32 : index
    %c0_6 = arith.constant 0 : index
    %8 = vector.load %arg5[%c32, %c0_6] : memref<864x32xbf16, #tpu.memory_space<vmem>>, vector<32x32xbf16>
    %cst_7 = arith.constant dense<0.000000e+00> : vector<64x32xf32>
    %9 = tpu.matmul %7, %8, %cst_7 {dimension_numbers = #tpu.dot_dimension_numbers<[1], [0], [0], [1], [0, 0, 1, 1], [], []>} : vector<64x32xbf16>, vector<32x32xbf16>, vector<64x32xf32> -> vector<64x32xf32>
    %10 = arith.addf %5, %9 : vector<64x32xf32>
    %11 = vector.extract_strided_slice %1 {offsets = [0, 2, 0], sizes = [8, 8, 32], strides = [1, 1, 1]} : vector<10x10x32xbf16> to vector<8x8x32xbf16>
    %12 = vector.shape_cast %11 : vector<8x8x32xbf16> to vector<64x32xbf16>
    %c64 = arith.constant 64 : index
    %c0_8 = arith.constant 0 : index
    %13 = vector.load %arg5[%c64, %c0_8] : memref<864x32xbf16, #tpu.memory_space<vmem>>, vector<32x32xbf16>
    %cst_9 = arith.constant dense<0.000000e+00> : vector<64x32xf32>
    %14 = tpu.matmul %12, %13, %cst_9 {dimension_numbers = #tpu.dot_dimension_numbers<[1], [0], [0], [1], [0, 0, 1, 1], [], []>} : vector<64x32xbf16>, vector<32x32xbf16>, vector<64x32xf32> -> vector<64x32xf32>
    %15 = arith.addf %10, %14 : vector<64x32xf32>
    %16 = vector.extract_strided_slice %1 {offsets = [1, 0, 0], sizes = [8, 8, 32], strides = [1, 1, 1]} : vector<10x10x32xbf16> to vector<8x8x32xbf16>
    %17 = vector.shape_cast %16 : vector<8x8x32xbf16> to vector<64x32xbf16>
    %c96 = arith.constant 96 : index
    %c0_10 = arith.constant 0 : index
    %18 = vector.load %arg5[%c96, %c0_10] : memref<864x32xbf16, #tpu.memory_space<vmem>>, vector<32x32xbf16>
    %cst_11 = arith.constant dense<0.000000e+00> : vector<64x32xf32>
    %19 = tpu.matmul %17, %18, %cst_11 {dimension_numbers = #tpu.dot_dimension_numbers<[1], [0], [0], [1], [0, 0, 1, 1], [], []>} : vector<64x32xbf16>, vector<32x32xbf16>, vector<64x32xf32> -> vector<64x32xf32>
    %20 = arith.addf %15, %19 : vector<64x32xf32>
    %21 = vector.extract_strided_slice %1 {offsets = [1, 1, 0], sizes = [8, 8, 32], strides = [1, 1, 1]} : vector<10x10x32xbf16> to vector<8x8x32xbf16>
    %22 = vector.shape_cast %21 : vector<8x8x32xbf16> to vector<64x32xbf16>
    %c128 = arith.constant 128 : index
    %c0_12 = arith.constant 0 : index
    %23 = vector.load %arg5[%c128, %c0_12] : memref<864x32xbf16, #tpu.memory_space<vmem>>, vector<32x32xbf16>
    %cst_13 = arith.constant dense<0.000000e+00> : vector<64x32xf32>
    %24 = tpu.matmul %22, %23, %cst_13 {dimension_numbers = #tpu.dot_dimension_numbers<[1], [0], [0], [1], [0, 0, 1, 1], [], []>} : vector<64x32xbf16>, vector<32x32xbf16>, vector<64x32xf32> -> vector<64x32xf32>
    %25 = arith.addf %20, %24 : vector<64x32xf32>
    %26 = vector.extract_strided_slice %1 {offsets = [1, 2, 0], sizes = [8, 8, 32], strides = [1, 1, 1]} : vector<10x10x32xbf16> to vector<8x8x32xbf16>
    %27 = vector.shape_cast %26 : vector<8x8x32xbf16> to vector<64x32xbf16>
    %c160 = arith.constant 160 : index
    %c0_14 = arith.constant 0 : index
    %28 = vector.load %arg5[%c160, %c0_14] : memref<864x32xbf16, #tpu.memory_space<vmem>>, vector<32x32xbf16>
    %cst_15 = arith.constant dense<0.000000e+00> : vector<64x32xf32>
    %29 = tpu.matmul %27, %28, %cst_15 {dimension_numbers = #tpu.dot_dimension_numbers<[1], [0], [0], [1], [0, 0, 1, 1], [], []>} : vector<64x32xbf16>, vector<32x32xbf16>, vector<64x32xf32> -> vector<64x32xf32>
    %30 = arith.addf %25, %29 : vector<64x32xf32>
    %31 = vector.extract_strided_slice %1 {offsets = [2, 0, 0], sizes = [8, 8, 32], strides = [1, 1, 1]} : vector<10x10x32xbf16> to vector<8x8x32xbf16>
    %32 = vector.shape_cast %31 : vector<8x8x32xbf16> to vector<64x32xbf16>
    %c192 = arith.constant 192 : index
    %c0_16 = arith.constant 0 : index
    %33 = vector.load %arg5[%c192, %c0_16] : memref<864x32xbf16, #tpu.memory_space<vmem>>, vector<32x32xbf16>
    %cst_17 = arith.constant dense<0.000000e+00> : vector<64x32xf32>
    %34 = tpu.matmul %32, %33, %cst_17 {dimension_numbers = #tpu.dot_dimension_numbers<[1], [0], [0], [1], [0, 0, 1, 1], [], []>} : vector<64x32xbf16>, vector<32x32xbf16>, vector<64x32xf32> -> vector<64x32xf32>
    %35 = arith.addf %30, %34 : vector<64x32xf32>
    %36 = vector.extract_strided_slice %1 {offsets = [2, 1, 0], sizes = [8, 8, 32], strides = [1, 1, 1]} : vector<10x10x32xbf16> to vector<8x8x32xbf16>
    %37 = vector.shape_cast %36 : vector<8x8x32xbf16> to vector<64x32xbf16>
    %c224 = arith.constant 224 : index
    %c0_18 = arith.constant 0 : index
    %38 = vector.load %arg5[%c224, %c0_18] : memref<864x32xbf16, #tpu.memory_space<vmem>>, vector<32x32xbf16>
    %cst_19 = arith.constant dense<0.000000e+00> : vector<64x32xf32>
    %39 = tpu.matmul %37, %38, %cst_19 {dimension_numbers = #tpu.dot_dimension_numbers<[1], [0], [0], [1], [0, 0, 1, 1], [], []>} : vector<64x32xbf16>, vector<32x32xbf16>, vector<64x32xf32> -> vector<64x32xf32>
    %40 = arith.addf %35, %39 : vector<64x32xf32>
    %41 = vector.extract_strided_slice %1 {offsets = [2, 2, 0], sizes = [8, 8, 32], strides = [1, 1, 1]} : vector<10x10x32xbf16> to vector<8x8x32xbf16>
    %42 = vector.shape_cast %41 : vector<8x8x32xbf16> to vector<64x32xbf16>
    %c256 = arith.constant 256 : index
    %c0_20 = arith.constant 0 : index
    %43 = vector.load %arg5[%c256, %c0_20] : memref<864x32xbf16, #tpu.memory_space<vmem>>, vector<32x32xbf16>
    %cst_21 = arith.constant dense<0.000000e+00> : vector<64x32xf32>
    %44 = tpu.matmul %42, %43, %cst_21 {dimension_numbers = #tpu.dot_dimension_numbers<[1], [0], [0], [1], [0, 0, 1, 1], [], []>} : vector<64x32xbf16>, vector<32x32xbf16>, vector<64x32xf32> -> vector<64x32xf32>
    %45 = arith.addf %40, %44 : vector<64x32xf32>
    %c0_22 = arith.constant 0 : index
    %c0_23 = arith.constant 0 : index
    %c0_24 = arith.constant 0 : index
    %c0_25 = arith.constant 0 : index
    %c0_26 = arith.constant 0 : index
    %46 = vector.load %arg3[%c0_22, %c0_23, %c0_24, %c0_25, %c0_26] : memref<1x1x10x10x32xbf16, #tpu.memory_space<vmem>>, vector<1x1x10x10x32xbf16>
    %47 = vector.shape_cast %46 : vector<1x1x10x10x32xbf16> to vector<10x10x32xbf16>
    %48 = vector.extract_strided_slice %47 {offsets = [0, 0, 0], sizes = [8, 8, 32], strides = [1, 1, 1]} : vector<10x10x32xbf16> to vector<8x8x32xbf16>
    %49 = vector.shape_cast %48 : vector<8x8x32xbf16> to vector<64x32xbf16>
    %c288 = arith.constant 288 : index
    %c0_27 = arith.constant 0 : index
    %50 = vector.load %arg5[%c288, %c0_27] : memref<864x32xbf16, #tpu.memory_space<vmem>>, vector<32x32xbf16>
    %cst_28 = arith.constant dense<0.000000e+00> : vector<64x32xf32>
    %51 = tpu.matmul %49, %50, %cst_28 {dimension_numbers = #tpu.dot_dimension_numbers<[1], [0], [0], [1], [0, 0, 1, 1], [], []>} : vector<64x32xbf16>, vector<32x32xbf16>, vector<64x32xf32> -> vector<64x32xf32>
    %52 = arith.addf %45, %51 : vector<64x32xf32>
    %53 = vector.extract_strided_slice %47 {offsets = [0, 1, 0], sizes = [8, 8, 32], strides = [1, 1, 1]} : vector<10x10x32xbf16> to vector<8x8x32xbf16>
    %54 = vector.shape_cast %53 : vector<8x8x32xbf16> to vector<64x32xbf16>
    %c320 = arith.constant 320 : index
    %c0_29 = arith.constant 0 : index
    %55 = vector.load %arg5[%c320, %c0_29] : memref<864x32xbf16, #tpu.memory_space<vmem>>, vector<32x32xbf16>
    %cst_30 = arith.constant dense<0.000000e+00> : vector<64x32xf32>
    %56 = tpu.matmul %54, %55, %cst_30 {dimension_numbers = #tpu.dot_dimension_numbers<[1], [0], [0], [1], [0, 0, 1, 1], [], []>} : vector<64x32xbf16>, vector<32x32xbf16>, vector<64x32xf32> -> vector<64x32xf32>
    %57 = arith.addf %52, %56 : vector<64x32xf32>
    %58 = vector.extract_strided_slice %47 {offsets = [0, 2, 0], sizes = [8, 8, 32], strides = [1, 1, 1]} : vector<10x10x32xbf16> to vector<8x8x32xbf16>
    %59 = vector.shape_cast %58 : vector<8x8x32xbf16> to vector<64x32xbf16>
    %c352 = arith.constant 352 : index
    %c0_31 = arith.constant 0 : index
    %60 = vector.load %arg5[%c352, %c0_31] : memref<864x32xbf16, #tpu.memory_space<vmem>>, vector<32x32xbf16>
    %cst_32 = arith.constant dense<0.000000e+00> : vector<64x32xf32>
    %61 = tpu.matmul %59, %60, %cst_32 {dimension_numbers = #tpu.dot_dimension_numbers<[1], [0], [0], [1], [0, 0, 1, 1], [], []>} : vector<64x32xbf16>, vector<32x32xbf16>, vector<64x32xf32> -> vector<64x32xf32>
    %62 = arith.addf %57, %61 : vector<64x32xf32>
    %63 = vector.extract_strided_slice %47 {offsets = [1, 0, 0], sizes = [8, 8, 32], strides = [1, 1, 1]} : vector<10x10x32xbf16> to vector<8x8x32xbf16>
    %64 = vector.shape_cast %63 : vector<8x8x32xbf16> to vector<64x32xbf16>
    %c384 = arith.constant 384 : index
    %c0_33 = arith.constant 0 : index
    %65 = vector.load %arg5[%c384, %c0_33] : memref<864x32xbf16, #tpu.memory_space<vmem>>, vector<32x32xbf16>
    %cst_34 = arith.constant dense<0.000000e+00> : vector<64x32xf32>
    %66 = tpu.matmul %64, %65, %cst_34 {dimension_numbers = #tpu.dot_dimension_numbers<[1], [0], [0], [1], [0, 0, 1, 1], [], []>} : vector<64x32xbf16>, vector<32x32xbf16>, vector<64x32xf32> -> vector<64x32xf32>
    %67 = arith.addf %62, %66 : vector<64x32xf32>
    %68 = vector.extract_strided_slice %47 {offsets = [1, 1, 0], sizes = [8, 8, 32], strides = [1, 1, 1]} : vector<10x10x32xbf16> to vector<8x8x32xbf16>
    %69 = vector.shape_cast %68 : vector<8x8x32xbf16> to vector<64x32xbf16>
    %c416 = arith.constant 416 : index
    %c0_35 = arith.constant 0 : index
    %70 = vector.load %arg5[%c416, %c0_35] : memref<864x32xbf16, #tpu.memory_space<vmem>>, vector<32x32xbf16>
    %cst_36 = arith.constant dense<0.000000e+00> : vector<64x32xf32>
    %71 = tpu.matmul %69, %70, %cst_36 {dimension_numbers = #tpu.dot_dimension_numbers<[1], [0], [0], [1], [0, 0, 1, 1], [], []>} : vector<64x32xbf16>, vector<32x32xbf16>, vector<64x32xf32> -> vector<64x32xf32>
    %72 = arith.addf %67, %71 : vector<64x32xf32>
    %73 = vector.extract_strided_slice %47 {offsets = [1, 2, 0], sizes = [8, 8, 32], strides = [1, 1, 1]} : vector<10x10x32xbf16> to vector<8x8x32xbf16>
    %74 = vector.shape_cast %73 : vector<8x8x32xbf16> to vector<64x32xbf16>
    %c448 = arith.constant 448 : index
    %c0_37 = arith.constant 0 : index
    %75 = vector.load %arg5[%c448, %c0_37] : memref<864x32xbf16, #tpu.memory_space<vmem>>, vector<32x32xbf16>
    %cst_38 = arith.constant dense<0.000000e+00> : vector<64x32xf32>
    %76 = tpu.matmul %74, %75, %cst_38 {dimension_numbers = #tpu.dot_dimension_numbers<[1], [0], [0], [1], [0, 0, 1, 1], [], []>} : vector<64x32xbf16>, vector<32x32xbf16>, vector<64x32xf32> -> vector<64x32xf32>
    %77 = arith.addf %72, %76 : vector<64x32xf32>
    %78 = vector.extract_strided_slice %47 {offsets = [2, 0, 0], sizes = [8, 8, 32], strides = [1, 1, 1]} : vector<10x10x32xbf16> to vector<8x8x32xbf16>
    %79 = vector.shape_cast %78 : vector<8x8x32xbf16> to vector<64x32xbf16>
    %c480 = arith.constant 480 : index
    %c0_39 = arith.constant 0 : index
    %80 = vector.load %arg5[%c480, %c0_39] : memref<864x32xbf16, #tpu.memory_space<vmem>>, vector<32x32xbf16>
    %cst_40 = arith.constant dense<0.000000e+00> : vector<64x32xf32>
    %81 = tpu.matmul %79, %80, %cst_40 {dimension_numbers = #tpu.dot_dimension_numbers<[1], [0], [0], [1], [0, 0, 1, 1], [], []>} : vector<64x32xbf16>, vector<32x32xbf16>, vector<64x32xf32> -> vector<64x32xf32>
    %82 = arith.addf %77, %81 : vector<64x32xf32>
    %83 = vector.extract_strided_slice %47 {offsets = [2, 1, 0], sizes = [8, 8, 32], strides = [1, 1, 1]} : vector<10x10x32xbf16> to vector<8x8x32xbf16>
    %84 = vector.shape_cast %83 : vector<8x8x32xbf16> to vector<64x32xbf16>
    %c512 = arith.constant 512 : index
    %c0_41 = arith.constant 0 : index
    %85 = vector.load %arg5[%c512, %c0_41] : memref<864x32xbf16, #tpu.memory_space<vmem>>, vector<32x32xbf16>
    %cst_42 = arith.constant dense<0.000000e+00> : vector<64x32xf32>
    %86 = tpu.matmul %84, %85, %cst_42 {dimension_numbers = #tpu.dot_dimension_numbers<[1], [0], [0], [1], [0, 0, 1, 1], [], []>} : vector<64x32xbf16>, vector<32x32xbf16>, vector<64x32xf32> -> vector<64x32xf32>
    %87 = arith.addf %82, %86 : vector<64x32xf32>
    %88 = vector.extract_strided_slice %47 {offsets = [2, 2, 0], sizes = [8, 8, 32], strides = [1, 1, 1]} : vector<10x10x32xbf16> to vector<8x8x32xbf16>
    %89 = vector.shape_cast %88 : vector<8x8x32xbf16> to vector<64x32xbf16>
    %c544 = arith.constant 544 : index
    %c0_43 = arith.constant 0 : index
    %90 = vector.load %arg5[%c544, %c0_43] : memref<864x32xbf16, #tpu.memory_space<vmem>>, vector<32x32xbf16>
    %cst_44 = arith.constant dense<0.000000e+00> : vector<64x32xf32>
    %91 = tpu.matmul %89, %90, %cst_44 {dimension_numbers = #tpu.dot_dimension_numbers<[1], [0], [0], [1], [0, 0, 1, 1], [], []>} : vector<64x32xbf16>, vector<32x32xbf16>, vector<64x32xf32> -> vector<64x32xf32>
    %92 = arith.addf %87, %91 : vector<64x32xf32>
    %c0_45 = arith.constant 0 : index
    %c0_46 = arith.constant 0 : index
    %c0_47 = arith.constant 0 : index
    %c0_48 = arith.constant 0 : index
    %c0_49 = arith.constant 0 : index
    %93 = vector.load %arg4[%c0_45, %c0_46, %c0_47, %c0_48, %c0_49] : memref<1x1x10x10x32xbf16, #tpu.memory_space<vmem>>, vector<1x1x10x10x32xbf16>
    %94 = vector.shape_cast %93 : vector<1x1x10x10x32xbf16> to vector<10x10x32xbf16>
    %95 = vector.extract_strided_slice %94 {offsets = [0, 0, 0], sizes = [8, 8, 32], strides = [1, 1, 1]} : vector<10x10x32xbf16> to vector<8x8x32xbf16>
    %96 = vector.shape_cast %95 : vector<8x8x32xbf16> to vector<64x32xbf16>
    %c576 = arith.constant 576 : index
    %c0_50 = arith.constant 0 : index
    %97 = vector.load %arg5[%c576, %c0_50] : memref<864x32xbf16, #tpu.memory_space<vmem>>, vector<32x32xbf16>
    %cst_51 = arith.constant dense<0.000000e+00> : vector<64x32xf32>
    %98 = tpu.matmul %96, %97, %cst_51 {dimension_numbers = #tpu.dot_dimension_numbers<[1], [0], [0], [1], [0, 0, 1, 1], [], []>} : vector<64x32xbf16>, vector<32x32xbf16>, vector<64x32xf32> -> vector<64x32xf32>
    %99 = arith.addf %92, %98 : vector<64x32xf32>
    %100 = vector.extract_strided_slice %94 {offsets = [0, 1, 0], sizes = [8, 8, 32], strides = [1, 1, 1]} : vector<10x10x32xbf16> to vector<8x8x32xbf16>
    %101 = vector.shape_cast %100 : vector<8x8x32xbf16> to vector<64x32xbf16>
    %c608 = arith.constant 608 : index
    %c0_52 = arith.constant 0 : index
    %102 = vector.load %arg5[%c608, %c0_52] : memref<864x32xbf16, #tpu.memory_space<vmem>>, vector<32x32xbf16>
    %cst_53 = arith.constant dense<0.000000e+00> : vector<64x32xf32>
    %103 = tpu.matmul %101, %102, %cst_53 {dimension_numbers = #tpu.dot_dimension_numbers<[1], [0], [0], [1], [0, 0, 1, 1], [], []>} : vector<64x32xbf16>, vector<32x32xbf16>, vector<64x32xf32> -> vector<64x32xf32>
    %104 = arith.addf %99, %103 : vector<64x32xf32>
    %105 = vector.extract_strided_slice %94 {offsets = [0, 2, 0], sizes = [8, 8, 32], strides = [1, 1, 1]} : vector<10x10x32xbf16> to vector<8x8x32xbf16>
    %106 = vector.shape_cast %105 : vector<8x8x32xbf16> to vector<64x32xbf16>
    %c640 = arith.constant 640 : index
    %c0_54 = arith.constant 0 : index
    %107 = vector.load %arg5[%c640, %c0_54] : memref<864x32xbf16, #tpu.memory_space<vmem>>, vector<32x32xbf16>
    %cst_55 = arith.constant dense<0.000000e+00> : vector<64x32xf32>
    %108 = tpu.matmul %106, %107, %cst_55 {dimension_numbers = #tpu.dot_dimension_numbers<[1], [0], [0], [1], [0, 0, 1, 1], [], []>} : vector<64x32xbf16>, vector<32x32xbf16>, vector<64x32xf32> -> vector<64x32xf32>
    %109 = arith.addf %104, %108 : vector<64x32xf32>
    %110 = vector.extract_strided_slice %94 {offsets = [1, 0, 0], sizes = [8, 8, 32], strides = [1, 1, 1]} : vector<10x10x32xbf16> to vector<8x8x32xbf16>
    %111 = vector.shape_cast %110 : vector<8x8x32xbf16> to vector<64x32xbf16>
    %c672 = arith.constant 672 : index
    %c0_56 = arith.constant 0 : index
    %112 = vector.load %arg5[%c672, %c0_56] : memref<864x32xbf16, #tpu.memory_space<vmem>>, vector<32x32xbf16>
    %cst_57 = arith.constant dense<0.000000e+00> : vector<64x32xf32>
    %113 = tpu.matmul %111, %112, %cst_57 {dimension_numbers = #tpu.dot_dimension_numbers<[1], [0], [0], [1], [0, 0, 1, 1], [], []>} : vector<64x32xbf16>, vector<32x32xbf16>, vector<64x32xf32> -> vector<64x32xf32>
    %114 = arith.addf %109, %113 : vector<64x32xf32>
    %115 = vector.extract_strided_slice %94 {offsets = [1, 1, 0], sizes = [8, 8, 32], strides = [1, 1, 1]} : vector<10x10x32xbf16> to vector<8x8x32xbf16>
    %116 = vector.shape_cast %115 : vector<8x8x32xbf16> to vector<64x32xbf16>
    %c704 = arith.constant 704 : index
    %c0_58 = arith.constant 0 : index
    %117 = vector.load %arg5[%c704, %c0_58] : memref<864x32xbf16, #tpu.memory_space<vmem>>, vector<32x32xbf16>
    %cst_59 = arith.constant dense<0.000000e+00> : vector<64x32xf32>
    %118 = tpu.matmul %116, %117, %cst_59 {dimension_numbers = #tpu.dot_dimension_numbers<[1], [0], [0], [1], [0, 0, 1, 1], [], []>} : vector<64x32xbf16>, vector<32x32xbf16>, vector<64x32xf32> -> vector<64x32xf32>
    %119 = arith.addf %114, %118 : vector<64x32xf32>
    %120 = vector.extract_strided_slice %94 {offsets = [1, 2, 0], sizes = [8, 8, 32], strides = [1, 1, 1]} : vector<10x10x32xbf16> to vector<8x8x32xbf16>
    %121 = vector.shape_cast %120 : vector<8x8x32xbf16> to vector<64x32xbf16>
    %c736 = arith.constant 736 : index
    %c0_60 = arith.constant 0 : index
    %122 = vector.load %arg5[%c736, %c0_60] : memref<864x32xbf16, #tpu.memory_space<vmem>>, vector<32x32xbf16>
    %cst_61 = arith.constant dense<0.000000e+00> : vector<64x32xf32>
    %123 = tpu.matmul %121, %122, %cst_61 {dimension_numbers = #tpu.dot_dimension_numbers<[1], [0], [0], [1], [0, 0, 1, 1], [], []>} : vector<64x32xbf16>, vector<32x32xbf16>, vector<64x32xf32> -> vector<64x32xf32>
    %124 = arith.addf %119, %123 : vector<64x32xf32>
    %125 = vector.extract_strided_slice %94 {offsets = [2, 0, 0], sizes = [8, 8, 32], strides = [1, 1, 1]} : vector<10x10x32xbf16> to vector<8x8x32xbf16>
    %126 = vector.shape_cast %125 : vector<8x8x32xbf16> to vector<64x32xbf16>
    %c768 = arith.constant 768 : index
    %c0_62 = arith.constant 0 : index
    %127 = vector.load %arg5[%c768, %c0_62] : memref<864x32xbf16, #tpu.memory_space<vmem>>, vector<32x32xbf16>
    %cst_63 = arith.constant dense<0.000000e+00> : vector<64x32xf32>
    %128 = tpu.matmul %126, %127, %cst_63 {dimension_numbers = #tpu.dot_dimension_numbers<[1], [0], [0], [1], [0, 0, 1, 1], [], []>} : vector<64x32xbf16>, vector<32x32xbf16>, vector<64x32xf32> -> vector<64x32xf32>
    %129 = arith.addf %124, %128 : vector<64x32xf32>
    %130 = vector.extract_strided_slice %94 {offsets = [2, 1, 0], sizes = [8, 8, 32], strides = [1, 1, 1]} : vector<10x10x32xbf16> to vector<8x8x32xbf16>
    %131 = vector.shape_cast %130 : vector<8x8x32xbf16> to vector<64x32xbf16>
    %c800 = arith.constant 800 : index
    %c0_64 = arith.constant 0 : index
    %132 = vector.load %arg5[%c800, %c0_64] : memref<864x32xbf16, #tpu.memory_space<vmem>>, vector<32x32xbf16>
    %cst_65 = arith.constant dense<0.000000e+00> : vector<64x32xf32>
    %133 = tpu.matmul %131, %132, %cst_65 {dimension_numbers = #tpu.dot_dimension_numbers<[1], [0], [0], [1], [0, 0, 1, 1], [], []>} : vector<64x32xbf16>, vector<32x32xbf16>, vector<64x32xf32> -> vector<64x32xf32>
    %134 = arith.addf %129, %133 : vector<64x32xf32>
    %135 = vector.extract_strided_slice %94 {offsets = [2, 2, 0], sizes = [8, 8, 32], strides = [1, 1, 1]} : vector<10x10x32xbf16> to vector<8x8x32xbf16>
    %136 = vector.shape_cast %135 : vector<8x8x32xbf16> to vector<64x32xbf16>
    %c832 = arith.constant 832 : index
    %c0_66 = arith.constant 0 : index
    %137 = vector.load %arg5[%c832, %c0_66] : memref<864x32xbf16, #tpu.memory_space<vmem>>, vector<32x32xbf16>
    %cst_67 = arith.constant dense<0.000000e+00> : vector<64x32xf32>
    %138 = tpu.matmul %136, %137, %cst_67 {dimension_numbers = #tpu.dot_dimension_numbers<[1], [0], [0], [1], [0, 0, 1, 1], [], []>} : vector<64x32xbf16>, vector<32x32xbf16>, vector<64x32xf32> -> vector<64x32xf32>
    %139 = arith.addf %134, %138 : vector<64x32xf32>
    %c0_68 = arith.constant 0 : index
    %c0_69 = arith.constant 0 : index
    %140 = vector.load %arg6[%c0_68, %c0_69] : memref<1x32xf32, #tpu.memory_space<vmem>>, vector<1x32xf32>
    %141 = vector.broadcast %140 : vector<1x32xf32> to vector<64x32xf32>
    %142 = arith.mulf %139, %141 : vector<64x32xf32>
    %c0_70 = arith.constant 0 : index
    %c0_71 = arith.constant 0 : index
    %143 = vector.load %arg7[%c0_70, %c0_71] : memref<1x32xf32, #tpu.memory_space<vmem>>, vector<1x32xf32>
    %144 = vector.broadcast %143 : vector<1x32xf32> to vector<64x32xf32>
    %145 = arith.addf %142, %144 : vector<64x32xf32>
    %146 = arith.truncf %145 : vector<64x32xf32> to vector<64x32xbf16>
    %c0_72 = arith.constant 0 : index
    %c0_73 = arith.constant 0 : index
    %c0_74 = arith.constant 0 : index
    %c0_75 = arith.constant 0 : index
    %147 = vector.load %arg10[%c0_72, %c0_73, %c0_74, %c0_75] : memref<1x1x64x32xbf16, #tpu.memory_space<vmem>>, vector<1x1x64x32xbf16>
    %148 = vector.shape_cast %147 : vector<1x1x64x32xbf16> to vector<64x32xbf16>
    %149 = vector.shape_cast %146 : vector<64x32xbf16> to vector<1x1x64x32xbf16>
    tpu.vector_store %arg10[%c0_72, %c0_73, %c0_74, %c0_75], %149 {strides = array<i32>} : memref<1x1x64x32xbf16, #tpu.memory_space<vmem>>, vector<1x1x64x32xbf16>,
    %cst_76 = arith.constant dense<0.000000e+00> : vector<32xf32>
    %150 = vector.multi_reduction <add>, %145, %cst_76 [0] : vector<64x32xf32> to vector<32xf32>
    %151 = vector.shape_cast %150 : vector<32xf32> to vector<1x32xf32>
    %cst_77 = arith.constant dense<0xFF800000> : vector<32xf32>
    %152 = vector.multi_reduction <maximumf>, %145, %cst_77 [0] : vector<64x32xf32> to vector<32xf32>
    %153 = vector.shape_cast %152 : vector<32xf32> to vector<1x32xf32>
    %c0_i32 = arith.constant 0 : i32
    %154 = arith.cmpi eq, %arg1, %c0_i32 : i32
    %155 = arith.extui %154 : i1 to i32
    %c0_i32_78 = arith.constant 0 : i32
    %156 = arith.cmpi ne, %155, %c0_i32_78 : i32
    scf.if %156 {
      %c0_82 = arith.constant 0 : index
      %c0_83 = arith.constant 0 : index
      %163 = vector.load %arg12[%c0_82, %c0_83] : memref<1x32xf32, #tpu.memory_space<vmem>>, vector<1x32xf32>
      tpu.vector_store %arg12[%c0_82, %c0_83], %151 {strides = array<i32>} : memref<1x32xf32, #tpu.memory_space<vmem>>, vector<1x32xf32>,
      %c0_84 = arith.constant 0 : index
      %c0_85 = arith.constant 0 : index
      %164 = vector.load %arg13[%c0_84, %c0_85] : memref<1x32xf32, #tpu.memory_space<vmem>>, vector<1x32xf32>
      tpu.vector_store %arg13[%c0_84, %c0_85], %153 {strides = array<i32>} : memref<1x32xf32, #tpu.memory_space<vmem>>, vector<1x32xf32>,
    } else {
    }
    %c0_i32_79 = arith.constant 0 : i32
    %157 = arith.cmpi ne, %arg1, %c0_i32_79 : i32
    %158 = arith.extui %157 : i1 to i32
    %c0_i32_80 = arith.constant 0 : i32
    %159 = arith.cmpi ne, %158, %c0_i32_80 : i32
    scf.if %159 {
      %c0_82 = arith.constant 0 : index
      %c0_83 = arith.constant 0 : index
      %163 = vector.load %arg12[%c0_82, %c0_83] : memref<1x32xf32, #tpu.memory_space<vmem>>, vector<1x32xf32>
      %164 = arith.addf %163, %151 : vector<1x32xf32>
      %c0_84 = arith.constant 0 : index
      %c0_85 = arith.constant 0 : index
      %165 = vector.load %arg12[%c0_84, %c0_85] : memref<1x32xf32, #tpu.memory_space<vmem>>, vector<1x32xf32>
      tpu.vector_store %arg12[%c0_84, %c0_85], %164 {strides = array<i32>} : memref<1x32xf32, #tpu.memory_space<vmem>>, vector<1x32xf32>,
      %c0_86 = arith.constant 0 : index
      %c0_87 = arith.constant 0 : index
      %166 = vector.load %arg13[%c0_86, %c0_87] : memref<1x32xf32, #tpu.memory_space<vmem>>, vector<1x32xf32>
      %167 = arith.maximumf %166, %153 : vector<1x32xf32>
      %c0_88 = arith.constant 0 : index
      %c0_89 = arith.constant 0 : index
      %168 = vector.load %arg13[%c0_88, %c0_89] : memref<1x32xf32, #tpu.memory_space<vmem>>, vector<1x32xf32>
      tpu.vector_store %arg13[%c0_88, %c0_89], %167 {strides = array<i32>} : memref<1x32xf32, #tpu.memory_space<vmem>>, vector<1x32xf32>,
    } else {
    }
    %c3_i32 = arith.constant 3 : i32
    %160 = arith.cmpi eq, %arg1, %c3_i32 : i32
    %161 = arith.extui %160 : i1 to i32
    %c0_i32_81 = arith.constant 0 : i32
    %162 = arith.cmpi ne, %161, %c0_i32_81 : i32
    scf.if %162 {
      %c0_82 = arith.constant 0 : index
      %c0_83 = arith.constant 0 : index
      %163 = vector.load %arg12[%c0_82, %c0_83] : memref<1x32xf32, #tpu.memory_space<vmem>>, vector<1x32xf32>
      %cst_84 = arith.constant 3.906250e-03 : f32
      %164 = vector.broadcast %cst_84 : f32 to vector<1x32xf32>
      %165 = arith.mulf %163, %164 : vector<1x32xf32>
      %c0_85 = arith.constant 0 : index
      %c0_86 = arith.constant 0 : index
      %166 = vector.load %arg13[%c0_85, %c0_86] : memref<1x32xf32, #tpu.memory_space<vmem>>, vector<1x32xf32>
      %c0_87 = arith.constant 0 : index
      %c0_88 = arith.constant 0 : index
      %167 = vector.load %arg8[%c0_87, %c0_88] : memref<2x32xf32, #tpu.memory_space<vmem>>, vector<2x32xf32>
      %168 = vector.broadcast %165 : vector<1x32xf32> to vector<2x32xf32>
      %169 = arith.mulf %167, %168 : vector<2x32xf32>
      %cst_89 = arith.constant dense<0.000000e+00> : vector<2xf32>
      %170 = vector.multi_reduction <add>, %169, %cst_89 [1] : vector<2x32xf32> to vector<2xf32>
      %171 = vector.shape_cast %170 : vector<2xf32> to vector<2x1xf32>
      %cst_90 = arith.constant 0.000000e+00 : f32
      %172 = vector.broadcast %cst_90 : f32 to vector<2x1xf32>
      %173 = arith.maximumf %171, %172 : vector<2x1xf32>
      %c0_91 = arith.constant 0 : index
      %c0_92 = arith.constant 0 : index
      %174 = vector.load %arg9[%c0_91, %c0_92] : memref<2x32xf32, #tpu.memory_space<vmem>>, vector<2x32xf32>
      %175 = vector.broadcast %173 : vector<2x1xf32> to vector<2x32xf32>
      %176 = arith.mulf %175, %174 : vector<2x32xf32>
      %cst_93 = arith.constant dense<0.000000e+00> : vector<32xf32>
      %177 = vector.multi_reduction <add>, %176, %cst_93 [0] : vector<2x32xf32> to vector<32xf32>
      %178 = vector.shape_cast %177 : vector<32xf32> to vector<1x32xf32>
      %c0_94 = arith.constant 0 : index
      %c0_95 = arith.constant 0 : index
      %179 = vector.load %arg8[%c0_94, %c0_95] : memref<2x32xf32, #tpu.memory_space<vmem>>, vector<2x32xf32>
      %180 = vector.broadcast %166 : vector<1x32xf32> to vector<2x32xf32>
      %181 = arith.mulf %179, %180 : vector<2x32xf32>
      %cst_96 = arith.constant dense<0.000000e+00> : vector<2xf32>
      %182 = vector.multi_reduction <add>, %181, %cst_96 [1] : vector<2x32xf32> to vector<2xf32>
      %183 = vector.shape_cast %182 : vector<2xf32> to vector<2x1xf32>
      %cst_97 = arith.constant 0.000000e+00 : f32
      %184 = vector.broadcast %cst_97 : f32 to vector<2x1xf32>
      %185 = arith.maximumf %183, %184 : vector<2x1xf32>
      %c0_98 = arith.constant 0 : index
      %c0_99 = arith.constant 0 : index
      %186 = vector.load %arg9[%c0_98, %c0_99] : memref<2x32xf32, #tpu.memory_space<vmem>>, vector<2x32xf32>
      %187 = vector.broadcast %185 : vector<2x1xf32> to vector<2x32xf32>
      %188 = arith.mulf %187, %186 : vector<2x32xf32>
      %cst_100 = arith.constant dense<0.000000e+00> : vector<32xf32>
      %189 = vector.multi_reduction <add>, %188, %cst_100 [0] : vector<2x32xf32> to vector<32xf32>
      %190 = vector.shape_cast %189 : vector<32xf32> to vector<1x32xf32>
      %191 = arith.addf %178, %190 : vector<1x32xf32>
      %192 = arith.negf %191 : vector<1x32xf32>
      %193 = math.exp %192 : vector<1x32xf32>
      %cst_101 = arith.constant 1.000000e+00 : f32
      %194 = vector.broadcast %cst_101 : f32 to vector<1x32xf32>
      %195 = arith.addf %194, %193 : vector<1x32xf32>
      %196 = arith.divf %194, %195 : vector<1x32xf32>
      %c0_102 = arith.constant 0 : index
      %c0_103 = arith.constant 0 : index
      %c0_104 = arith.constant 0 : index
      %197 = vector.load %arg11[%c0_102, %c0_103, %c0_104] : memref<1x1x32xf32, #tpu.memory_space<vmem>>, vector<1x1x32xf32>
      %198 = vector.shape_cast %197 : vector<1x1x32xf32> to vector<1x32xf32>
      %199 = vector.shape_cast %196 : vector<1x32xf32> to vector<1x1x32xf32>
      tpu.vector_store %arg11[%c0_102, %c0_103, %c0_104], %199 {strides = array<i32>} : memref<1x1x32xf32, #tpu.memory_space<vmem>>, vector<1x1x32xf32>,
    } else {
    }
    return
  }
  func.func @transform_0(%arg0: i32, %arg1: i32) -> (i32, i32, i32, i32, i32) {
    %c0_i32 = arith.constant 0 : i32
    %c0_i32_0 = arith.constant 0 : i32
    %c0_i32_1 = arith.constant 0 : i32
    %c0_i32_2 = arith.constant 0 : i32
    return %arg0, %arg1, %c0_i32, %c0_i32_0, %c0_i32_1 : i32, i32, i32, i32, i32
  }
  func.func @transform_1(%arg0: i32, %arg1: i32) -> (i32, i32, i32, i32, i32) {
    %c1_i32 = arith.constant 1 : i32
    %0 = arith.addi %arg1, %c1_i32 : i32
    %c0_i32 = arith.constant 0 : i32
    %c0_i32_0 = arith.constant 0 : i32
    %c0_i32_1 = arith.constant 0 : i32
    %c0_i32_2 = arith.constant 0 : i32
    return %arg0, %0, %c0_i32, %c0_i32_0, %c0_i32_1 : i32, i32, i32, i32, i32
  }
  func.func @transform_2(%arg0: i32, %arg1: i32) -> (i32, i32, i32, i32, i32) {
    %c2_i32 = arith.constant 2 : i32
    %0 = arith.addi %arg1, %c2_i32 : i32
    %c0_i32 = arith.constant 0 : i32
    %c0_i32_0 = arith.constant 0 : i32
    %c0_i32_1 = arith.constant 0 : i32
    %c0_i32_2 = arith.constant 0 : i32
    return %arg0, %0, %c0_i32, %c0_i32_0, %c0_i32_1 : i32, i32, i32, i32, i32
  }
  func.func @transform_3(%arg0: i32, %arg1: i32) -> (i32, i32) {
    %c0_i32 = arith.constant 0 : i32
    %c0_i32_0 = arith.constant 0 : i32
    %c0_i32_1 = arith.constant 0 : i32
    return %c0_i32, %c0_i32_0 : i32, i32
  }
  func.func @transform_4(%arg0: i32, %arg1: i32) -> (i32, i32) {
    %c0_i32 = arith.constant 0 : i32
    %c0_i32_0 = arith.constant 0 : i32
    %c0_i32_1 = arith.constant 0 : i32
    return %c0_i32, %c0_i32_0 : i32, i32
  }
  func.func @transform_5(%arg0: i32, %arg1: i32) -> (i32, i32) {
    %c0_i32 = arith.constant 0 : i32
    %c0_i32_0 = arith.constant 0 : i32
    %c0_i32_1 = arith.constant 0 : i32
    return %c0_i32, %c0_i32_0 : i32, i32
  }
  func.func @transform_6(%arg0: i32, %arg1: i32) -> (i32, i32) {
    %c0_i32 = arith.constant 0 : i32
    %c0_i32_0 = arith.constant 0 : i32
    %c0_i32_1 = arith.constant 0 : i32
    return %c0_i32, %c0_i32_0 : i32, i32
  }
  func.func @transform_7(%arg0: i32, %arg1: i32) -> (i32, i32) {
    %c0_i32 = arith.constant 0 : i32
    %c0_i32_0 = arith.constant 0 : i32
    %c0_i32_1 = arith.constant 0 : i32
    return %c0_i32, %c0_i32_0 : i32, i32
  }
  func.func @transform_8(%arg0: i32, %arg1: i32) -> (i32, i32, i32, i32) {
    %c0_i32 = arith.constant 0 : i32
    %c0_i32_0 = arith.constant 0 : i32
    %c0_i32_1 = arith.constant 0 : i32
    return %arg0, %arg1, %c0_i32, %c0_i32_0 : i32, i32, i32, i32
  }
  func.func @transform_9(%arg0: i32, %arg1: i32) -> (i32, i32, i32) {
    %c0_i32 = arith.constant 0 : i32
    %c0_i32_0 = arith.constant 0 : i32
    %c0_i32_1 = arith.constant 0 : i32
    return %arg0, %c0_i32, %c0_i32_0 : i32, i32, i32
  }
}

module attributes {stable_mosaic.version = 11 : i64} {
  func.func @_epilogue_kernel(%arg0: i32, %arg1: i32, %arg2: memref<1x1x64x32xbf16, #tpu.memory_space<vmem>>, %arg3: memref<1x1x32xf32, #tpu.memory_space<vmem>>, %arg4: memref<1x1x64x1xf32, #tpu.memory_space<vmem>>, %arg5: memref<1x1x64x32xf32, #tpu.memory_space<vmem>>, %arg6: memref<1x1x64x32xf32, #tpu.memory_space<vmem>>) attributes {dimension_semantics = [#tpu.dimension_semantics<parallel>, #tpu.dimension_semantics<parallel>], iteration_bounds = array<i64: 2, 4>, scalar_prefetch = 0 : i64, scratch_operands = 0 : i64, tpu.core_type = #tpu.core_type<tc>, window_params = [{transform_indices = @transform_0, window_bounds = array<i64: 1, 1, 64, 32>}, {transform_indices = @transform_1, window_bounds = array<i64: 1, 1, 32>}, {transform_indices = @transform_2, window_bounds = array<i64: 1, 1, 64, 1>}, {transform_indices = @transform_3, window_bounds = array<i64: 1, 1, 64, 32>}, {transform_indices = @transform_4, window_bounds = array<i64: 1, 1, 64, 32>}]} {
    %c0 = arith.constant 0 : index
    %c0_0 = arith.constant 0 : index
    %c0_1 = arith.constant 0 : index
    %c0_2 = arith.constant 0 : index
    %0 = vector.load %arg2[%c0, %c0_0, %c0_1, %c0_2] : memref<1x1x64x32xbf16, #tpu.memory_space<vmem>>, vector<1x1x64x32xbf16>
    %1 = vector.shape_cast %0 : vector<1x1x64x32xbf16> to vector<64x32xbf16>
    %2 = arith.extf %1 : vector<64x32xbf16> to vector<64x32xf32>
    %c0_3 = arith.constant 0 : index
    %c0_4 = arith.constant 0 : index
    %c0_5 = arith.constant 0 : index
    %c0_6 = arith.constant 0 : index
    %3 = vector.load %arg4[%c0_3, %c0_4, %c0_5, %c0_6] : memref<1x1x64x1xf32, #tpu.memory_space<vmem>>, vector<1x1x64x1xf32>
    %4 = vector.shape_cast %3 : vector<1x1x64x1xf32> to vector<64x1xf32>
    %5 = arith.negf %4 : vector<64x1xf32>
    %6 = math.exp %5 : vector<64x1xf32>
    %cst = arith.constant 1.000000e+00 : f32
    %7 = vector.broadcast %cst : f32 to vector<64x1xf32>
    %8 = arith.addf %7, %6 : vector<64x1xf32>
    %9 = arith.divf %7, %8 : vector<64x1xf32>
    %c0_7 = arith.constant 0 : index
    %c0_8 = arith.constant 0 : index
    %c0_9 = arith.constant 0 : index
    %10 = vector.load %arg3[%c0_7, %c0_8, %c0_9] : memref<1x1x32xf32, #tpu.memory_space<vmem>>, vector<1x1x32xf32>
    %11 = vector.shape_cast %10 : vector<1x1x32xf32> to vector<1x32xf32>
    %12 = vector.broadcast %11 : vector<1x32xf32> to vector<64x32xf32>
    %13 = arith.mulf %2, %12 : vector<64x32xf32>
    %14 = vector.broadcast %9 : vector<64x1xf32> to vector<64x32xf32>
    %15 = arith.mulf %13, %14 : vector<64x32xf32>
    %c0_10 = arith.constant 0 : index
    %c0_11 = arith.constant 0 : index
    %c0_12 = arith.constant 0 : index
    %c0_13 = arith.constant 0 : index
    %16 = vector.load %arg5[%c0_10, %c0_11, %c0_12, %c0_13] : memref<1x1x64x32xf32, #tpu.memory_space<vmem>>, vector<1x1x64x32xf32>
    %17 = vector.shape_cast %16 : vector<1x1x64x32xf32> to vector<64x32xf32>
    %18 = arith.addf %15, %17 : vector<64x32xf32>
    %cst_14 = arith.constant 0.000000e+00 : f32
    %19 = vector.broadcast %cst_14 : f32 to vector<64x32xf32>
    %20 = arith.maximumf %18, %19 : vector<64x32xf32>
    %c0_15 = arith.constant 0 : index
    %c0_16 = arith.constant 0 : index
    %c0_17 = arith.constant 0 : index
    %c0_18 = arith.constant 0 : index
    %21 = vector.load %arg6[%c0_15, %c0_16, %c0_17, %c0_18] : memref<1x1x64x32xf32, #tpu.memory_space<vmem>>, vector<1x1x64x32xf32>
    %22 = vector.shape_cast %21 : vector<1x1x64x32xf32> to vector<64x32xf32>
    %23 = vector.shape_cast %20 : vector<64x32xf32> to vector<1x1x64x32xf32>
    tpu.vector_store %arg6[%c0_15, %c0_16, %c0_17, %c0_18], %23 {strides = array<i32>} : memref<1x1x64x32xf32, #tpu.memory_space<vmem>>, vector<1x1x64x32xf32>,
    return
  }
  func.func @transform_0(%arg0: i32, %arg1: i32) -> (i32, i32, i32, i32) {
    %c0_i32 = arith.constant 0 : i32
    %c0_i32_0 = arith.constant 0 : i32
    %c0_i32_1 = arith.constant 0 : i32
    return %arg0, %arg1, %c0_i32, %c0_i32_0 : i32, i32, i32, i32
  }
  func.func @transform_1(%arg0: i32, %arg1: i32) -> (i32, i32, i32) {
    %c0_i32 = arith.constant 0 : i32
    %c0_i32_0 = arith.constant 0 : i32
    %c0_i32_1 = arith.constant 0 : i32
    return %arg0, %c0_i32, %c0_i32_0 : i32, i32, i32
  }
  func.func @transform_2(%arg0: i32, %arg1: i32) -> (i32, i32, i32, i32) {
    %c0_i32 = arith.constant 0 : i32
    %c0_i32_0 = arith.constant 0 : i32
    %c0_i32_1 = arith.constant 0 : i32
    return %arg0, %arg1, %c0_i32, %c0_i32_0 : i32, i32, i32, i32
  }
  func.func @transform_3(%arg0: i32, %arg1: i32) -> (i32, i32, i32, i32) {
    %c0_i32 = arith.constant 0 : i32
    %c0_i32_0 = arith.constant 0 : i32
    %c0_i32_1 = arith.constant 0 : i32
    return %arg0, %arg1, %c0_i32, %c0_i32_0 : i32, i32, i32, i32
  }
  func.func @transform_4(%arg0: i32, %arg1: i32) -> (i32, i32, i32, i32) {
    %c0_i32 = arith.constant 0 : i32
    %c0_i32_0 = arith.constant 0 : i32
    %c0_i32_1 = arith.constant 0 : i32
    return %arg0, %arg1, %c0_i32, %c0_i32_0 : i32, i32, i32, i32
  }
}

</mosaic_0001>

<bundles_post_ra>
// kernel: reverse.1
= control target key start
LH: loop header
LB: loop body
LE: loop exit
PB: predicated region body
PF: predicated region fallthrough
CT: control target
= control target key end

     0   :  { %v2_v0 = vlaneseq  ;;  %s1381_s0 = inlined_call_operand.vmem [shape: f32[7,7,7,2], index: 0, kind: input, shape index: {}]   ;;  %s1382_s1 = inlined_call_operand.vmem [shape: bf16[7,7,7,2], index: 1, kind: output, shape index: {}]  }
   0x2   :  { %v3_v1 = vsub.s32 6, %v2_v0 }
   0x4   :  { %4 = vset.pattern.permute.xlu0 %v3_v1 }
   0x5   :  { %1260 = vset.pattern.permute.xlu1 %v3_v1  ;;  %v116_v2 = vld [vmem:[%s1381_s0 + $0x60] sm:$0x3]  ;;  %v112_v3 = vld [vmem:[%s1381_s0 + $0x58] sm:$0xff]   ;;  %v106_v4 = vld [vmem:[%s1381_s0 + $0x50] sm:$0xff]  }
   0x6   :  { %117 = vst [vmem:[#allocation1 + $0x60] sm:$0x3] %v116_v2  ;;  %113 = vst [vmem:[#allocation1 + $0x58] sm:$0xff] %v112_v3   ;;  %v98_v5 = vld [vmem:[%s1381_s0 + $0x48] sm:$0xff]   ;;  %v90_v6 = vld [vmem:[%s1381_s0 + $0x40] sm:$0xff]  }
   0x7   :  { %107 = vst [vmem:[#allocation1 + $0x50] sm:$0xff] %v106_v4   ;;  %v82_v7 = vld [vmem:[%s1381_s0 + $0x38] sm:$0xff]   ;;  %99 = vst [vmem:[#allocation1 + $0x48] sm:$0xff] %v98_v5   ;;  %v74_v8 = vld [vmem:[%s1381_s0 + $0x30] sm:$0xff]  }
   0x8   :  { %91 = vst [vmem:[#allocation1 + $0x40] sm:$0xff] %v90_v6   ;;  %83 = vst [vmem:[#allocation1 + $0x38] sm:$0xff] %v82_v7   ;;  %v66_v9 = vld [vmem:[%s1381_s0 + $0x28] sm:$0xff]   ;;  %v58_v10 = vld [vmem:[%s1381_s0 + $0x20] sm:$0xff]  }
   0x9   :  { %75 = vst [vmem:[#allocation1 + $0x30] sm:$0xff] %v74_v8   ;;  %67 = vst [vmem:[#allocation1 + $0x28] sm:$0xff] %v66_v9   ;;  %v50_v11 = vld [vmem:[%s1381_s0 + $0x18] sm:$0xff]   ;;  %v42_v12 = vld [vmem:[%s1381_s0 + $0x10] sm:$0xff]  }
   0xa   :  { %59 = vst [vmem:[#allocation1 + $0x20] sm:$0xff] %v58_v10   ;;  %v34_v13 = vld [vmem:[%s1381_s0 + $0x8] sm:$0xff]   ;;  %51 = vst [vmem:[#allocation1 + $0x18] sm:$0xff] %v50_v11   ;;  %v26_v14 = vld [vmem:[%s1381_s0] sm:$0xff]  }
   0xb   :  { %43 = vst [vmem:[#allocation1 + $0x10] sm:$0xff] %v42_v12   ;;  %35 = vst [vmem:[#allocation1 + $0x8] sm:$0xff] %v34_v13  }
   0xc   :  { %27 = vst [vmem:[#allocation1] sm:$0xff] %v26_v14  }
   0xd   :  { %v240_v15 = vld [vmem:[#allocation1 + $0x60] sm:$0x3]  ;;  %v250_v16 = vld [vmem:[#allocation1 + $0x5c] sm:$0x3]  ;;  %v245_v17 = vld [vmem:[#allocation1 + $0x5e] sm:$0x3] }
   0xe   :  { %242 = vst [vmem:[#allocation0 + $0x180] sm:$0x3] %v240_v15  ;;  %252 = vst [vmem:[#allocation0 + $0x170] sm:$0x3] %v250_v16  ;;  %v255_v18 = vld [vmem:[#allocation1 + $0x5a] sm:$0x3] }
   0xf   :  { %247 = vst [vmem:[#allocation0 + $0x178] sm:$0x3] %v245_v17  ;;  %v260_v19 = vld [vmem:[#allocation1 + $0x58] sm:$0x3]  ;;  %v265_v20 = vld [vmem:[#allocation1 + $0x56] sm:$0x3] }
  0x10   :  { %257 = vst [vmem:[#allocation0 + $0x168] sm:$0x3] %v255_v18  ;;  %262 = vst [vmem:[#allocation0 + $0x160] sm:$0x3] %v260_v19  ;;  %v270_v21 = vld [vmem:[#allocation1 + $0x54] sm:$0x3] }
  0x11   :  { %267 = vst [vmem:[#allocation0 + $0x158] sm:$0x3] %v265_v20  ;;  %v275_v22 = vld [vmem:[#allocation1 + $0x52] sm:$0x3]  ;;  %v280_v23 = vld [vmem:[#allocation1 + $0x50] sm:$0x3] }
  0x12   :  { %272 = vst [vmem:[#allocation0 + $0x150] sm:$0x3] %v270_v21  ;;  %277 = vst [vmem:[#allocation0 + $0x148] sm:$0x3] %v275_v22  ;;  %v285_v24 = vld [vmem:[#allocation1 + $0x4e] sm:$0x3] }
  0x13   :  { %282 = vst [vmem:[#allocation0 + $0x140] sm:$0x3] %v280_v23  ;;  %v290_v25 = vld [vmem:[#allocation1 + $0x4c] sm:$0x3]  ;;  %v295_v26 = vld [vmem:[#allocation1 + $0x4a] sm:$0x3] }
  0x14   :  { %287 = vst [vmem:[#allocation0 + $0x138] sm:$0x3] %v285_v24  ;;  %292 = vst [vmem:[#allocation0 + $0x130] sm:$0x3] %v290_v25  ;;  %v300_v27 = vld [vmem:[#allocation1 + $0x48] sm:$0x3] }
  0x15   :  { %297 = vst [vmem:[#allocation0 + $0x128] sm:$0x3] %v295_v26  ;;  %v305_v28 = vld [vmem:[#allocation1 + $0x46] sm:$0x3]  ;;  %v310_v29 = vld [vmem:[#allocation1 + $0x44] sm:$0x3] }
  0x16   :  { %302 = vst [vmem:[#allocation0 + $0x120] sm:$0x3] %v300_v27  ;;  %307 = vst [vmem:[#allocation0 + $0x118] sm:$0x3] %v305_v28  ;;  %v315_v30 = vld [vmem:[#allocation1 + $0x42] sm:$0x3] }
  0x17   :  { %312 = vst [vmem:[#allocation0 + $0x110] sm:$0x3] %v310_v29  ;;  %v320_v31 = vld [vmem:[#allocation1 + $0x40] sm:$0x3]  ;;  %v325_v32 = vld [vmem:[#allocation1 + $0x3e] sm:$0x3] }
  0x18   :  { %317 = vst [vmem:[#allocation0 + $0x108] sm:$0x3] %v315_v30  ;;  %322 = vst [vmem:[#allocation0 + $0x100] sm:$0x3] %v320_v31  ;;  %v330_v33 = vld [vmem:[#allocation1 + $0x3c] sm:$0x3] }
  0x19   :  { %327 = vst [vmem:[#allocation0 + $0xf8] sm:$0x3] %v325_v32  ;;  %v335_v34 = vld [vmem:[#allocation1 + $0x3a] sm:$0x3]  ;;  %v340_v35 = vld [vmem:[#allocation1 + $0x38] sm:$0x3] }
  0x1a   :  { %332 = vst [vmem:[#allocation0 + $0xf0] sm:$0x3] %v330_v33  ;;  %337 = vst [vmem:[#allocation0 + $0xe8] sm:$0x3] %v335_v34  ;;  %v345_v36 = vld [vmem:[#allocation1 + $0x36] sm:$0x3] }
  0x1b   :  { %342 = vst [vmem:[#allocation0 + $0xe0] sm:$0x3] %v340_v35  ;;  %v350_v37 = vld [vmem:[#allocation1 + $0x34] sm:$0x3]  ;;  %v355_v38 = vld [vmem:[#allocation1 + $0x32] sm:$0x3] }
  0x1c   :  { %v480_v39 = vld [vmem:[#allocation0 + $0x180] sm:$0xff]  ;;  %v492_v40 = vld [vmem:[#allocation0 + $0x170] sm:$0xff]  ;;  %347 = vst [vmem:[#allocation0 + $0xd8] sm:$0x3] %v345_v36  ;;  %352 = vst [vmem:[#allocation0 + $0xd0] sm:$0x3] %v350_v37 }
  0x1d   :  { %357 = vst [vmem:[#allocation0 + $0xc8] sm:$0x3] %v355_v38  ;;  %481 = vperm.xlu0 %4, %v480_v39   ;;  %493 = vperm.xlu1 %1260, %v492_v40   ;;  %v486_v41 = vld [vmem:[#allocation0 + $0x178] sm:$0xff]  ;;  %v498_v42 = vld [vmem:[#allocation0 + $0x168] sm:$0xff]  ;;  %v504_v43 = vld [vmem:[#allocation0 + $0x160] sm:$0xff] }
  0x1e   :  { %v510_v44 = vld [vmem:[#allocation0 + $0x158] sm:$0xff]  ;;  %v516_v45 = vld [vmem:[#allocation0 + $0x150] sm:$0xff]  ;;  %v522_v46 = vld [vmem:[#allocation0 + $0x148] sm:$0xff] }
  0x1f   :  { %v360_v47 = vld [vmem:[#allocation1 + $0x30] sm:$0x3]  ;;  %v365_v48 = vld [vmem:[#allocation1 + $0x2e] sm:$0x3]  ;;  %v370_v49 = vld [vmem:[#allocation1 + $0x2c] sm:$0x3] }
  0x20   :  { %362 = vst [vmem:[#allocation0 + $0xc0] sm:$0x3] %v360_v47  ;;  %367 = vst [vmem:[#allocation0 + $0xb8] sm:$0x3] %v365_v48  ;;  %v375_v50 = vld [vmem:[#allocation1 + $0x2a] sm:$0x3] }
  0x21   :  { %487 = vperm.xlu0 %4, %v486_v41   ;;  %499 = vperm.xlu1 %1260, %v498_v42   ;;  %372 = vst [vmem:[#allocation0 + $0xb0] sm:$0x3] %v370_v49  ;;  %v380_v51 = vld [vmem:[#allocation1 + $0x28] sm:$0x3]  ;;  %v385_v52 = vld [vmem:[#allocation1 + $0x26] sm:$0x3] }
  0x22   :  { %377 = vst [vmem:[#allocation0 + $0xa8] sm:$0x3] %v375_v50  ;;  %382 = vst [vmem:[#allocation0 + $0xa0] sm:$0x3] %v380_v51  ;;  %v390_v53 = vld [vmem:[#allocation1 + $0x24] sm:$0x3] }
  0x23   :  { %387 = vst [vmem:[#allocation0 + $0x98] sm:$0x3] %v385_v52  ;;  %v395_v54 = vld [vmem:[#allocation1 + $0x22] sm:$0x3]  ;;  %v400_v55 = vld [vmem:[#allocation1 + $0x20] sm:$0x3] }
  0x24   :  { %392 = vst [vmem:[#allocation0 + $0x90] sm:$0x3] %v390_v53  ;;  %397 = vst [vmem:[#allocation0 + $0x88] sm:$0x3] %v395_v54  ;;  %v405_v56 = vld [vmem:[#allocation1 + $0x1e] sm:$0x3] }
  0x25   :  { %505 = vperm.xlu0 %4, %v504_v43   ;;  %511 = vperm.xlu1 %1260, %v510_v44   ;;  %402 = vst [vmem:[#allocation0 + $0x80] sm:$0x3] %v400_v55  ;;  %v410_v57 = vld [vmem:[#allocation1 + $0x1c] sm:$0x3]  ;;  %v415_v58 = vld [vmem:[#allocation1 + $0x1a] sm:$0x3] }
  0x26   :  { %v528_v59 = vld [vmem:[#allocation0 + $0x140] sm:$0xff]  ;;  %v534_v60 = vld [vmem:[#allocation0 + $0x138] sm:$0xff]  ;;  %407 = vst [vmem:[#allocation0 + $0x78] sm:$0x3] %v405_v56  ;;  %412 = vst [vmem:[#allocation0 + $0x70] sm:$0x3] %v410_v57 }
  0x27   :  { %417 = vst [vmem:[#allocation0 + $0x68] sm:$0x3] %v415_v58  ;;  %v420_v61 = vld [vmem:[#allocation1 + $0x18] sm:$0x3]  ;;  %v425_v62 = vld [vmem:[#allocation1 + $0x16] sm:$0x3] }
  0x28   :  { %v430_v63 = vld [vmem:[#allocation1 + $0x14] sm:$0x3]  ;;  %422 = vst [vmem:[#allocation0 + $0x60] sm:$0x3] %v420_v61  ;;  %427 = vst [vmem:[#allocation0 + $0x58] sm:$0x3] %v425_v62 }
  0x29   :  { %517 = vperm.xlu0 %4, %v516_v45   ;;  %523 = vperm.xlu1 %1260, %v522_v46   ;;  %432 = vst [vmem:[#allocation0 + $0x50] sm:$0x3] %v430_v63  ;;  %v435_v0 = vld [vmem:[#allocation1 + $0x12] sm:$0x3]  ;;  %v440_v1 = vld [vmem:[#allocation1 + $0x10] sm:$0x3] }
  0x2a   :  { %v445_v2 = vld [vmem:[#allocation1 + $0xe] sm:$0x3]  ;;  %437 = vst [vmem:[#allocation0 + $0x48] sm:$0x3] %v435_v0  ;;  %442 = vst [vmem:[#allocation0 + $0x40] sm:$0x3] %v440_v1 }
  0x2b   :  { %447 = vst [vmem:[#allocation0 + $0x38] sm:$0x3] %v445_v2  ;;  %v450_v3 = vld [vmem:[#allocation1 + $0xc] sm:$0x3]  ;;  %v455_v4 = vld [vmem:[#allocation1 + $0xa] sm:$0x3] }
  0x2c   :  { %v460_v5 = vld [vmem:[#allocation1 + $0x8] sm:$0x3]  ;;  %452 = vst [vmem:[#allocation0 + $0x30] sm:$0x3] %v450_v3  ;;  %457 = vst [vmem:[#allocation0 + $0x28] sm:$0x3] %v455_v4 }
  0x2d   :  { %462 = vst [vmem:[#allocation0 + $0x20] sm:$0x3] %v460_v5  ;;  %v465_v6 = vld [vmem:[#allocation1 + $0x6] sm:$0x3]  ;;  %v470_v7 = vld [vmem:[#allocation1 + $0x4] sm:$0x3]  ;;  %529 = vperm.xlu0 %4, %v528_v59   ;;  %535 = vperm.xlu1 %1260, %v534_v60  }
  0x2e   :  { %v474_v8 = vld [vmem:[#allocation1 + $0x2] sm:$0x3]  ;;  %467 = vst [vmem:[#allocation0 + $0x18] sm:$0x3] %v465_v6  ;;  %472 = vst [vmem:[#allocation0 + $0x10] sm:$0x3] %v470_v7 }
  0x2f   :  { %476 = vst [vmem:[#allocation0 + $0x8] sm:$0x3] %v474_v8  ;;  %v540_v9 = vld [vmem:[#allocation0 + $0x130] sm:$0xff]  ;;  %v546_v10 = vld [vmem:[#allocation0 + $0x128] sm:$0xff]  ;;  %v552_v11 = vld [vmem:[#allocation0 + $0x120] sm:$0xff]  ;;  %v1261_v57 = vmov 0.0  }
  0x30   :  { %v558_v12 = vld [vmem:[#allocation0 + $0x118] sm:$0xff]  ;;  %v477_v13 = vld [vmem:[#allocation1] sm:$0x3]  ;;  %v564_v14 = vld [vmem:[#allocation0 + $0x110] sm:$0xff] }
  0x31   :  { %541 = vperm.xlu0 %4, %v540_v9   ;;  %547 = vperm.xlu1 %1260, %v546_v10   ;;  %478 = vst [vmem:[#allocation0] sm:$0x3] %v477_v13  ;;  %v570_v15 = vld [vmem:[#allocation0 + $0x108] sm:$0xff]  ;;  %v576_v16 = vld [vmem:[#allocation0 + $0x100] sm:$0xff]  ;;  %v582_v17 = vld [vmem:[#allocation0 + $0xf8] sm:$0xff] }
  0x32   :  { %v588_v18 = vld [vmem:[#allocation0 + $0xf0] sm:$0xff]  ;;  %v594_v19 = vld [vmem:[#allocation0 + $0xe8] sm:$0xff]  ;;  %v600_v20 = vld [vmem:[#allocation0 + $0xe0] sm:$0xff] }
  0x33   :  { %v606_v21 = vld [vmem:[#allocation0 + $0xd8] sm:$0xff]  ;;  %v612_v22 = vld [vmem:[#allocation0 + $0xd0] sm:$0xff]  ;;  %v618_v23 = vld [vmem:[#allocation0 + $0xc8] sm:$0xff] }
  0x34   :  { %v624_v24 = vld [vmem:[#allocation0 + $0xc0] sm:$0xff]  ;;  %v630_v25 = vld [vmem:[#allocation0 + $0xb8] sm:$0xff]  ;;  %v636_v26 = vld [vmem:[#allocation0 + $0xb0] sm:$0xff] }
  0x35   :  { %553 = vperm.xlu0 %4, %v552_v11   ;;  %559 = vperm.xlu1 %1260, %v558_v12   ;;  %v642_v27 = vld [vmem:[#allocation0 + $0xa8] sm:$0xff]  ;;  %v648_v28 = vld [vmem:[#allocation0 + $0xa0] sm:$0xff]  ;;  %v654_v29 = vld [vmem:[#allocation0 + $0x98] sm:$0xff] }
  0x36   :  { %v660_v30 = vld [vmem:[#allocation0 + $0x90] sm:$0xff]  ;;  %v666_v31 = vld [vmem:[#allocation0 + $0x88] sm:$0xff]  ;;  %v672_v32 = vld [vmem:[#allocation0 + $0x80] sm:$0xff] }
  0x37   :  { %v678_v33 = vld [vmem:[#allocation0 + $0x78] sm:$0xff]  ;;  %v684_v34 = vld [vmem:[#allocation0 + $0x70] sm:$0xff]  ;;  %v690_v35 = vld [vmem:[#allocation0 + $0x68] sm:$0xff] }
  0x38   :  { %v696_v36 = vld [vmem:[#allocation0 + $0x60] sm:$0xff]  ;;  %v702_v37 = vld [vmem:[#allocation0 + $0x58] sm:$0xff]  ;;  %v708_v38 = vld [vmem:[#allocation0 + $0x50] sm:$0xff] }
  0x39   :  { %565 = vperm.xlu0 %4, %v564_v14   ;;  %571 = vperm.xlu1 %1260, %v570_v15   ;;  %v714_v39 = vld [vmem:[#allocation0 + $0x48] sm:$0xff]  ;;  %v720_v40 = vld [vmem:[#allocation0 + $0x40] sm:$0xff]  ;;  %v726_v41 = vld [vmem:[#allocation0 + $0x38] sm:$0xff] }
  0x3a   :  { %v732_v42 = vld [vmem:[#allocation0 + $0x30] sm:$0xff]  ;;  %v738_v43 = vld [vmem:[#allocation0 + $0x28] sm:$0xff]  ;;  %v744_v44 = vld [vmem:[#allocation0 + $0x20] sm:$0xff] }
  0x3b   :  { %v750_v45 = vld [vmem:[#allocation0 + $0x18] sm:$0xff]  ;;  %v756_v46 = vld [vmem:[#allocation0 + $0x10] sm:$0xff]  ;;  %v762_v47 = vld [vmem:[#allocation0 + $0x8] sm:$0xff] }
  0x3c   :  { %v767_v48 = vld [vmem:[#allocation0] sm:$0xff] }
  0x3d   :  { %577 = vperm.xlu0 %4, %v576_v16   ;;  %583 = vperm.xlu1 %1260, %v582_v17  }
  0x41   :  { %589 = vperm.xlu0 %4, %v588_v18   ;;  %595 = vperm.xlu1 %1260, %v594_v19  }
  0x45   :  { %601 = vperm.xlu0 %4, %v600_v20   ;;  %607 = vperm.xlu1 %1260, %v606_v21  }
  0x49   :  { %613 = vperm.xlu0 %4, %v612_v22   ;;  %619 = vperm.xlu1 %1260, %v618_v23  }
  0x4d   :  { %625 = vperm.xlu0 %4, %v624_v24   ;;  %631 = vperm.xlu1 %1260, %v630_v25  }
  0x51   :  { %637 = vperm.xlu0 %4, %v636_v26   ;;  %643 = vperm.xlu1 %1260, %v642_v27  }
  0x55   :  { %649 = vperm.xlu0 %4, %v648_v28   ;;  %655 = vperm.xlu1 %1260, %v654_v29  }
  0x59   :  { %661 = vperm.xlu0 %4, %v660_v30   ;;  %667 = vperm.xlu1 %1260, %v666_v31  }
  0x5d   :  { %673 = vperm.xlu0 %4, %v672_v32   ;;  %679 = vperm.xlu1 %1260, %v678_v33  }
  0x61   :  { %685 = vperm.xlu0 %4, %v684_v34   ;;  %691 = vperm.xlu1 %1260, %v690_v35  }
  0x65   :  { %697 = vperm.xlu0 %4, %v696_v36   ;;  %703 = vperm.xlu1 %1260, %v702_v37  }
  0x69   :  { %709 = vperm.xlu0 %4, %v708_v38   ;;  %715 = vperm.xlu1 %1260, %v714_v39  }
  0x6d   :  { %721 = vperm.xlu0 %4, %v720_v40   ;;  %727 = vperm.xlu1 %1260, %v726_v41  }
  0x71   :  { %733 = vperm.xlu0 %4, %v732_v42   ;;  %739 = vperm.xlu1 %1260, %v738_v43  }
  0x75   :  { %745 = vperm.xlu0 %4, %v744_v44   ;;  %751 = vperm.xlu1 %1260, %v750_v45  }
  0x79   :  { %757 = vperm.xlu0 %4, %v756_v46   ;;  %763 = vperm.xlu1 %1260, %v762_v47  }
  0x7d   :  { %768 = vperm.xlu0 %4, %v767_v48  }
  0x9c   :  { %v482_v49 = vpop.permute.xlu0 %481  ;;  %v494_v50 = vpop.permute.xlu1 %493 }
  0x9d   :  { %483 = vst [vmem:[#allocation2] sm:$0xff] %v482_v49  ;;  %495 = vst [vmem:[#allocation2 + $0x10] sm:$0xff] %v494_v50 }
  0xa0   :  { %v488_v51 = vpop.permute.xlu0 %487  ;;  %v500_v52 = vpop.permute.xlu1 %499 }
  0xa1   :  { %489 = vst [vmem:[#allocation2 + $0x8] sm:$0xff] %v488_v51  ;;  %501 = vst [vmem:[#allocation2 + $0x18] sm:$0xff] %v500_v52 }
  0xa4   :  { %v775_v53 = vld [vmem:[#allocation2] sm:$0x3]  ;;  %v786_v54 = vld [vmem:[#allocation2 + $0x10] sm:$0x3]  ;;  %v506_v55 = vpop.permute.xlu0 %505  ;;  %v512_v56 = vpop.permute.xlu1 %511 }
  0xa5   :  { %v776_v58 = vpack.c.bf16 %v1261_v57, %v775_v53  ;;  %v787_v59 = vpack.c.bf16 %v1261_v57, %v786_v54  ;;  %507 = vst [vmem:[#allocation2 + $0x20] sm:$0xff] %v506_v55  ;;  %513 = vst [vmem:[#allocation2 + $0x28] sm:$0xff] %v512_v56 }
  0xa7   :  { %778 = vst [vmem:[#allocation3] sm:$0x1] %v776_v58  ;;  %791 = vst [vmem:[#allocation3 + $0x2] sm:$0x1] %v787_v59 }
  0xa8   :  { %v780_v60 = vld [vmem:[#allocation2 + $0x8] sm:$0x3]  ;;  %v793_v61 = vld [vmem:[#allocation2 + $0x18] sm:$0x3]  ;;  %v518_v62 = vpop.permute.xlu0 %517  ;;  %v524_v63 = vpop.permute.xlu1 %523 }
  0xa9   :  { %v781_v0 = vpack.c.bf16 %v1261_v57, %v780_v60  ;;  %v794_v1 = vpack.c.bf16 %v1261_v57, %v793_v61  ;;  %519 = vst [vmem:[#allocation2 + $0x30] sm:$0xff] %v518_v62  ;;  %525 = vst [vmem:[#allocation2 + $0x38] sm:$0xff] %v524_v63 }
  0xab   :  { %784 = vst [vmem:[#allocation3 + $0x1] sm:$0x1] %v781_v0  ;;  %798 = vst [vmem:[#allocation3 + $0x3] sm:$0x1] %v794_v1 }
  0xac   :  { %v800_v2 = vld [vmem:[#allocation2 + $0x20] sm:$0x3]  ;;  %v807_v3 = vld [vmem:[#allocation2 + $0x28] sm:$0x3]  ;;  %v530_v4 = vpop.permute.xlu0 %529  ;;  %v536_v5 = vpop.permute.xlu1 %535 }
  0xad   :  { %v801_v6 = vpack.c.bf16 %v1261_v57, %v800_v2  ;;  %v808_v7 = vpack.c.bf16 %v1261_v57, %v807_v3  ;;  %531 = vst [vmem:[#allocation2 + $0x40] sm:$0xff] %v530_v4  ;;  %537 = vst [vmem:[#allocation2 + $0x48] sm:$0xff] %v536_v5 }
  0xaf   :  { %805 = vst [vmem:[#allocation3 + $0x4] sm:$0x1] %v801_v6  ;;  %812 = vst [vmem:[#allocation3 + $0x5] sm:$0x1] %v808_v7 }
  0xb0   :  { %v814_v8 = vld [vmem:[#allocation2 + $0x30] sm:$0x3]  ;;  %v821_v9 = vld [vmem:[#allocation2 + $0x38] sm:$0x3]  ;;  %v542_v10 = vpop.permute.xlu0 %541  ;;  %v548_v11 = vpop.permute.xlu1 %547 }
  0xb1   :  { %v815_v12 = vpack.c.bf16 %v1261_v57, %v814_v8  ;;  %v822_v13 = vpack.c.bf16 %v1261_v57, %v821_v9  ;;  %543 = vst [vmem:[#allocation2 + $0x50] sm:$0xff] %v542_v10  ;;  %549 = vst [vmem:[#allocation2 + $0x58] sm:$0xff] %v548_v11 }
  0xb3   :  { %819 = vst [vmem:[#allocation3 + $0x6] sm:$0x1] %v815_v12  ;;  %826 = vst [vmem:[#allocation3 + $0x7] sm:$0x1] %v822_v13 }
  0xb4   :  { %v828_v14 = vld [vmem:[#allocation2 + $0x40] sm:$0x3]  ;;  %v835_v15 = vld [vmem:[#allocation2 + $0x48] sm:$0x3]  ;;  %v554_v16 = vpop.permute.xlu0 %553  ;;  %v560_v17 = vpop.permute.xlu1 %559 }
  0xb5   :  { %v829_v18 = vpack.c.bf16 %v1261_v57, %v828_v14  ;;  %v836_v19 = vpack.c.bf16 %v1261_v57, %v835_v15  ;;  %555 = vst [vmem:[#allocation2 + $0x60] sm:$0xff] %v554_v16  ;;  %561 = vst [vmem:[#allocation2 + $0x68] sm:$0xff] %v560_v17 }
  0xb7   :  { %833 = vst [vmem:[#allocation3 + $0x8] sm:$0x1] %v829_v18  ;;  %840 = vst [vmem:[#allocation3 + $0x9] sm:$0x1] %v836_v19 }
  0xb8   :  { %v842_v20 = vld [vmem:[#allocation2 + $0x50] sm:$0x3]  ;;  %v849_v21 = vld [vmem:[#allocation2 + $0x58] sm:$0x3]  ;;  %v566_v22 = vpop.permute.xlu0 %565  ;;  %v572_v23 = vpop.permute.xlu1 %571 }
  0xb9   :  { %v843_v24 = vpack.c.bf16 %v1261_v57, %v842_v20  ;;  %v850_v25 = vpack.c.bf16 %v1261_v57, %v849_v21  ;;  %567 = vst [vmem:[#allocation2 + $0x70] sm:$0xff] %v566_v22  ;;  %573 = vst [vmem:[#allocation2 + $0x78] sm:$0xff] %v572_v23 }
  0xba   :  { %v1128_v26 = vld [vmem:[#allocation3] sm:$0xff] }
  0xbb   :  { %1129 = vst [vmem:[%s1382_s1] sm:$0xff] %v1128_v26  ;;  %847 = vst [vmem:[#allocation3 + $0xa] sm:$0x1] %v843_v24 }
  0xbc   :  { %854 = vst [vmem:[#allocation3 + $0xb] sm:$0x1] %v850_v25  ;;  %v856_v27 = vld [vmem:[#allocation2 + $0x60] sm:$0x3]  ;;  %v863_v28 = vld [vmem:[#allocation2 + $0x68] sm:$0x3]  ;;  %v578_v29 = vpop.permute.xlu0 %577  ;;  %v584_v30 = vpop.permute.xlu1 %583 }
  0xbd   :  { %v857_v31 = vpack.c.bf16 %v1261_v57, %v856_v27  ;;  %v864_v32 = vpack.c.bf16 %v1261_v57, %v863_v28  ;;  %579 = vst [vmem:[#allocation2 + $0x80] sm:$0xff] %v578_v29  ;;  %585 = vst [vmem:[#allocation2 + $0x88] sm:$0xff] %v584_v30 }
  0xbf   :  { %861 = vst [vmem:[#allocation3 + $0xc] sm:$0x1] %v857_v31  ;;  %868 = vst [vmem:[#allocation3 + $0xd] sm:$0x1] %v864_v32 }
  0xc0   :  { %v870_v33 = vld [vmem:[#allocation2 + $0x70] sm:$0x3]  ;;  %v877_v34 = vld [vmem:[#allocation2 + $0x78] sm:$0x3]  ;;  %v590_v35 = vpop.permute.xlu0 %589  ;;  %v596_v36 = vpop.permute.xlu1 %595 }
  0xc1   :  { %v871_v37 = vpack.c.bf16 %v1261_v57, %v870_v33  ;;  %v878_v38 = vpack.c.bf16 %v1261_v57, %v877_v34  ;;  %591 = vst [vmem:[#allocation2 + $0x90] sm:$0xff] %v590_v35  ;;  %597 = vst [vmem:[#allocation2 + $0x98] sm:$0xff] %v596_v36 }
  0xc3   :  { %875 = vst [vmem:[#allocation3 + $0xe] sm:$0x1] %v871_v37  ;;  %882 = vst [vmem:[#allocation3 + $0xf] sm:$0x1] %v878_v38 }
  0xc4   :  { %v884_v39 = vld [vmem:[#allocation2 + $0x80] sm:$0x3]  ;;  %v891_v40 = vld [vmem:[#allocation2 + $0x88] sm:$0x3]  ;;  %v602_v41 = vpop.permute.xlu0 %601  ;;  %v608_v42 = vpop.permute.xlu1 %607 }
  0xc5   :  { %v885_v43 = vpack.c.bf16 %v1261_v57, %v884_v39  ;;  %v892_v44 = vpack.c.bf16 %v1261_v57, %v891_v40  ;;  %603 = vst [vmem:[#allocation2 + $0xa0] sm:$0xff] %v602_v41  ;;  %609 = vst [vmem:[#allocation2 + $0xa8] sm:$0xff] %v608_v42 }
  0xc7   :  { %889 = vst [vmem:[#allocation3 + $0x10] sm:$0x1] %v885_v43  ;;  %896 = vst [vmem:[#allocation3 + $0x11] sm:$0x1] %v892_v44 }
  0xc8   :  { %v898_v45 = vld [vmem:[#allocation2 + $0x90] sm:$0x3]  ;;  %v905_v46 = vld [vmem:[#allocation2 + $0x98] sm:$0x3]  ;;  %v614_v47 = vpop.permute.xlu0 %613  ;;  %v620_v48 = vpop.permute.xlu1 %619 }
  0xc9   :  { %v899_v49 = vpack.c.bf16 %v1261_v57, %v898_v45  ;;  %v906_v50 = vpack.c.bf16 %v1261_v57, %v905_v46  ;;  %615 = vst [vmem:[#allocation2 + $0xb0] sm:$0xff] %v614_v47  ;;  %621 = vst [vmem:[#allocation2 + $0xb8] sm:$0xff] %v620_v48 }
  0xca   :  { %v1130_v51 = vld [vmem:[#allocation3 + $0x8] sm:$0xff] }
  0xcb   :  { %1131 = vst [vmem:[%s1382_s1 + $0x8] sm:$0xff] %v1130_v51  ;;  %903 = vst [vmem:[#allocation3 + $0x12] sm:$0x1] %v899_v49 }
  0xcc   :  { %910 = vst [vmem:[#allocation3 + $0x13] sm:$0x1] %v906_v50  ;;  %v912_v52 = vld [vmem:[#allocation2 + $0xa0] sm:$0x3]  ;;  %v919_v53 = vld [vmem:[#allocation2 + $0xa8] sm:$0x3]  ;;  %v626_v54 = vpop.permute.xlu0 %625  ;;  %v632_v55 = vpop.permute.xlu1 %631 }
  0xcd   :  { %v913_v56 = vpack.c.bf16 %v1261_v57, %v912_v52  ;;  %v920_v58 = vpack.c.bf16 %v1261_v57, %v919_v53  ;;  %627 = vst [vmem:[#allocation2 + $0xc0] sm:$0xff] %v626_v54  ;;  %633 = vst [vmem:[#allocation2 + $0xc8] sm:$0xff] %v632_v55 }
  0xcf   :  { %917 = vst [vmem:[#allocation3 + $0x14] sm:$0x1] %v913_v56  ;;  %924 = vst [vmem:[#allocation3 + $0x15] sm:$0x1] %v920_v58 }
  0xd0   :  { %v926_v59 = vld [vmem:[#allocation2 + $0xb0] sm:$0x3]  ;;  %v933_v60 = vld [vmem:[#allocation2 + $0xb8] sm:$0x3]  ;;  %v638_v61 = vpop.permute.xlu0 %637  ;;  %v644_v62 = vpop.permute.xlu1 %643 }
  0xd1   :  { %v927_v63 = vpack.c.bf16 %v1261_v57, %v926_v59  ;;  %v934_v0 = vpack.c.bf16 %v1261_v57, %v933_v60  ;;  %639 = vst [vmem:[#allocation2 + $0xd0] sm:$0xff] %v638_v61  ;;  %645 = vst [vmem:[#allocation2 + $0xd8] sm:$0xff] %v644_v62 }
  0xd3   :  { %931 = vst [vmem:[#allocation3 + $0x16] sm:$0x1] %v927_v63  ;;  %938 = vst [vmem:[#allocation3 + $0x17] sm:$0x1] %v934_v0 }
  0xd4   :  { %v940_v1 = vld [vmem:[#allocation2 + $0xc0] sm:$0x3]  ;;  %v947_v2 = vld [vmem:[#allocation2 + $0xc8] sm:$0x3]  ;;  %v650_v3 = vpop.permute.xlu0 %649  ;;  %v656_v4 = vpop.permute.xlu1 %655 }
  0xd5   :  { %v941_v5 = vpack.c.bf16 %v1261_v57, %v940_v1  ;;  %v948_v6 = vpack.c.bf16 %v1261_v57, %v947_v2  ;;  %651 = vst [vmem:[#allocation2 + $0xe0] sm:$0xff] %v650_v3  ;;  %657 = vst [vmem:[#allocation2 + $0xe8] sm:$0xff] %v656_v4 }
  0xd7   :  { %945 = vst [vmem:[#allocation3 + $0x18] sm:$0x1] %v941_v5  ;;  %952 = vst [vmem:[#allocation3 + $0x19] sm:$0x1] %v948_v6 }
  0xd8   :  { %v954_v7 = vld [vmem:[#allocation2 + $0xd0] sm:$0x3]  ;;  %v961_v8 = vld [vmem:[#allocation2 + $0xd8] sm:$0x3]  ;;  %v662_v9 = vpop.permute.xlu0 %661  ;;  %v668_v10 = vpop.permute.xlu1 %667 }
  0xd9   :  { %v955_v11 = vpack.c.bf16 %v1261_v57, %v954_v7  ;;  %v962_v12 = vpack.c.bf16 %v1261_v57, %v961_v8  ;;  %663 = vst [vmem:[#allocation2 + $0xf0] sm:$0xff] %v662_v9  ;;  %669 = vst [vmem:[#allocation2 + $0xf8] sm:$0xff] %v668_v10 }
  0xda   :  { %v1132_v13 = vld [vmem:[#allocation3 + $0x10] sm:$0xff] }
  0xdb   :  { %1133 = vst [vmem:[%s1382_s1 + $0x10] sm:$0xff] %v1132_v13  ;;  %959 = vst [vmem:[#allocation3 + $0x1a] sm:$0x1] %v955_v11 }
  0xdc   :  { %966 = vst [vmem:[#allocation3 + $0x1b] sm:$0x1] %v962_v12  ;;  %v968_v14 = vld [vmem:[#allocation2 + $0xe0] sm:$0x3]  ;;  %v975_v15 = vld [vmem:[#allocation2 + $0xe8] sm:$0x3]  ;;  %v674_v16 = vpop.permute.xlu0 %673  ;;  %v680_v17 = vpop.permute.xlu1 %679 }
  0xdd   :  { %v969_v18 = vpack.c.bf16 %v1261_v57, %v968_v14  ;;  %v976_v19 = vpack.c.bf16 %v1261_v57, %v975_v15  ;;  %675 = vst [vmem:[#allocation2 + $0x100] sm:$0xff] %v674_v16  ;;  %681 = vst [vmem:[#allocation2 + $0x108] sm:$0xff] %v680_v17 }
  0xdf   :  { %973 = vst [vmem:[#allocation3 + $0x1c] sm:$0x1] %v969_v18  ;;  %980 = vst [vmem:[#allocation3 + $0x1d] sm:$0x1] %v976_v19 }
  0xe0   :  { %v982_v20 = vld [vmem:[#allocation2 + $0xf0] sm:$0x3]  ;;  %v989_v21 = vld [vmem:[#allocation2 + $0xf8] sm:$0x3]  ;;  %v686_v22 = vpop.permute.xlu0 %685  ;;  %v692_v23 = vpop.permute.xlu1 %691 }
  0xe1   :  { %v983_v24 = vpack.c.bf16 %v1261_v57, %v982_v20  ;;  %v990_v25 = vpack.c.bf16 %v1261_v57, %v989_v21  ;;  %687 = vst [vmem:[#allocation2 + $0x110] sm:$0xff] %v686_v22  ;;  %693 = vst [vmem:[#allocation2 + $0x118] sm:$0xff] %v692_v23 }
  0xe3   :  { %987 = vst [vmem:[#allocation3 + $0x1e] sm:$0x1] %v983_v24  ;;  %994 = vst [vmem:[#allocation3 + $0x1f] sm:$0x1] %v990_v25 }
  0xe4   :  { %v996_v26 = vld [vmem:[#allocation2 + $0x100] sm:$0x3]  ;;  %v1003_v27 = vld [vmem:[#allocation2 + $0x108] sm:$0x3]  ;;  %v698_v28 = vpop.permute.xlu0 %697  ;;  %v704_v29 = vpop.permute.xlu1 %703 }
  0xe5   :  { %v997_v30 = vpack.c.bf16 %v1261_v57, %v996_v26  ;;  %v1004_v31 = vpack.c.bf16 %v1261_v57, %v1003_v27  ;;  %699 = vst [vmem:[#allocation2 + $0x120] sm:$0xff] %v698_v28  ;;  %705 = vst [vmem:[#allocation2 + $0x128] sm:$0xff] %v704_v29 }
  0xe7   :  { %1001 = vst [vmem:[#allocation3 + $0x20] sm:$0x1] %v997_v30  ;;  %1008 = vst [vmem:[#allocation3 + $0x21] sm:$0x1] %v1004_v31 }
  0xe8   :  { %v1010_v32 = vld [vmem:[#allocation2 + $0x110] sm:$0x3]  ;;  %v1017_v33 = vld [vmem:[#allocation2 + $0x118] sm:$0x3]  ;;  %v710_v34 = vpop.permute.xlu0 %709  ;;  %v716_v35 = vpop.permute.xlu1 %715 }
  0xe9   :  { %v1011_v36 = vpack.c.bf16 %v1261_v57, %v1010_v32  ;;  %v1018_v37 = vpack.c.bf16 %v1261_v57, %v1017_v33  ;;  %711 = vst [vmem:[#allocation2 + $0x130] sm:$0xff] %v710_v34  ;;  %717 = vst [vmem:[#allocation2 + $0x138] sm:$0xff] %v716_v35 }
  0xea   :  { %v1134_v38 = vld [vmem:[#allocation3 + $0x18] sm:$0xff] }
  0xeb   :  { %1135 = vst [vmem:[%s1382_s1 + $0x18] sm:$0xff] %v1134_v38  ;;  %1015 = vst [vmem:[#allocation3 + $0x22] sm:$0x1] %v1011_v36 }
  0xec   :  { %1022 = vst [vmem:[#allocation3 + $0x23] sm:$0x1] %v1018_v37  ;;  %v1024_v39 = vld [vmem:[#allocation2 + $0x120] sm:$0x3]  ;;  %v1031_v40 = vld [vmem:[#allocation2 + $0x128] sm:$0x3]  ;;  %v722_v41 = vpop.permute.xlu0 %721  ;;  %v728_v42 = vpop.permute.xlu1 %727 }
  0xed   :  { %v1025_v43 = vpack.c.bf16 %v1261_v57, %v1024_v39  ;;  %v1032_v44 = vpack.c.bf16 %v1261_v57, %v1031_v40  ;;  %723 = vst [vmem:[#allocation2 + $0x140] sm:$0xff] %v722_v41  ;;  %729 = vst [vmem:[#allocation2 + $0x148] sm:$0xff] %v728_v42 }
  0xef   :  { %1029 = vst [vmem:[#allocation3 + $0x24] sm:$0x1] %v1025_v43  ;;  %1036 = vst [vmem:[#allocation3 + $0x25] sm:$0x1] %v1032_v44 }
  0xf0   :  { %v1038_v45 = vld [vmem:[#allocation2 + $0x130] sm:$0x3]  ;;  %v1045_v46 = vld [vmem:[#allocation2 + $0x138] sm:$0x3]  ;;  %v734_v47 = vpop.permute.xlu0 %733  ;;  %v740_v48 = vpop.permute.xlu1 %739 }
  0xf1   :  { %v1039_v49 = vpack.c.bf16 %v1261_v57, %v1038_v45  ;;  %v1046_v50 = vpack.c.bf16 %v1261_v57, %v1045_v46  ;;  %735 = vst [vmem:[#allocation2 + $0x150] sm:$0xff] %v734_v47  ;;  %741 = vst [vmem:[#allocation2 + $0x158] sm:$0xff] %v740_v48 }
  0xf3   :  { %1043 = vst [vmem:[#allocation3 + $0x26] sm:$0x1] %v1039_v49  ;;  %1050 = vst [vmem:[#allocation3 + $0x27] sm:$0x1] %v1046_v50 }
  0xf4   :  { %v1052_v51 = vld [vmem:[#allocation2 + $0x140] sm:$0x3]  ;;  %v1059_v52 = vld [vmem:[#allocation2 + $0x148] sm:$0x3]  ;;  %v746_v53 = vpop.permute.xlu0 %745  ;;  %v752_v54 = vpop.permute.xlu1 %751 }
  0xf5   :  { %v1053_v55 = vpack.c.bf16 %v1261_v57, %v1052_v51  ;;  %v1060_v56 = vpack.c.bf16 %v1261_v57, %v1059_v52  ;;  %747 = vst [vmem:[#allocation2 + $0x160] sm:$0xff] %v746_v53  ;;  %753 = vst [vmem:[#allocation2 + $0x168] sm:$0xff] %v752_v54 }
  0xf7   :  { %1057 = vst [vmem:[#allocation3 + $0x28] sm:$0x1] %v1053_v55  ;;  %1064 = vst [vmem:[#allocation3 + $0x29] sm:$0x1] %v1060_v56 }
  0xf8   :  { %v1066_v58 = vld [vmem:[#allocation2 + $0x150] sm:$0x3]  ;;  %v1073_v59 = vld [vmem:[#allocation2 + $0x158] sm:$0x3]  ;;  %v758_v60 = vpop.permute.xlu0 %757  ;;  %v764_v61 = vpop.permute.xlu1 %763 }
  0xf9   :  { %v1067_v62 = vpack.c.bf16 %v1261_v57, %v1066_v58  ;;  %v1074_v63 = vpack.c.bf16 %v1261_v57, %v1073_v59  ;;  %759 = vst [vmem:[#allocation2 + $0x170] sm:$0xff] %v758_v60  ;;  %765 = vst [vmem:[#allocation2 + $0x178] sm:$0xff] %v764_v61 }
  0xfa   :  { %v1136_v0 = vld [vmem:[#allocation3 + $0x20] sm:$0xff] }
  0xfb   :  { %1137 = vst [vmem:[%s1382_s1 + $0x20] sm:$0xff] %v1136_v0  ;;  %1071 = vst [vmem:[#allocation3 + $0x2a] sm:$0x1] %v1067_v62 }
  0xfc   :  { %1078 = vst [vmem:[#allocation3 + $0x2b] sm:$0x1] %v1074_v63  ;;  %v1080_v1 = vld [vmem:[#allocation2 + $0x160] sm:$0x3]  ;;  %v1087_v2 = vld [vmem:[#allocation2 + $0x168] sm:$0x3]  ;;  %v769_v3 = vpop.permute.xlu0 %768 }
  0xfd   :  { %v1081_v4 = vpack.c.bf16 %v1261_v57, %v1080_v1  ;;  %v1088_v5 = vpack.c.bf16 %v1261_v57, %v1087_v2  ;;  %770 = vst [vmem:[#allocation2 + $0x180] sm:$0xff] %v769_v3 }
  0xff   :  { %1085 = vst [vmem:[#allocation3 + $0x2c] sm:$0x1] %v1081_v4  ;;  %1092 = vst [vmem:[#allocation3 + $0x2d] sm:$0x1] %v1088_v5 }
 0x100   :  { %v1094_v6 = vld [vmem:[#allocation2 + $0x170] sm:$0x3]  ;;  %v1101_v7 = vld [vmem:[#allocation2 + $0x178] sm:$0x3] }
 0x101   :  { %v1095_v8 = vpack.c.bf16 %v1261_v57, %v1094_v6  ;;  %v1102_v9 = vpack.c.bf16 %v1261_v57, %v1101_v7 }
 0x103   :  { %1099 = vst [vmem:[#allocation3 + $0x2e] sm:$0x1] %v1095_v8  ;;  %1106 = vst [vmem:[#allocation3 + $0x2f] sm:$0x1] %v1102_v9 }
 0x104   :  { %v1108_v10 = vld [vmem:[#allocation2 + $0x180] sm:$0x3] }
 0x105   :  { %v1109_v57 = vpack.c.bf16 %v1261_v57, %v1108_v10 }
 0x107   :  { %1113 = vst [vmem:[#allocation3 + $0x30] sm:$0x1] %v1109_v57 }
 0x10a   :  { %v1138_v11 = vld [vmem:[#allocation3 + $0x28] sm:$0xff] }
 0x10b   :  { %1139 = vst [vmem:[%s1382_s1 + $0x28] sm:$0xff] %v1138_v11 }
 0x10e   :  { %v1149_v12 = vld [vmem:[#allocation3 + $0x30] sm:$0x1] }
 0x10f   :  { %1258 = vst [vmem:[%s1382_s1 + $0x30] sm:$0x1] %v1149_v12 }

// kernel: cbam_forward.6
= control target key start
LH: loop header
LB: loop body
LE: loop exit
PB: predicated region body
PF: predicated region fallthrough
CT: control target
= control target key end

     0   :  { %s532_s9 = smov 0   ;;  %s534_s10 = smov 0   ;;  %s632_s0 = inlined_call_operand.vmem [shape: bf16[2,4,64,32], index: 0, kind: input, shape index: {}]   ;;  %s633_s1 = inlined_call_operand.vmem [shape: f32[2,1,32], index: 1, kind: input, shape index: {}]   ;;  %s634_s2 = inlined_call_operand.vmem [shape: f32[2,4,64,2], index: 2, kind: output, shape index: {}]  }
   0x1   :  { %s536_s11 = smov 0   ;;  %s538_s12 = smov 0  }
   0x2   :  { %s540_s13 = smov 0  }
   0x3 LB: > { %s21_s14 = sadd.s32 1, %s507_s11  ;;  %s24_s15 = sadd.s32 1, %s511_s12  ;;  %s515_s13 = sphi %s540_s13, %s12_s13   ;;  %s511_s12 = sphi %s538_s12, %s638_s12   ;;  %s507_s11 = sphi %s536_s11, %s637_s11   ;;  %s503_s10 = sphi %s534_s10, %s636_s10   ;;  %s499_s9 = sphi %s532_s9, %s635_s9  }
   0x4   : > { %p22_p0 = scmp.ge.s32.totalorder %s21_s14, 4  ;;  %p408_p1 = scmp.ge.s32.totalorder %s515_s13, 1 }
   0x5   : > { %p140_p2 = scmp.lt.s32.totalorder %s515_s13, 9 }
   0x6   : > { %s640_s14 = smov (%p22_p0, %s21_s14), 0  ;;  %s642_s15 = smov (!%p22_p0, %s24_s15), %s511_s12 }
   0x7   : > { %p141_p3 = pnand %p408_p1, %p140_p2  ;;  %p26_p4 = scmp.ge.s32.totalorder %s642_s15, 2 }
   0x8   : > { %p173_p5 = scmp.lt.s32.totalorder (!%p141_p3), %s503_s10, 1  ;;  %p175_p6 = scmp.lt.s32.totalorder (!%p141_p3), %s499_s9, 3  ;;  %vm225_vm0 = vcmask (!%p141_p3), 261120   ;;  %vm282_vm1 = vcmask (!%p141_p3), 7168   ;;  %vm291_vm2 = vcmask (!%p141_p3), 15360  }
   0x9   : > { %s644_s15 = smov (%p26_p4, %s642_s15), 0  ;;  %144 = sbr.rel (%p141_p3) target bundleno = 199 (0xc7), region = 28 }
  0x10   : > { %s646_s10 = smov (!%p173_p5, %s503_s10), 1  ;;  %s648_s9 = smov (!%p175_p6, %s499_s9), 3 }
  0x11   : > { %s410_s16 = sshll.u32 %s646_s10, 5  ;;  %s409_s17 = sshll.u32 %s648_s9, 3 }
  0x12   : > { %s184_s20 = scalar_lea.vmem %s633_s1, %s646_s10  ;;  %s565_s21 = sadd.s32 %s410_s16, %s409_s17 }
  0x13   : > { %s411_s22 = sshll.u32 %s565_s21, 2  ;;  %v415_v0 = vld [vmem:[%s184_s20] ss:$0 sm:$0xff]  ;;  %s414_s26 = sshll.u32 %s565_s21, 3 }
  0x14   : > { %s181_s25 = scalar_lea.vmem %s632_s0, %s411_s22  ;;  %s591_s29 = scalar_lea.vmem %s634_s2, %s414_s26 }
  0x15   : > { %v434_v1 = vld [vmem:[%s181_s25 + $0x8] sm:$0xff]   ;;  %v419_v2 = vld [vmem:[%s181_s25] sm:$0xff]   ;;  %v435_v3 = vld [vmem:[%s181_s25 + $0x10] sm:$0xff]  }
  0x16   : > { %v424_v4 = vunpack.c.l.bf16 %v434_v1  ;;  %v420_v5 = vunpack.c.l.bf16 %v419_v2  ;;  %v425_v6 = vunpack.c.h.bf16 %v434_v1  ;;  %v421_v7 = vunpack.c.h.bf16 %v419_v2  ;;  %v436_v14 = vld [vmem:[%s181_s25 + $0x18] sm:$0xff]  }
  0x17   : > { %v429_v8 = vunpack.c.h.bf16 %v435_v3  ;;  %v428_v9 = vunpack.c.l.bf16 %v435_v3  ;;  %v433_v17 = vunpack.c.h.bf16 %v436_v14  ;;  %v432_v18 = vunpack.c.l.bf16 %v436_v14 }
  0x18   : > { %v219_v10 = vmul.f32 %v424_v4, %v415_v0  ;;  %v217_v11 = vmul.f32 %v420_v5, %v415_v0  ;;  %v220_v12 = vmul.f32 %v425_v6, %v415_v0  ;;  %v218_v13 = vmul.f32 %v421_v7, %v415_v0 }
  0x19   : > { %v222_v21 = vmul.f32 %v429_v8, %v415_v0  ;;  %v221_v22 = vmul.f32 %v428_v9, %v415_v0  ;;  %v224_v25 = vmul.f32 %v433_v17, %v415_v0  ;;  %v223_v26 = vmul.f32 %v432_v18, %v415_v0 }
  0x1a   : > { %v232_v15 = vsel %vm225_vm0, %v219_v10, 0.0  ;;  %v226_v16 = vsel %vm225_vm0, %v217_v11, 0.0  ;;  %v235_v19 = vsel %vm225_vm0, %v220_v12, 0.0  ;;  %v229_v20 = vsel %vm225_vm0, %v218_v13, 0.0 }
  0x1b   : > { %233 = vadd.xlane.f32.xlu1 %v232_v15  ;;  %227 = vadd.xlane.f32.xlu0 %v226_v16  ;;  %v241_v23 = vsel %vm225_vm0, %v222_v21, 0.0  ;;  %v238_v24 = vsel %vm225_vm0, %v221_v22, 0.0  ;;  %v247_v27 = vsel %vm225_vm0, %v224_v25, 0.0  ;;  %v244_v28 = vsel %vm225_vm0, %v223_v26, 0.0 }
  0x1c   : > { %v261_v29 = vsel %vm225_vm0, %v218_v13, -inf  ;;  %v258_v30 = vsel %vm225_vm0, %v217_v11, -inf  ;;  %v267_v31 = vsel %vm225_vm0, %v220_v12, -inf  ;;  %v264_v32 = vsel %vm225_vm0, %v219_v10, -inf }
  0x1d   : > { %v273_v33 = vsel %vm225_vm0, %v222_v21, -inf  ;;  %v270_v34 = vsel %vm225_vm0, %v221_v22, -inf  ;;  %v279_v35 = vsel %vm225_vm0, %v224_v25, -inf  ;;  %v276_v36 = vsel %vm225_vm0, %v223_v26, -inf }
  0x1f   : > { %236 = vadd.xlane.f32.xlu1 %v235_v19  ;;  %230 = vadd.xlane.f32.xlu0 %v229_v20 }
  0x23   : > { %242 = vadd.xlane.f32.xlu1 %v241_v23  ;;  %239 = vadd.xlane.f32.xlu0 %v238_v24 }
  0x27   : > { %248 = vadd.xlane.f32.xlu1 %v247_v27  ;;  %245 = vadd.xlane.f32.xlu0 %v244_v28 }
  0x2b   : > { %262 = vmax.xlane.f32.xlu1 %v261_v29  ;;  %259 = vmax.xlane.f32.xlu0 %v258_v30 }
  0x2f   : > { %268 = vmax.xlane.f32.xlu1 %v267_v31  ;;  %265 = vmax.xlane.f32.xlu0 %v264_v32 }
  0x33   : > { %274 = vmax.xlane.f32.xlu1 %v273_v33  ;;  %271 = vmax.xlane.f32.xlu0 %v270_v34 }
  0x37   : > { %280 = vmax.xlane.f32.xlu1 %v279_v35  ;;  %277 = vmax.xlane.f32.xlu0 %v276_v36 }
  0xa8   : > { %v234_v37 = vpop.xlane.xlu1 %233  ;;  %v228_v38 = vpop.xlane.xlu0 %227 }
  0xa9   : > { %v250_v45 = vmul.f32 0.03125, %v228_v38  ;;  %v252_v51 = vmul.f32 0.03125, %v234_v37 }
  0xac   : > { %v237_v39 = vpop.xlane.xlu1 %236  ;;  %v231_v40 = vpop.xlane.xlu0 %230 }
  0xad   : > { %v251_v46 = vmul.f32 0.03125, %v231_v40  ;;  %v253_v52 = vmul.f32 0.03125, %v237_v39 }
  0xb0   : > { %v243_v41 = vpop.xlane.xlu1 %242  ;;  %v240_v42 = vpop.xlane.xlu0 %239 }
  0xb1   : > { %v255_v57 = vmul.f32 0.03125, %v243_v41  ;;  %v254_v58 = vmul.f32 0.03125, %v240_v42 }
  0xb4   : > { %v249_v43 = vpop.xlane.xlu1 %248  ;;  %v246_v44 = vpop.xlane.xlu0 %245 }
  0xb5   : > { %v257_v63 = vmul.f32 0.03125, %v249_v43  ;;  %v256_v0 = vmul.f32 0.03125, %v246_v44 }
  0xb8   : > { %v263_v47 = vpop.xlane.xlu1 %262  ;;  %v260_v48 = vpop.xlane.xlu0 %259 }
  0xb9   : > { %v284_v49 = vsel %vm282_vm1, %v251_v46, %v263_v47  ;;  %v283_v50 = vsel %vm282_vm1, %v250_v45, %v260_v48 }
  0xba   : > { %293 = vst.msk [vmem:[%s591_s29 + $0x8] sm:$0xff] %vm291_vm2, %v284_v49  ;;  %292 = vst.msk [vmem:[%s591_s29] sm:$0xff] %vm291_vm2, %v283_v50 }
  0xbc   : > { %v269_v53 = vpop.xlane.xlu1 %268  ;;  %v266_v54 = vpop.xlane.xlu0 %265 }
  0xbd   : > { %v286_v55 = vsel %vm282_vm1, %v253_v52, %v269_v53  ;;  %v285_v56 = vsel %vm282_vm1, %v252_v51, %v266_v54 }
  0xbe   : > { %295 = vst.msk [vmem:[%s591_s29 + $0x18] sm:$0xff] %vm291_vm2, %v286_v55  ;;  %294 = vst.msk [vmem:[%s591_s29 + $0x10] sm:$0xff] %vm291_vm2, %v285_v56 }
  0xc0   : > { %v275_v59 = vpop.xlane.xlu1 %274  ;;  %v272_v60 = vpop.xlane.xlu0 %271 }
  0xc1   : > { %v288_v61 = vsel %vm282_vm1, %v255_v57, %v275_v59  ;;  %v287_v62 = vsel %vm282_vm1, %v254_v58, %v272_v60 }
  0xc2   : > { %297 = vst.msk [vmem:[%s591_s29 + $0x28] sm:$0xff] %vm291_vm2, %v288_v61  ;;  %296 = vst.msk [vmem:[%s591_s29 + $0x20] sm:$0xff] %vm291_vm2, %v287_v62 }
  0xc4   : > { %v281_v1 = vpop.xlane.xlu1 %280  ;;  %v278_v2 = vpop.xlane.xlu0 %277 }
  0xc5   : > { %v290_v3 = vsel %vm282_vm1, %v257_v63, %v281_v1  ;;  %v289_v4 = vsel %vm282_vm1, %v256_v0, %v278_v2 }
  0xc6   : > { %299 = vst.msk [vmem:[%s591_s29 + $0x38] sm:$0xff] %vm291_vm2, %v290_v3  ;;  %298 = vst.msk [vmem:[%s591_s29 + $0x30] sm:$0xff] %vm291_vm2, %v289_v4 }
  0xc7 PF: > { %s12_s13 = sadd.s32 1, %s515_s13   ;;  %s635_s9 = smov %s507_s11 }
  0xc8   : > { %p9_p7 = scmp.ge.s32.totalorder %s12_s13, 10   ;;  %s636_s10 = smov %s511_s12 }
  0xc9   : > { %s637_s11 = smov %s640_s14  ;;  %s638_s12 = smov %s644_s15 }
  0xca   :  { %11 = sbr.rel (!%p9_p7) target bundleno = 3 (0x3), region = 61 }

// kernel: cbam_forward.4
= control target key start
LH: loop header
LB: loop body
LE: loop exit
PB: predicated region body
PF: predicated region fallthrough
CT: control target
= control target key end

     0   :  { %s5269_s21 = smov 0   ;;  %s5271_s22 = smov 0   ;;  %s6547_s0 = inlined_call_operand.vmem [shape: bf16[2,6,10,10,32], index: 0, kind: input, shape index: {}, may-alias: {0,1,2}]   ;;  %s6548_s1 = inlined_call_operand.vmem [shape: bf16[2,6,10,10,32], index: 1, kind: input, shape index: {}, may-alias: {0,1,2}]   ;;  %s6549_s2 = inlined_call_operand.vmem [shape: bf16[2,6,10,10,32], index: 2, kind: input, shape index: {}, may-alias: {0,1,2}]   ;;  %s6550_s3 = inlined_call_operand.vmem [shape: bf16[864,32], index: 3, kind: input, shape index: {}]   ;;  %s6551_s4 = inlined_call_operand.vmem [shape: f32[1,32], index: 4, kind: input, shape index: {}]   ;;  %s6552_s5 = inlined_call_operand.vmem [shape: f32[1,32], index: 5, kind: input, shape index: {}]   ;;  %s6553_s6 = inlined_call_operand.vmem [shape: bf16[2,4,64,32], index: 6, kind: output, shape index: {}]  }
   0x1   :  { %s5273_s23 = smov 0   ;;  %s5275_s24 = smov 0  }
   0x2   :  { %s5277_s25 = smov 0  }
   0x3 LB: > { %s25_s26 = sadd.s32 1, %s5224_s23  ;;  %s28_s27 = sadd.s32 1, %s5228_s24  ;;  %s5232_s25 = sphi %s5277_s25, %s16_s25   ;;  %s5228_s24 = sphi %s5275_s24, %s6646_s24   ;;  %s5224_s23 = sphi %s5273_s23, %s6645_s23   ;;  %s5220_s22 = sphi %s5271_s22, %s6644_s22   ;;  %s5216_s21 = sphi %s5269_s21, %s6643_s21  }
   0x4   : > { %p26_p0 = scmp.ge.s32.totalorder %s25_s26, 4  ;;  %p4059_p1 = scmp.ge.s32.totalorder %s5232_s25, 1 }
   0x5   : > { %p272_p2 = scmp.lt.s32.totalorder %s5232_s25, 9 }
   0x6   : > { %s6648_s26 = smov (%p26_p0, %s25_s26), 0  ;;  %s6650_s27 = smov (!%p26_p0, %s28_s27), %s5228_s24 }
   0x7   : > { %p273_p3 = pnand %p4059_p1, %p272_p2  ;;  %p30_p4 = scmp.ge.s32.totalorder %s6650_s27, 2 }
   0x9   : > { %s6652_s27 = smov (%p30_p4, %s6650_s27), 0  ;;  %276 = sbr.rel (%p273_p3) target bundleno = 497 (0x1f1), region = 44 }
  0x10   : > { %v5101_v0 = vld [vmem:[%s6550_s3 + $0x10] sm:$0xff]   ;;  %p330_p5 = scmp.lt.s32.totalorder %s5220_s22, 1  ;;  %p332_p6 = scmp.lt.s32.totalorder %s5216_s21, 5  ;;  %v5103_v2 = vld [vmem:[%s6550_s3 + $0x18] sm:$0xff]   ;;  %v5323_v4 = vld [vmem:[%s6550_s3] sm:$0xff]   ;;  %vm538_vm3 = vcmask 261120  }
  0x11   : > { %v5102_v1 = vld [vmem:[%s6550_s3 + $0xd0] sm:$0xff]   ;;  %4521 = vmatprep.subr.bf16.mxu1 %v5101_v0  ;;  %v5104_v3 = vld [vmem:[%s6550_s3 + $0xd8] sm:$0xff]   ;;  %s339_s17 = sadd.s32 1, %s5216_s21  ;;  %v5330_v5 = vld [vmem:[%s6550_s3 + $0xe0] sm:$0xff]   ;;  %vm395_vm0 = vsmask.f32 3328 }
  0x12   : > { %s6654_s22 = smov (!%p330_p5, %s5220_s22), 1  ;;  %4677 = vmatprep.subr.bf16.mxu0 %v5102_v1  ;;  %4522 = vmatpush3.bf16.msra.mxu1 %v5101_v0  ;;  %p5338_p7 = scmp.lt.s32.totalorder %s339_s17, 5  ;;  %vm396_vm1 = vsmask.f32 7440  ;;  %v5108_v63 = vld [vmem:[%s6550_s3 + $0x8] sm:$0xff]   ;;  %vm733_vm4 = vcmask 1042432  }
  0x13   : > { %s333_s12 = scalar_select %p332_p6, %s5216_s21, 5  ;;  %4678 = vmatpush3.bf16.msra.mxu0 %v5102_v1  ;;  %4523 = vmatprep.subr.bf16.mxu1 %v5103_v2  ;;  %vm5384_vm2 = vmor %vm395_vm0, %vm396_vm1  ;;  %vm734_vm5 = vcmask 1046532   ;;  %vm3909_vm7 = vcmask 257024  }
  0x14   : > { %s5318_s13 = smul.u32 120, %s6654_s22  ;;  %4679 = vmatprep.subr.bf16.mxu0 %v5104_v3  ;;  %s6656_s17 = smov (!%p5338_p7, %s339_s17), 5  ;;  %vm5535_vm6 = vmor %vm733_vm4, %vm734_vm5 }
  0x15   : > { %s5057_s14 = smul.u32 20, %s333_s12  ;;  %p363_p9 = scmp.lt.s32.totalorder %s5216_s21, 3 }
  0x16   : > { %4524 = vmatpush3.bf16.msra.mxu1 %v5103_v2  ;;  %s5059_s9 = smul.u32 20, %s6656_s17 }
  0x17   : > { %s336_s18 = sadd.s32 %s5318_s13, %s5057_s14  ;;  %4680 = vmatpush3.bf16.msra.mxu0 %v5104_v3  ;;  %4533 = vmatprep.subr.bf16.mxu1 %v5323_v4 }
  0x18   : > { %s4060_s28 = sshll.u32 %s336_s18, 2  ;;  %4689 = vmatprep.subr.bf16.mxu0 %v5330_v5  ;;  %s346_s10 = sadd.s32 %s5059_s9, %s5318_s13 }
  0x19   : > { %s5336_s7 = scalar_lea.vmem %s6547_s0, %s4060_s28  ;;  %s4061_s11 = sshll.u32 %s346_s10, 2 }
  0x1a   : > { %v5344_v6 = vld [vmem:[%s5336_s7] sm:$0xf]  ;;  %v5347_v7 = vld [vmem:[%s5336_s7 + $0x4] sm:$0x1]  ;;  %v5350_v8 = vld [vmem:[%s5336_s7 + $0x8] sm:$0xf]  ;;  %s5402_s15 = scalar_lea.vmem %s6548_s1, %s4061_s11 }
  0x1b   : > { %v5353_v9 = vld [vmem:[%s5336_s7 + $0xc] sm:$0x1]  ;;  %v5356_v10 = vld [vmem:[%s5336_s7 + $0x10] sm:$0xf]  ;;  %v5359_v11 = vld [vmem:[%s5336_s7 + $0x14] sm:$0x1] }
  0x1c   : > { %v5364_v13 = vld [vmem:[%s5336_s7 + $0x18] sm:$0xf]  ;;  %v399_v14 = vshrl.u32 %v5344_v6, 16  ;;  %v402_v15 = vshll.u32 %v5344_v6, 16  ;;  %v408_v16 = vshll.u32 %v5347_v7, 16  ;;  %v413_v17 = vshrl.u32 %v5350_v8, 16 }
  0x1d   : > { %v416_v18 = vshll.u32 %v5350_v8, 16  ;;  %v422_v19 = vshll.u32 %v5353_v9, 16  ;;  %v427_v20 = vshrl.u32 %v5356_v10, 16  ;;  %v430_v21 = vshll.u32 %v5356_v10, 16  ;;  %v5377_v22 = vld [vmem:[%s5336_s7 + $0x1c] sm:$0x1] }
  0x1e   : > { %v401_v23 = vrot.slane %v399_v14, 4  ;;  %v404_v24 = vrot.slane %v402_v15, 5  ;;  %v415_v25 = vrot.slane %v413_v17, 4  ;;  %v410_v26 = vrot.slane %v408_v16, 5  ;;  %v5391_v45 = vld [vmem:[%s5336_s7 + $0x20] sm:$0xf] }
  0x1f   : > { %v418_v27 = vrot.slane %v416_v18, 5  ;;  %v429_v28 = vrot.slane %v427_v20, 4  ;;  %v432_v29 = vrot.slane %v430_v21, 5  ;;  %v436_v31 = vshll.u32 %v5359_v11, 16  ;;  %v1522_v56 = vld [vmem:[%s5402_s15 + $0x4] sm:$0x1] }
  0x20   : > { %v405_v30 = vor.u32 %v404_v24, %v401_v23  ;;  %v441_v32 = vshrl.u32 %v5364_v13, 16  ;;  %v444_v33 = vshll.u32 %v5364_v13, 16  ;;  %v424_v36 = vrot.slane %v422_v19, 5  ;;  %v5419_v57 = vld [vmem:[%s5402_s15 + $0x8] sm:$0xf]  ;;  %v5456_v20 = vld [vmem:[%s6550_s3 + $0x20] sm:$0xff]  }
  0x21   : > { %v419_v35 = vor.u32 %v418_v27, %v415_v25  ;;  %v433_v37 = vor.u32 %v432_v29, %v429_v28  ;;  %v450_v38 = vshll.u32 %v5377_v22, 16  ;;  %v438_v40 = vrot.slane %v436_v31, 5  ;;  %v5422_v58 = vld [vmem:[%s5402_s15 + $0xc] sm:$0x1]  ;;  %v1521_v61 = vld [vmem:[%s5402_s15] sm:$0xf] }
  0x22   : > { %v406_v39 = vrot.slane %v405_v30, 4  ;;  %v443_v41 = vrot.slane %v441_v32, 4  ;;  %v446_v42 = vrot.slane %v444_v33, 5  ;;  %v455_v53 = vshrl.u32 %v5391_v45, 16  ;;  %v5431_v62 = vld [vmem:[%s5402_s15 + $0x10] sm:$0xf] }
  0x23   : > { %v420_v43 = vrot.slane %v419_v35, 4  ;;  %v434_v44 = vrot.slane %v433_v37, 4  ;;  %v452_v48 = vrot.slane %v450_v38, 5  ;;  %v458_v59 = vshll.u32 %v5391_v45, 16  ;;  %v5437_v0 = vld [vmem:[%s5402_s15 + $0x14] sm:$0x1] }
  0x24   : > { %v411_v46 = vsel %vm5384_vm2, %v406_v39, %v410_v26  ;;  %v447_v47 = vor.u32 %v446_v42, %v443_v41  ;;  %v5440_v1 = vld [vmem:[%s5402_s15 + $0x18] sm:$0xf]  ;;  %v1663_v2 = vshrl.u32 %v1521_v61, 16  ;;  %v1666_v3 = vshll.u32 %v1521_v61, 16  ;;  %v5445_v14 = vld [vmem:[%s5402_s15 + $0x1c] sm:$0x1] }
  0x25   : > { %v5397_v49 = vsel %vm5384_vm2, %v420_v43, %v424_v36  ;;  %v5406_v50 = vsel %vm5384_vm2, %v434_v44, %v438_v40  ;;  %v5448_v15 = vld [vmem:[%s5402_s15 + $0x20] sm:$0xf]  ;;  %v1672_v16 = vshll.u32 %v1522_v56, 16  ;;  %v1677_v17 = vshrl.u32 %v5419_v57, 16  ;;  %v5461_v30 = vld [vmem:[%s5336_s7 + $0x24] sm:$0x1] }
  0x26   : > { %v448_v51 = vrot.slane %v447_v47, 4  ;;  %v4066_v52 = vcombine.low %v411_v46, %v5397_v49  ;;  %v1680_v18 = vshll.u32 %v5419_v57, 16  ;;  %v1686_v19 = vshll.u32 %v5422_v58, 16  ;;  %v5465_v36 = vld [vmem:[%s5402_s15 + $0x24] sm:$0x1]  ;;  %s350_s18 = sadd.s32 2, %s5216_s21 }
  0x27   : > { %v457_v21 = vrot.slane %v455_v53, 4  ;;  %v1665_v23 = vrot.slane %v1663_v2, 4  ;;  %v1668_v24 = vrot.slane %v1666_v3, 5  ;;  %v1691_v25 = vshrl.u32 %v5431_v62, 16  ;;  %p5739_p8 = scmp.lt.s32.totalorder %s350_s18, 5  ;;  %s6660_s21 = smov (!%p363_p9, %s5216_s21), 3 }
  0x28   : > { %v5412_v54 = vsel %vm5384_vm2, %v448_v51, %v452_v48  ;;  %4525 = vmatprep.mubr.msk.bf16.mxu1 %vm538_vm3, %v4066_v52  ;;  %v460_v26 = vrot.slane %v458_v59, 5  ;;  %v1674_v27 = vrot.slane %v1672_v16, 5  ;;  %v1679_v28 = vrot.slane %v1677_v17, 4 }
  0x29   : > { %v5427_v60 = vcombine.low %v5406_v50, %v5412_v54  ;;  %v1682_v29 = vrot.slane %v1680_v18, 5  ;;  %v1669_v31 = vor.u32 %v1668_v24, %v1665_v23  ;;  %v1688_v32 = vrot.slane %v1686_v19, 5  ;;  %v5481_v18 = vld [vmem:[%s5336_s7 + $0x28] sm:$0xf]  ;;  %s6658_s18 = smov (!%p5739_p8, %s350_s18), 5 }
  0x2a   : > { %v1693_v33 = vrot.slane %v1691_v25, 4  ;;  %v1694_v35 = vshll.u32 %v5431_v62, 16  ;;  %v1700_v38 = vshll.u32 %v5437_v0, 16  ;;  %v1705_v39 = vshrl.u32 %v5440_v1, 16  ;;  %v5486_v25 = vld [vmem:[%s5336_s7 + $0x2c] sm:$0x1] }
  0x2b   : > { %6582 = vst [vmem:[#allocation2_spill] sm:$0xff] %v5427_v60  ;;  %4526 = vmatmul.mubr.msk.bf16.vlgmr.msra.gmra.mrb[0].mxu1 %vm538_vm3, %v5427_v60  ;;  %v1683_v37 = vor.u32 %v1682_v29, %v1679_v28  ;;  %v1670_v40 = vrot.slane %v1669_v31, 4  ;;  %v1714_v42 = vshll.u32 %v5445_v14, 16  ;;  %v1719_v43 = vshrl.u32 %v5448_v15, 16  ;;  %v5493_v28 = vld [vmem:[%s5336_s7 + $0x30] sm:$0xf] }
  0x2c   : > { %4534 = vmatpush3.bf16.msra.mxu1 %v5323_v4  ;;  %v1708_v4 = vshll.u32 %v5440_v1, 16  ;;  %v1696_v41 = vrot.slane %v1694_v35, 5  ;;  %v1707_v46 = vrot.slane %v1705_v39, 4  ;;  %v464_v48 = vshll.u32 %v5461_v30, 16  ;;  %s5060_s10 = smul.u32 20, %s6658_s18 }
  0x2d   : > { %4535 = vmatprep.subr.bf16.mxu1 %v5108_v63  ;;  %v1684_v44 = vrot.slane %v1683_v37, 4  ;;  %v1675_v51 = vsel %vm5384_vm2, %v1670_v40, %v1674_v27  ;;  %v1702_v53 = vrot.slane %v1700_v38, 5  ;;  %v1721_v59 = vrot.slane %v1719_v43, 4  ;;  %v5507_v40 = vld [vmem:[%s5336_s7 + $0x38] sm:$0xf] }
  0x2e   : > { %v1710_v47 = vrot.slane %v1708_v4, 5  ;;  %v1697_v52 = vor.u32 %v1696_v41, %v1693_v33  ;;  %v1722_v61 = vshll.u32 %v5448_v15, 16  ;;  %v461_v2 = vor.u32 %v460_v26, %v457_v21  ;;  %v5496_v21 = vld [vmem:[%s5336_s7 + $0x34] sm:$0x1]  ;;  %s357_s14 = sadd.s32 %s5060_s10, %s5318_s13 }
  0x2f   : > { %v1689_v3 = vsel %vm5384_vm2, %v1684_v44, %v1688_v32  ;;  %v1716_v17 = vrot.slane %v1714_v42, 5  ;;  %v466_v26 = vrot.slane %v464_v48, 5  ;;  %v1901_v35 = vrot.slane %v5422_v58, 5  ;;  %v5513_v44 = vld [vmem:[%s5336_s7 + $0x3c] sm:$0x1]  ;;  %s4062_s13 = sshll.u32 %s357_s14, 2 }
  0x30   : > { %4536 = vmatpush3.bf16.msra.mxu1 %v5108_v63  ;;  %v1711_v56 = vor.u32 %v1710_v47, %v1707_v46  ;;  %v1728_v63 = vshll.u32 %v5465_v36, 16  ;;  %v1698_v16 = vrot.slane %v1697_v52, 4  ;;  %v1724_v23 = vrot.slane %v1722_v61, 5  ;;  %s5889_s29 = scalar_lea.vmem %s6549_s2, %s4062_s13  ;;  %s4064_s13 = sshll.u32 %s6654_s22, 5 }
  0x31   : > { %4545 = vmatprep.subr.bf16.mxu1 %v5456_v20  ;;  %v5483_v24 = vcombine.low %v1675_v51, %v1689_v3  ;;  %v462_v32 = vrot.slane %v461_v2, 4  ;;  %v1905_v38 = vrot.slane %v5437_v0, 5  ;;  %v469_v4 = vshrl.u32 %v5481_v18, 16  ;;  %v5107_v0 = vld [vmem:[%s6550_s3 + $0xe8] sm:$0xff]  }
  0x32   : > { %v1712_v19 = vrot.slane %v1711_v56, 4  ;;  %v5490_v27 = vsel %vm5384_vm2, %v1698_v16, %v1702_v53  ;;  %v1725_v29 = vor.u32 %v1724_v23, %v1721_v59  ;;  %v1730_v31 = vrot.slane %v1728_v63, 5  ;;  %v5540_v16 = vld [vmem:[%s5402_s15 + $0x28] sm:$0xf] }
  0x33   : > { %6583 = vst [vmem:[#allocation3_spill] sm:$0xff] %v5483_v24  ;;  %v4205_v39 = vcombine.low %v1689_v3, %v5490_v27  ;;  %v1909_v41 = vrot.slane %v5445_v14, 5  ;;  %v472_v42 = vshll.u32 %v5481_v18, 16  ;;  %v478_v43 = vshll.u32 %v5486_v25, 16  ;;  %v5176_v3 = vld [vmem:[%s6550_s3 + $0x1a0] sm:$0xff]  }
  0x34   : > { %v5500_v33 = vsel %vm5384_vm2, %v1712_v19, %v1716_v17  ;;  %v1726_v37 = vrot.slane %v1725_v29, 4  ;;  %v483_v46 = vshrl.u32 %v5493_v28, 16  ;;  %v471_v14 = vrot.slane %v469_v4, 4  ;;  %v5543_v17 = vld [vmem:[%s5402_s15 + $0x2c] sm:$0x1] }
  0x35   : > { %4681 = vmatprep.mubr.msk.bf16.mxu0 %vm538_vm3, %v4205_v39  ;;  %v486_v47 = vshll.u32 %v5493_v28, 16  ;;  %v492_v48 = vshll.u32 %v5496_v21, 16  ;;  %v5528_v51 = vsel %vm5384_vm2, %v462_v32, %v466_v26  ;;  %v1913_v52 = vrot.slane %v5465_v36, 5  ;;  %v5557_v4 = vld [vmem:[%s5402_s15 + $0x30] sm:$0xf] }
  0x36   : > { %v5518_v58 = vsel %vm5384_vm2, %v1726_v37, %v1730_v31  ;;  %v474_v56 = vrot.slane %v472_v42, 5  ;;  %v480_v59 = vrot.slane %v478_v43, 5  ;;  %v485_v61 = vrot.slane %v483_v46, 4  ;;  %v5109_v37 = vld [vmem:[%s6550_s3 + $0xf0] sm:$0xff]  }
  0x37   : > { %v4206_v53 = vcombine.low %v5500_v33, %v5518_v58  ;;  %v488_v63 = vrot.slane %v486_v47, 5  ;;  %v494_v2 = vrot.slane %v492_v48, 5  ;;  %v497_v19 = vshrl.u32 %v5507_v40, 16  ;;  %v5560_v42 = vld [vmem:[%s5402_s15 + $0x34] sm:$0x1] }
  0x38   : > { %v475_v36 = vor.u32 %v474_v56, %v471_v14  ;;  %v500_v23 = vshll.u32 %v5507_v40, 16  ;;  %v506_v26 = vshll.u32 %v5513_v44, 16  ;;  %v4178_v31 = vrot.slane %v5419_v57, 9  ;;  %v5575_v56 = vld [vmem:[%s5402_s15 + $0x38] sm:$0xf] }
  0x39   : > { %4682 = vmatmul.mubr.msk.bf16.vlgmr.msra.gmra.mrb[0].mxu0 %vm538_vm3, %v4206_v53  ;;  %v489_v29 = vor.u32 %v488_v63, %v485_v61  ;;  %v4179_v32 = vrot.slane %v5431_v62, 9  ;;  %v4180_v39 = vrot.slane %v5440_v1, 9  ;;  %v499_v43 = vrot.slane %v497_v19, 4  ;;  %v5578_v61 = vld [vmem:[%s5402_s15 + $0x3c] sm:$0x1] }
  0x3a   : > { %4690 = vmatpush3.bf16.msra.mxu0 %v5330_v5  ;;  %v476_v5 = vrot.slane %v475_v36, 4  ;;  %v502_v46 = vrot.slane %v500_v23, 5  ;;  %v508_v57 = vrot.slane %v506_v26, 5  ;;  %v5564_v47 = vsel %vm5535_vm6, %v4178_v31, %v1901_v35  ;;  %v5591_v23 = vld [vmem:[%s5402_s15 + $0x44] sm:$0x1] }
  0x3b   : > { %4691 = vmatprep.subr.bf16.mxu0 %v5107_v0  ;;  %v490_v14 = vrot.slane %v489_v29, 4  ;;  %6586 = vst [vmem:[#allocation4_spill] sm:$0xff] %v5564_v47  ;;  %v5568_v48 = vsel %vm5535_vm6, %v4179_v32, %v1905_v38  ;;  %v5572_v53 = vsel %vm5535_vm6, %v4180_v39, %v1909_v41  ;;  %v4181_v19 = vrot.slane %v5448_v15, 9  ;;  %v5588_v38 = vld [vmem:[%s5402_s15 + $0x40] sm:$0xf] }
  0x3c   : > { %v5582_v63 = vsel %vm5384_vm2, %v476_v5, %v480_v59  ;;  %v503_v36 = vor.u32 %v502_v46, %v499_v43  ;;  %v4216_v35 = vcombine.low %v5564_v47, %v5568_v48  ;;  %v4182_v59 = vrot.slane %v5540_v16, 9 }
  0x3d   : > { %v5595_v41 = vcombine.low %v5528_v51, %v5582_v63  ;;  %v5599_v26 = vsel %vm5384_vm2, %v490_v14, %v494_v2  ;;  %v1917_v29 = vrot.slane %v5543_v17, 5  ;;  %v5606_v32 = vsel %vm5535_vm6, %v4181_v19, %v1913_v52 }
  0x3e   : > { %4692 = vmatpush3.bf16.msra.mxu0 %v5107_v0  ;;  %v504_v31 = vrot.slane %v503_v36, 4  ;;  %4693 = vmatprep.mubr.msk.bf16.mxu0 %vm538_vm3, %v4216_v35  ;;  %v4183_v39 = vrot.slane %v5557_v4, 9  ;;  %v1921_v0 = vrot.slane %v5560_v42, 5  ;;  %v4217_v2 = vcombine.low %v5572_v53, %v5606_v32 }
  0x3f   : > { %6587 = vst [vmem:[#allocation5_spill] sm:$0xff] %v5595_v41  ;;  %4701 = vmatprep.subr.bf16.mxu0 %v5109_v37  ;;  %4529 = vmatprep.mubr.msk.bf16.mxu1 %vm538_vm3, %v5595_v41  ;;  %v4076_v5 = vcombine.low %v5344_v6, %v5350_v8  ;;  %v5618_v43 = vsel %vm5535_vm6, %v4182_v59, %v1917_v29  ;;  %v4184_v14 = vrot.slane %v5575_v56, 9  ;;  %v1925_v36 = vrot.slane %v5578_v61, 5  ;;  %v5113_v29 = vld [vmem:[%s6550_s3 + $0xf8] sm:$0xff]  }
  0x40   : > { %v5622_v52 = vsel %vm5384_vm2, %v504_v31, %v508_v57  ;;  %v5626_v46 = vsel %vm5535_vm6, %v4183_v39, %v1921_v0  ;;  %v4215_v59 = vrot.slane %v5588_v38, 9  ;;  %v2270_v57 = vrot.slane %v5591_v23, 5 }
  0x41   : > { %6588 = vst [vmem:[#allocation6_spill] sm:$0xff] %v5622_v52  ;;  %v5632_v35 = vcombine.low %v5599_v26, %v5622_v52  ;;  %v4218_v19 = vcombine.low %v5618_v43, %v5626_v46  ;;  %v5648_v31 = vsel %vm5535_vm6, %v4184_v14, %v1925_v36  ;;  %v738_v0 = vrot.slane %v5347_v7, 5 }
  0x42   : > { %v5652_v39 = vsel %vm5535_vm6, %v4215_v59, %v2270_v57  ;;  %v4086_v14 = vrot.slane %v5344_v6, 9  ;;  %v4087_v36 = vrot.slane %v5350_v8, 9  ;;  %v746_v7 = vrot.slane %v5359_v11, 5  ;;  %v5116_v6 = vld [vmem:[%s6550_s3 + $0x28] sm:$0xff]  }
  0x43   : > { %6589 = vst [vmem:[#allocation7_spill] sm:$0xff] %v5632_v35  ;;  %4530 = vmatmul.mubr.msk.bf16.gmra.mrb[4].mxu1 %vm538_vm3, %v5632_v35  ;;  %6590 = vst [vmem:[#allocation8_spill] sm:$0xff] %v5652_v39  ;;  %v4219_v59 = vcombine.low %v5648_v31, %v5652_v39  ;;  %v4089_v57 = vrot.slane %v5364_v13, 9  ;;  %v1733_v55 = vshrl.u32 %v5540_v16, 16  ;;  %v5676_v12 = vcombine.low %v5391_v45, %v5481_v18 }
  0x44   : > { %4537 = vmatprep.mubr.msk.bf16.mxu1 %vm538_vm3, %v4076_v5  ;;  %v5663_v5 = vcombine.low %v5356_v10, %v5364_v13  ;;  %v750_v11 = vrot.slane %v5377_v22, 5  ;;  %v5684_v47 = vcombine.low %v5431_v62, %v5440_v1  ;;  %v1761_v24 = vshrl.u32 %v5575_v56, 16 }
  0x45   : > { %4694 = vmatmul.mubr.msk.bf16.vlgmr.msra.gmra.mrb[0].mxu0 %vm538_vm3, %v4217_v2  ;;  %v5658_v2 = vld [vmem:[%s6550_s3 + $0x100] sm:$0xff]   ;;  %v739_v35 = vsel %vm5535_vm6, %v4086_v14, %v738_v0  ;;  %v1770_v22 = vshll.u32 %v5578_v61, 16  ;;  %v2148_v62 = vshrl.u32 %v5588_v38, 16  ;;  %v2151_v52 = vshll.u32 %v5588_v38, 16 }
  0x46   : > { %4702 = vmatpush3.bf16.msra.mxu0 %v5109_v37  ;;  %4697 = vmatprep.mubr.msk.bf16.mxu0 %vm538_vm3, %v4218_v19  ;;  %v742_v37 = vrot.slane %v5353_v9, 5  ;;  %6591 = vst [vmem:[#allocation9_spill] sm:$0xff] %v5663_v5  ;;  %v4088_v19 = vrot.slane %v5356_v10, 9  ;;  %v1736_v9 = vshll.u32 %v5540_v16, 16  ;;  %6592 = vst [vmem:[#allocation10_spill] sm:$0xff] %v5684_v47  ;;  %v1763_v1 = vrot.slane %v1761_v24, 4 }
  0x47   : > { %4703 = vmatprep.subr.bf16.mxu0 %v5113_v29  ;;  %v1735_v39 = vrot.slane %v1733_v55, 4  ;;  %v2150_v24 = vrot.slane %v2148_v62, 4  ;;  %v1747_v61 = vshrl.u32 %v5557_v4, 16  ;;  %v1750_v55 = vshll.u32 %v5557_v4, 16 }
  0x48   : > { %v5695_v41 = vsel %vm5535_vm6, %v4087_v36, %v742_v37  ;;  %v1738_v0 = vrot.slane %v1736_v9, 5  ;;  %v1742_v37 = vshll.u32 %v5543_v17, 16  ;;  %v2153_v14 = vrot.slane %v2151_v52, 5 }
  0x49   : > { %v5717_v17 = vcombine.low %v5493_v28, %v5507_v40  ;;  %v5721_v36 = vcombine.low %v5448_v15, %v5540_v16  ;;  %v4090_v9 = vrot.slane %v5391_v45, 9  ;;  %v1772_v62 = vrot.slane %v1770_v22, 5 }
  0x4a   : > { %4704 = vmatpush3.bf16.msra.mxu0 %v5113_v29  ;;  %v1764_v29 = vshll.u32 %v5575_v56, 16  ;;  %v5729_v52 = vcombine.low %v5557_v4, %v5575_v56  ;;  %v754_v15 = vrot.slane %v5461_v30, 5  ;;  %v4091_v16 = vrot.slane %v5481_v18, 9 }
  0x4b   : > { %4713 = vmatprep.subr.bf16.mxu0 %v5658_v2  ;;  %4538 = vmatmul.mubr.msk.bf16.vlgmr.msra.gmra.mrb[0].mxu1 %vm538_vm3, %v5663_v5  ;;  %v2157_v5 = vshll.u32 %v5591_v23, 16  ;;  %6593 = vst [vmem:[#allocation11_spill] sm:$0xff] %v5721_v36  ;;  %v1749_v22 = vrot.slane %v1747_v61, 4  ;;  %v5745_v4 = vsel %vm5535_vm6, %v4088_v19, %v746_v7  ;;  %v5751_v30 = vsel %vm5535_vm6, %v4089_v57, %v750_v11 }
  0x4c   : > { %4546 = vmatpush3.bf16.msra.mxu1 %v5456_v20  ;;  %v1766_v60 = vrot.slane %v1764_v29, 5  ;;  %4541 = vmatprep.mubr.msk.bf16.mxu1 %vm538_vm3, %v5676_v12  ;;  %v5709_v20 = vld [vmem:[%s6550_s3 + $0x30] sm:$0xff]   ;;  %6594 = vst [vmem:[#allocation12_spill] sm:$0xff] %v5729_v52  ;;  %v1739_v7 = vor.u32 %v1738_v0, %v1735_v39  ;;  %v1756_v61 = vshll.u32 %v5560_v42, 16  ;;  %v766_v42 = vrot.slane %v5513_v44, 5 }
  0x4d   : > { %4698 = vmatmul.mubr.msk.bf16.gmra.mrb[4].mxu0 %vm538_vm3, %v4219_v59  ;;  %4547 = vmatprep.subr.bf16.mxu1 %v5116_v6  ;;  %v4094_v59 = vcombine.low %v739_v35, %v5695_v41  ;;  %v5122_v35 = vld [vmem:[%s6550_s3 + $0x108] sm:$0xff]  }
  0x4e   : > { %4705 = vmatprep.mubr.msk.bf16.mxu0 %vm538_vm3, %v5684_v47  ;;  %v1767_v23 = vor.u32 %v1766_v60, %v1763_v1  ;;  %v2154_v47 = vor.u32 %v2153_v14, %v2150_v24  ;;  %v2159_v60 = vrot.slane %v2157_v5, 5  ;;  %v1752_v1 = vrot.slane %v1750_v55, 5  ;;  %v5814_v44 = vld [vmem:[%s5402_s15 + $0x4c] sm:$0x1] }
  0x4f   : > { %v5776_v24 = vsel %vm5535_vm6, %v4090_v9, %v754_v15  ;;  %v5794_v55 = vcombine.low %v5745_v4, %v5751_v30  ;;  %v762_v14 = vrot.slane %v5496_v21, 5  ;;  %v4093_v9 = vrot.slane %v5507_v40, 9 }
  0x50   : > { %4548 = vmatpush3.bf16.msra.mxu1 %v5116_v6  ;;  %v1768_v29 = vrot.slane %v1767_v23, 4  ;;  %v758_v6 = vrot.slane %v5486_v25, 5  ;;  %v2155_v5 = vrot.slane %v2154_v47, 4  ;;  %v1744_v25 = vrot.slane %v1742_v37, 5  ;;  %v5757_v47 = vld [vmem:[%s5402_s15 + $0x48] sm:$0xf] }
  0x51   : > { %4557 = vmatprep.subr.bf16.mxu1 %v5709_v20  ;;  %v2474_v57 = vshrl.u32 %v5757_v47, 16  ;;  %v2477_v11 = vshll.u32 %v5757_v47, 16  ;;  %v1753_v0 = vor.u32 %v1752_v1, %v1749_v22  ;;  %v4092_v23 = vrot.slane %v5493_v28, 9 }
  0x52   : > { %v5761_v56 = vsel %vm5384_vm2, %v1768_v29, %v1772_v62  ;;  %v5765_v19 = vsel %vm5384_vm2, %v2155_v5, %v2159_v60  ;;  %v5780_v39 = vsel %vm5535_vm6, %v4091_v16, %v758_v6  ;;  %v1740_v29 = vrot.slane %v1739_v7, 4  ;;  %v5124_v60 = vld [vmem:[%s6550_s3 + $0x38] sm:$0xff]  }
  0x53   : > { %4542 = vmatmul.mubr.msk.bf16.gmra.mrb[4].mxu1 %vm538_vm3, %v5717_v17  ;;  %6596 = vst [vmem:[#allocation13_spill] sm:$0xff] %v5761_v56  ;;  %6597 = vst [vmem:[#allocation14_spill] sm:$0xff] %v5765_v19  ;;  %v5804_v62 = vcombine.low %v5776_v24, %v5780_v39  ;;  %v2476_v15 = vrot.slane %v2474_v57, 4  ;;  %v2479_v21 = vrot.slane %v2477_v11, 5  ;;  %v5811_v16 = vcombine.low %v5490_v27, %v5500_v33 }
  0x54   : > { %4549 = vmatprep.mubr.msk.bf16.mxu1 %vm538_vm3, %v4094_v59  ;;  %v4226_v59 = vcombine.low %v5588_v38, %v5757_v47  ;;  %v1754_v38 = vrot.slane %v1753_v0, 4  ;;  %v1758_v6 = vrot.slane %v1756_v61, 5  ;;  %v5827_v27 = vsel %vm5535_vm6, %v4093_v9, %v766_v42  ;;  %v5129_v61 = vld [vmem:[%s6550_s3 + $0x118] sm:$0xff]   ;;  %v5881_v42 = vld [vmem:[%s6550_s3 + $0x120] sm:$0xff]  }
  0x55   : > { %4706 = vmatmul.mubr.msk.bf16.vlgmr.msra.gmra.mrb[0].mxu0 %vm538_vm3, %v5721_v36  ;;  %6598 = vst [vmem:[#allocation15_spill] sm:$0xff] %v5804_v62  ;;  %6599 = vst [vmem:[#allocation16_spill] sm:$0xff] %v5811_v16  ;;  %v5831_v33 = vsel %vm5384_vm2, %v1740_v29, %v1744_v25  ;;  %v2480_v22 = vor.u32 %v2479_v21, %v2476_v15  ;;  %v2483_v1 = vshll.u32 %v5814_v44, 16  ;;  %v5884_v29 = vld [vmem:[%s5336_s7 + $0x44] sm:$0x1]  ;;  %v5132_v21 = vld [vmem:[%s6550_s3 + $0x48] sm:$0xff]  }
  0x56   : > { %4714 = vmatpush3.bf16.msra.mxu0 %v5658_v2  ;;  %4709 = vmatprep.mubr.msk.bf16.mxu0 %vm538_vm3, %v5729_v52  ;;  %v5125_v2 = vld [vmem:[%s6550_s3 + $0x110] sm:$0xff]   ;;  %6600 = vst [vmem:[#allocation17_spill] sm:$0xff] %v5831_v33  ;;  %v5843_v5 = vsel %vm5384_vm2, %v1754_v38, %v1758_v6  ;;  %v5852_v7 = vcombine.low %v5518_v58, %v5831_v33  ;;  %v998_v38 = vshll.u32 %v5884_v29, 16  ;;  %v5901_v6 = vld [vmem:[%s5889_s29] sm:$0xf] }
  0x57   : > { %4715 = vmatprep.subr.bf16.mxu0 %v5122_v35  ;;  %6601 = vst [vmem:[#allocation18_spill] sm:$0xff] %v5843_v5  ;;  %v5856_v57 = vcombine.low %v5843_v5, %v5761_v56  ;;  %v2481_v11 = vrot.slane %v2480_v22, 4  ;;  %v2485_v0 = vrot.slane %v2483_v1, 5  ;;  %v4106_v15 = vcombine.low %v5481_v18, %v5493_v28  ;;  %v5913_v22 = vld [vmem:[%s5889_s29 + $0x8] sm:$0xf] }
  0x58   : > { %6603 = vst [vmem:[#allocation20_spill] sm:$0xff] %v5852_v7  ;;  %v2825_v18 = vshll.u32 %v5901_v6, 16  ;;  %v5916_v1 = vld [vmem:[%s5889_s29 + $0x4] sm:$0x1]  ;;  %v6038_v52 = vld [vmem:[%s5889_s29 + $0x4c] sm:$0x1] }
  0x59   : > { %6604 = vst [vmem:[#allocation21_spill] sm:$0xff] %v5856_v57  ;;  %v2486_v9 = vsel %vm5384_vm2, %v2481_v11, %v2485_v0  ;;  %v2584_v11 = vrot.slane %v5814_v44, 5  ;;  %v5927_v0 = vld [vmem:[%s5889_s29 + $0x38] sm:$0xf] }
  0x5a   : > { %4716 = vmatpush3.bf16.msra.mxu0 %v5122_v35  ;;  %v5823_v35 = vsel %vm5535_vm6, %v4092_v23, %v762_v14  ;;  %v5862_v23 = vld [vmem:[%s5336_s7 + $0x40] sm:$0xf] }
  0x5b   : > { %4725 = vmatprep.subr.bf16.mxu0 %v5125_v2  ;;  %4550 = vmatmul.mubr.msk.bf16.vlgmr.msra.gmra.mrb[0].mxu1 %vm538_vm3, %v5794_v55  ;;  %v5847_v25 = vcombine.low %v5823_v35, %v5827_v27  ;;  %v989_v58 = vshrl.u32 %v5862_v23, 16  ;;  %v992_v14 = vshll.u32 %v5862_v23, 16  ;;  %v4107_v44 = vcombine.low %v5507_v40, %v5862_v23 }
  0x5c   : > { %4558 = vmatpush3.bf16.msra.mxu1 %v5709_v20  ;;  %4553 = vmatprep.mubr.msk.bf16.mxu1 %vm538_vm3, %v5804_v62  ;;  %v5128_v20 = vld [vmem:[%s6550_s3 + $0x40] sm:$0xff]   ;;  %v2923_v40 = vshll.u32 %v5927_v0, 16 }
  0x5d   : > { %4710 = vmatmul.mubr.msk.bf16.gmra.mrb[4].mxu0 %vm538_vm3, %v4226_v59  ;;  %4559 = vmatprep.subr.bf16.mxu1 %v5124_v60  ;;  %6602 = vst [vmem:[#allocation19_spill] sm:$0xff] %v5847_v25  ;;  %v6605_v59 = vcombine.low %v5350_v8, %v5356_v10  ;;  %v4105_v8 = vcombine.low %v5364_v13, %v5391_v45  ;;  %v991_v10 = vrot.slane %v989_v58, 4  ;;  %v2822_v45 = vshrl.u32 %v5901_v6, 16 }
  0x5e   : > { %4717 = vmatprep.mubr.msk.bf16.mxu0 %vm538_vm3, %v5811_v16  ;;  %v5905_v13 = vcombine.low %v5568_v48, %v5572_v53  ;;  %v5922_v48 = vld [vmem:[%s6550_s3 + $0x50] sm:$0xff]   ;;  %v4240_v53 = vrot.slane %v5757_v47, 9  ;;  %v2839_v47 = vshll.u32 %v5913_v22, 16 }
  0x5f   : > { %v2824_v58 = vrot.slane %v2822_v45, 4  ;;  %v5957_v45 = vcombine.low %v5626_v46, %v5648_v31 }
  0x60   : > { %4560 = vmatpush3.bf16.msra.mxu1 %v5124_v60  ;;  %v4233_v60 = vcombine.low %v5765_v19, %v2486_v9  ;;  %6606 = vst [vmem:[#allocation22_spill] sm:$0xff] %v5905_v13  ;;  %v2841_v37 = vrot.slane %v2839_v47, 5  ;;  %v6611_v47 = vld [vmem:[#allocation6_spill] sm:$0xff] }
  0x61   : > { %4569 = vmatprep.subr.bf16.mxu1 %v5128_v20  ;;  %6608 = vst [vmem:[#allocation24_spill] sm:$0xff] %v5957_v45 }
  0x63   : > { %4554 = vmatmul.mubr.msk.bf16.gmra.mrb[4].mxu1 %vm538_vm3, %v5847_v25 }
  0x64   : > { %4561 = vmatprep.mubr.msk.bf16.mxu1 %vm538_vm3, %v6605_v59  ;;  %v2836_v59 = vshrl.u32 %v5913_v22, 16 }
  0x65   : > { %4718 = vmatmul.mubr.msk.bf16.vlgmr.msra.gmra.mrb[0].mxu0 %vm538_vm3, %v5852_v7 }
  0x66   : > { %4726 = vmatpush3.bf16.msra.mxu0 %v5125_v2  ;;  %4721 = vmatprep.mubr.msk.bf16.mxu0 %vm538_vm3, %v5856_v57  ;;  %v994_v2 = vrot.slane %v992_v14, 5  ;;  %v2827_v14 = vrot.slane %v2825_v18, 5  ;;  %v2585_v18 = vsel %vm5535_vm6, %v4240_v53, %v2584_v11  ;;  %v5987_v53 = vld [vmem:[%s6550_s3 + $0x130] sm:$0xff]  }
  0x67   : > { %4727 = vmatprep.subr.bf16.mxu0 %v5129_v61 }
  0x68   : > { %v995_v28 = vor.u32 %v994_v2, %v991_v10  ;;  %v5941_v10 = vcombine.low %v5606_v32, %v5618_v43  ;;  %v5135_v2 = vld [vmem:[%s6550_s3 + $0x128] sm:$0xff]   ;;  %v5960_v32 = vld [vmem:[%s5889_s29 + $0x20] sm:$0xf]  ;;  %v2828_v46 = vor.u32 %v2827_v14, %v2824_v58  ;;  %v2925_v14 = vrot.slane %v2923_v40, 5 }
  0x69   : > { %v5963_v43 = vld [vmem:[%s5889_s29 + $0x28] sm:$0xf] }
  0x6a   : > { %4728 = vmatpush3.bf16.msra.mxu0 %v5129_v61  ;;  %v5932_v61 = vld [vmem:[%s5889_s29 + $0xc] sm:$0x1]  ;;  %v996_v9 = vrot.slane %v995_v28, 4  ;;  %6607 = vst [vmem:[#allocation23_spill] sm:$0xff] %v5941_v10  ;;  %v2838_v28 = vrot.slane %v2836_v59, 4 }
  0x6b   : > { %4737 = vmatprep.subr.bf16.mxu0 %v5881_v42  ;;  %4562 = vmatmul.mubr.msk.bf16.vlgmr.msra.gmra.mrb[0].mxu1 %vm538_vm3, %v4105_v8  ;;  %v2831_v8 = vshll.u32 %v5916_v1, 16  ;;  %v2845_v31 = vshll.u32 %v5932_v61, 16  ;;  %v2697_v59 = vld [vmem:[%s5889_s29 + $0x44] sm:$0x1] }
  0x6c   : > { %4570 = vmatpush3.bf16.msra.mxu1 %v5128_v20  ;;  %4565 = vmatprep.mubr.msk.bf16.mxu1 %vm538_vm3, %v4106_v15  ;;  %v1000_v20 = vrot.slane %v998_v38, 5  ;;  %v5950_v15 = vld [vmem:[%s5889_s29 + $0x18] sm:$0xf]  ;;  %v2920_v38 = vshrl.u32 %v5927_v0, 16  ;;  %v3429_v25 = vrot.slane %v2697_v59, 5 }
  0x6d   : > { %4722 = vmatmul.mubr.msk.bf16.gmra.mrb[4].mxu0 %vm538_vm3, %v4233_v60  ;;  %4571 = vmatprep.subr.bf16.mxu1 %v5132_v21  ;;  %v5947_v60 = vld [vmem:[%s5889_s29 + $0x10] sm:$0xf]  ;;  %v5989_v11 = vrot.slane %v2831_v8, 5  ;;  %v2842_v8 = vor.u32 %v2841_v37, %v2838_v28  ;;  %v6013_v40 = vrot.slane %v2845_v31, 5  ;;  %v2867_v33 = vshll.u32 %v5950_v15, 16 }
  0x6e   : > { %4729 = vmatprep.mubr.msk.bf16.mxu0 %vm538_vm3, %v5905_v13  ;;  %v5972_v19 = vsel %vm5384_vm2, %v996_v9, %v1000_v20  ;;  %v2850_v56 = vshrl.u32 %v5947_v60, 16  ;;  %v2695_v20 = vld [vmem:[%s5889_s29 + $0x3c] sm:$0x1]  ;;  %v2922_v58 = vrot.slane %v2920_v38, 4  ;;  %v6009_v9 = vcombine.low %v5960_v32, %v5963_v43  ;;  %v6024_v37 = vld [vmem:[%s5889_s29 + $0x40] sm:$0xf] }
  0x6f   : > { %v6011_v38 = vrot.slane %v2828_v46, 4  ;;  %v2878_v28 = vshrl.u32 %v5960_v32, 16  ;;  %v3310_v46 = vshll.u32 %v6024_v37, 16  ;;  %v3316_v31 = vshll.u32 %v2697_v59, 16 }
  0x70   : > { %4572 = vmatpush3.bf16.msra.mxu1 %v5132_v21  ;;  %v4115_v21 = vcombine.low %v5412_v54, %v5528_v51  ;;  %v6609_v54 = vcombine.low %v5397_v49, %v5406_v50  ;;  %v4116_v51 = vcombine.low %v5582_v63, %v5599_v26  ;;  %v6610_v49 = vld [vmem:[#allocation8_spill] sm:$0xff]  ;;  %v4248_v63 = vcombine.low %v5901_v6, %v5913_v22 }
  0x71   : > { %4581 = vmatprep.subr.bf16.mxu1 %v5922_v48  ;;  %v4241_v50 = vcombine.low %v6610_v49, %v2585_v18  ;;  %v6000_v26 = vcombine.low %v5947_v60, %v5950_v15  ;;  %v6015_v18 = vrot.slane %v2850_v56, 4  ;;  %v5136_v49 = vld [vmem:[%s6550_s3 + $0x58] sm:$0xff]   ;;  %v2926_v5 = vor.u32 %v2925_v14, %v2922_v58  ;;  %6612 = vst [vmem:[#allocation8_spill] sm:$0xff] %v6024_v37 }
  0x72   : > { %v3307_v56 = vshrl.u32 %v6024_v37, 16  ;;  %v2881_v13 = vshll.u32 %v5960_v32, 16  ;;  %v4275_v58 = vrot.slane %v5927_v0, 9  ;;  %v3084_v14 = vrot.slane %v2695_v20, 5 }
  0x73   : > { %4566 = vmatmul.mubr.msk.bf16.gmra.mrb[4].mxu1 %vm538_vm3, %v4107_v44  ;;  %v2853_v44 = vshll.u32 %v5947_v60, 16  ;;  %v3312_v16 = vrot.slane %v3310_v46, 5  ;;  %v2927_v36 = vrot.slane %v2926_v5, 4  ;;  %v2895_v59 = vshll.u32 %v5963_v43, 16 }
  0x74   : > { %4573 = vmatprep.mubr.msk.bf16.mxu1 %vm538_vm3, %v6609_v54  ;;  %v2929_v54 = vshll.u32 %v2695_v20, 16  ;;  %v3309_v7 = vrot.slane %v3307_v56, 4  ;;  %v6067_v20 = vld [vmem:[%s5889_s29 + $0x14] sm:$0x1] }
  0x75   : > { %4730 = vmatmul.mubr.msk.bf16.vlgmr.msra.gmra.mrb[0].mxu0 %vm538_vm3, %v5941_v10  ;;  %v2843_v10 = vrot.slane %v2842_v8, 4  ;;  %v4306_v8 = vrot.slane %v6024_v37, 9  ;;  %v2869_v37 = vrot.slane %v2867_v33, 5  ;;  %v5142_v33 = vld [vmem:[%s6550_s3 + $0x138] sm:$0xff]  }
  0x76   : > { %4738 = vmatpush3.bf16.msra.mxu0 %v5881_v42  ;;  %4733 = vmatprep.mubr.msk.bf16.mxu0 %vm538_vm3, %v5957_v45  ;;  %v2864_v42 = vshrl.u32 %v5950_v15, 16  ;;  %v6030_v45 = vld [vmem:[%s5889_s29 + $0x48] sm:$0xf]  ;;  %v2931_v57 = vrot.slane %v2929_v54, 5  ;;  %v3313_v54 = vor.u32 %v3312_v16, %v3309_v7  ;;  %v3642_v16 = vshll.u32 %v6038_v52, 16 }
  0x77   : > { %4739 = vmatprep.subr.bf16.mxu0 %v5135_v2  ;;  %v3636_v5 = vshll.u32 %v6030_v45, 16  ;;  %v6061_v56 = vsel %vm5535_vm6, %v4306_v8, %v3429_v25  ;;  %v2855_v7 = vrot.slane %v2853_v44, 5  ;;  %v6071_v25 = vld [vmem:[%s5889_s29 + $0x1c] sm:$0x1]  ;;  %v2883_v8 = vrot.slane %v2881_v13, 5 }
  0x78   : > { %v3314_v46 = vrot.slane %v3313_v54, 4  ;;  %v2866_v62 = vrot.slane %v2864_v42, 4  ;;  %v6075_v54 = vsel %vm5384_vm2, %v2927_v36, %v2931_v57  ;;  %v6085_v42 = vld [vmem:[%s5889_s29 + $0x24] sm:$0x1]  ;;  %v4126_v36 = vcombine.low %v5751_v30, %v5776_v24  ;;  %v6110_v24 = vld [vmem:[%s5889_s29 + $0x30] sm:$0xf] }
  0x79   : > { %v6613_v57 = vcombine.low %v6611_v47, %v5972_v19  ;;  %v6614_v30 = vcombine.low %v5695_v41, %v5745_v4  ;;  %v6115_v47 = vsel %vm5384_vm2, %v2843_v10, %v6013_v40  ;;  %v2887_v4 = vshll.u32 %v6085_v42, 16  ;;  %v5145_v10 = vld [vmem:[%s6550_s3 + $0x140] sm:$0xff]  }
  0x7a   : > { %4740 = vmatpush3.bf16.msra.mxu0 %v5135_v2  ;;  %v2892_v2 = vshrl.u32 %v5963_v43, 16  ;;  %v2870_v41 = vor.u32 %v2869_v37, %v2866_v62  ;;  %v6133_v62 = vcombine.low %v6110_v24, %v5927_v0  ;;  %v4127_v37 = vcombine.low %v5780_v39, %v5823_v35 }
  0x7b   : > { %4749 = vmatprep.subr.bf16.mxu0 %v5987_v53  ;;  %4574 = vmatmul.mubr.msk.bf16.vlgmr.msra.gmra.mrb[0].mxu1 %vm538_vm3, %v4115_v21  ;;  %v6049_v21 = vld [vmem:[%s6550_s3 + $0x60] sm:$0xff]   ;;  %v4288_v34 = vcombine.low %v5963_v43, %v6110_v24 }
  0x7c   : > { %4582 = vmatpush3.bf16.msra.mxu1 %v5922_v48  ;;  %4577 = vmatprep.mubr.msk.bf16.mxu1 %vm538_vm3, %v4116_v51  ;;  %v3318_v48 = vrot.slane %v3316_v31, 5  ;;  %v6057_v51 = vsel %vm5535_vm6, %v4275_v58, %v3084_v14  ;;  %v2880_v58 = vrot.slane %v2878_v28, 4  ;;  %v3638_v14 = vrot.slane %v3636_v5, 5 }
  0x7d   : > { %4734 = vmatmul.mubr.msk.bf16.gmra.mrb[4].mxu0 %vm538_vm3, %v4241_v50  ;;  %4583 = vmatprep.subr.bf16.mxu1 %v5136_v49  ;;  %v3633_v50 = vshrl.u32 %v6030_v45, 16  ;;  %v2894_v44 = vrot.slane %v2892_v2, 4  ;;  %v2897_v28 = vrot.slane %v2895_v59, 5  ;;  %v2859_v5 = vshll.u32 %v6067_v20, 16  ;;  %v6101_v59 = vld [vmem:[%s5889_s29 + $0x2c] sm:$0x1] }
  0x7e   : > { %4741 = vmatprep.mubr.msk.bf16.mxu0 %vm538_vm3, %v4248_v63  ;;  %v2884_v40 = vor.u32 %v2883_v8, %v2880_v58  ;;  %v1111_v58 = vrot.slane %v5884_v29, 5  ;;  %v4331_v29 = vrot.slane %v6030_v45, 9 }
  0x7f   : > { %v3635_v63 = vrot.slane %v3633_v50, 4  ;;  %v3644_v50 = vrot.slane %v3642_v16, 5 }
  0x80   : > { %4584 = vmatpush3.bf16.msra.mxu1 %v5136_v49  ;;  %v6079_v49 = vsel %vm5384_vm2, %v3314_v46, %v3318_v48  ;;  %v2834_v48 = vsel %vm5384_vm2, %v6011_v38, %v5989_v11  ;;  %v2856_v11 = vor.u32 %v2855_v7, %v6015_v18  ;;  %v2873_v38 = vshll.u32 %v6071_v25, 16 }
  0x81   : > { %4593 = vmatprep.subr.bf16.mxu1 %v6049_v21  ;;  %v3639_v2 = vor.u32 %v3638_v14, %v3635_v63  ;;  %v2906_v46 = vshrl.u32 %v6110_v24, 16  ;;  %v2909_v63 = vshll.u32 %v6110_v24, 16  ;;  %v2898_v18 = vor.u32 %v2897_v28, %v2894_v44 }
  0x82   : > { %v2901_v7 = vshll.u32 %v6101_v59, 16  ;;  %v4124_v14 = vrot.slane %v5862_v23, 9  ;;  %v2857_v8 = vrot.slane %v2856_v11, 4  ;;  %v2861_v44 = vrot.slane %v2859_v5, 5 }
  0x83   : > { %4578 = vmatmul.mubr.msk.bf16.gmra.mrb[4].mxu1 %vm538_vm3, %v6613_v57  ;;  %v3640_v16 = vrot.slane %v3639_v2, 4  ;;  %v2875_v28 = vrot.slane %v2873_v38, 5  ;;  %v4258_v57 = vcombine.low %v2834_v48, %v6115_v47  ;;  %v2908_v39 = vrot.slane %v2906_v46, 4 }
  0x84   : > { %4585 = vmatprep.mubr.msk.bf16.mxu1 %vm538_vm3, %v6614_v30  ;;  %v2871_v30 = vrot.slane %v2870_v41, 4  ;;  %v2911_v35 = vrot.slane %v2909_v63, 5  ;;  %v2899_v31 = vrot.slane %v2898_v18, 4  ;;  %v2903_v13 = vrot.slane %v2901_v7, 5 }
  0x85   : > { %4742 = vmatmul.mubr.msk.bf16.vlgmr.msra.gmra.mrb[0].mxu0 %vm538_vm3, %v6000_v26  ;;  %v6157_v48 = vsel %vm5535_vm6, %v4124_v14, %v1111_v58  ;;  %v6161_v5 = vsel %vm5384_vm2, %v2857_v8, %v2861_v44  ;;  %v4269_v14 = vrot.slane %v5913_v22, 9  ;;  %v3060_v58 = vrot.slane %v5932_v61, 5  ;;  %v6616_v8 = vld [vmem:[#allocation9_spill] sm:$0xff] }
  0x86   : > { %4750 = vmatpush3.bf16.msra.mxu0 %v5987_v53  ;;  %4745 = vmatprep.mubr.msk.bf16.mxu0 %vm538_vm3, %v6009_v9  ;;  %v3645_v53 = vsel %vm5384_vm2, %v3640_v16, %v3644_v50  ;;  %v5144_v50 = vld [vmem:[%s6550_s3 + $0x68] sm:$0xff]   ;;  %v2885_v16 = vrot.slane %v2884_v40, 4  ;;  %v4128_v63 = vcombine.low %v5827_v27, %v6157_v48  ;;  %v3056_v27 = vrot.slane %v5916_v1, 5 }
  0x87   : > { %4751 = vmatprep.subr.bf16.mxu0 %v5142_v33  ;;  %v6139_v2 = vcombine.low %v6079_v49, %v3645_v53  ;;  %v2889_v53 = vrot.slane %v2887_v4, 5  ;;  %v6183_v4 = vsel %vm5384_vm2, %v2899_v31, %v2903_v13  ;;  %v5147_v31 = vld [vmem:[%s6550_s3 + $0x148] sm:$0xff]   ;;  %v4268_v13 = vrot.slane %v5901_v6, 9 }
  0x88   : > { %v6219_v61 = vsel %vm5535_vm6, %v4269_v14, %v3060_v58  ;;  %v390_v14 = vld [vmem:[%s5336_s7 + $0x4c] sm:$0x1]  ;;  %v6617_v58 = vld [vmem:[#allocation2_spill] sm:$0xff] }
  0x89   : > { %6615 = vst [vmem:[#allocation6_spill] sm:$0xff] %v6139_v2  ;;  %v6147_v2 = vld [vmem:[%s5889_s29 + $0x34] sm:$0x1]  ;;  %v6179_v41 = vsel %vm5384_vm2, %v2885_v16, %v2889_v53  ;;  %v3057_v1 = vsel %vm5535_vm6, %v4268_v13, %v3056_v27  ;;  %v4272_v16 = vrot.slane %v5960_v32, 9  ;;  %v3072_v53 = vrot.slane %v6085_v42, 5 }
  0x8a   : > { %4752 = vmatpush3.bf16.msra.mxu0 %v5142_v33  ;;  %v3743_v33 = vrot.slane %v6038_v52, 5  ;;  %v5146_v52 = vld [vmem:[%s6550_s3 + $0x70] sm:$0xff]   ;;  %v2915_v11 = vshll.u32 %v6147_v2, 16  ;;  %v6195_v18 = vcombine.low %v6179_v41, %v6183_v4  ;;  %v4274_v13 = vrot.slane %v6110_v24, 9 }
  0x8b   : > { %4761 = vmatprep.subr.bf16.mxu0 %v5145_v10  ;;  %4586 = vmatmul.mubr.msk.bf16.vlgmr.msra.gmra.mrb[0].mxu1 %vm538_vm3, %v4126_v36  ;;  %v6166_v36 = vsel %vm5384_vm2, %v2871_v30, %v2875_v28  ;;  %v4270_v28 = vrot.slane %v5947_v60, 9  ;;  %v3064_v30 = vrot.slane %v6067_v20, 5  ;;  %v3080_v27 = vrot.slane %v6147_v2, 5 }
  0x8c   : > { %4594 = vmatpush3.bf16.msra.mxu1 %v6049_v21  ;;  %4589 = vmatprep.mubr.msk.bf16.mxu1 %vm538_vm3, %v4127_v37  ;;  %v2912_v21 = vor.u32 %v2911_v35, %v2908_v39  ;;  %v6174_v38 = vsel %vm5535_vm6, %v4331_v29, %v3743_v33  ;;  %v6191_v40 = vcombine.low %v6161_v5, %v6166_v36  ;;  %v2917_v37 = vrot.slane %v2915_v11, 5 }
  0x8d   : > { %4746 = vmatmul.mubr.msk.bf16.gmra.mrb[4].mxu0 %vm538_vm3, %v6133_v62  ;;  %4595 = vmatprep.subr.bf16.mxu1 %v5144_v50  ;;  %v4332_v46 = vcombine.low %v6061_v56, %v6174_v38  ;;  %v4271_v39 = vrot.slane %v5950_v15, 9  ;;  %v3068_v35 = vrot.slane %v6071_v25, 5  ;;  %v4273_v29 = vrot.slane %v5963_v43, 9 }
  0x8e   : > { %4753 = vmatprep.mubr.msk.bf16.mxu0 %vm538_vm3, %v4258_v57  ;;  %v2913_v7 = vrot.slane %v2912_v21, 4  ;;  %v4276_v57 = vcombine.low %v3057_v1, %v6219_v61  ;;  %v3076_v33 = vrot.slane %v6101_v59, 5  ;;  %v6243_v21 = vld [vmem:[%s5336_s7 + $0x48] sm:$0xf]  ;;  %v6253_v42 = vsel %vm5535_vm6, %v4270_v28, %v3064_v30  ;;  %v5151_v59 = vld [vmem:[%s6550_s3 + $0x80] sm:$0xff]  }
  0x8f   : > { %v1315_v20 = vshrl.u32 %v6243_v21, 16  ;;  %v1318_v25 = vshll.u32 %v6243_v21, 16  ;;  %v4135_v11 = vcombine.low %v5862_v23, %v6243_v21  ;;  %v5152_v23 = vld [vmem:[%s6550_s3 + $0x158] sm:$0xff]   ;;  %v1324_v1 = vshll.u32 %v390_v14, 16  ;;  %v5155_v28 = vld [vmem:[%s6550_s3 + $0x160] sm:$0xff]  }
  0x90   : > { %4596 = vmatpush3.bf16.msra.mxu1 %v5144_v50  ;;  %v6213_v6 = vsel %vm5384_vm2, %v2913_v7, %v2917_v37  ;;  %v5149_v50 = vld [vmem:[%s6550_s3 + $0x78] sm:$0xff]   ;;  %v6296_v2 = vsel %vm5535_vm6, %v4274_v13, %v3080_v27  ;;  %v4149_v43 = vrot.slane %v6243_v21, 9  ;;  %v1425_v24 = vrot.slane %v390_v14, 5  ;;  %v6622_v21 = vld [vmem:[#allocation19_spill] sm:$0xff] }
  0x91   : > { %4605 = vmatprep.subr.bf16.mxu1 %v5146_v52  ;;  %v6226_v44 = vcombine.low %v6213_v6, %v6075_v54  ;;  %v1317_v7 = vrot.slane %v1315_v20, 4  ;;  %v1320_v37 = vrot.slane %v1318_v25, 5  ;;  %v1326_v30 = vrot.slane %v1324_v1, 5  ;;  %v6621_v25 = vld [vmem:[#allocation15_spill] sm:$0xff]  ;;  %v5165_v27 = vld [vmem:[%s6550_s3 + $0x178] sm:$0xff]  }
  0x92   : > { %v4296_v20 = vcombine.low %v6115_v47, %v6161_v5  ;;  %v4297_v5 = vcombine.low %v6166_v36, %v6179_v41  ;;  %v4298_v13 = vcombine.low %v6183_v4, %v6213_v6  ;;  %v5166_v36 = vld [vmem:[%s6550_s3 + $0xa8] sm:$0xff]   ;;  %v4307_v41 = vcombine.low %v6219_v61, %v6253_v42  ;;  %v6623_v4 = vld [vmem:[#allocation10_spill] sm:$0xff] }
  0x93   : > { %4590 = vmatmul.mubr.msk.bf16.gmra.mrb[4].mxu1 %vm538_vm3, %v4128_v63  ;;  %v6624_v6 = vcombine.low %v6075_v54, %v6079_v49  ;;  %v6625_v14 = vld [vmem:[#allocation11_spill] sm:$0xff] }
  0x94   : > { %4597 = vmatprep.mubr.msk.bf16.mxu1 %vm538_vm3, %v6616_v8  ;;  %v1321_v8 = vor.u32 %v1320_v37, %v1317_v7  ;;  %v5183_v7 = vld [vmem:[%s5402_s15] sm:$0xf]  ;;  %v5169_v49 = vld [vmem:[%s6550_s3 + $0x188] sm:$0xff]  }
  0x95   : > { %4754 = vmatmul.mubr.msk.bf16.vlgmr.msra.gmra.mrb[0].mxu0 %vm538_vm3, %v6191_v40  ;;  %v4177_v1 = vrot.slane %v5183_v7, 9 }
  0x96   : > { %4762 = vmatpush3.bf16.msra.mxu0 %v5145_v10  ;;  %4757 = vmatprep.mubr.msk.bf16.mxu0 %vm538_vm3, %v6195_v18  ;;  %v5150_v10 = vld [vmem:[%s6550_s3 + $0x150] sm:$0xff]  }
  0x97   : > { %4763 = vmatprep.subr.bf16.mxu0 %v5147_v31 }
  0x9a   : > { %4764 = vmatpush3.bf16.msra.mxu0 %v5147_v31 }
  0x9b   : > { %4773 = vmatprep.subr.bf16.mxu0 %v5150_v10  ;;  %4598 = vmatmul.mubr.msk.bf16.vlgmr.msra.gmra.mrb[0].mxu1 %vm538_vm3, %v5676_v12  ;;  %v6257_v12 = vsel %vm5535_vm6, %v4271_v39, %v3068_v35  ;;  %v4286_v39 = vcombine.low %v5913_v22, %v5947_v60  ;;  %v6618_v35 = vld [vmem:[#allocation5_spill] sm:$0xff]  ;;  %v4287_v60 = vcombine.low %v5950_v15, %v5960_v32  ;;  %v6620_v15 = vld [vmem:[#allocation8_spill] sm:$0xff] }
  0x9c   : > { %4606 = vmatpush3.bf16.msra.mxu1 %v5146_v52  ;;  %4601 = vmatprep.mubr.msk.bf16.mxu1 %vm538_vm3, %v5717_v17  ;;  %v6265_v52 = vsel %vm5535_vm6, %v4272_v16, %v3072_v53  ;;  %v6269_v17 = vsel %vm5535_vm6, %v4273_v29, %v3076_v33  ;;  %v6275_v63 = vcombine.low %v6253_v42, %v6257_v12  ;;  %v6619_v53 = vld [vmem:[#allocation7_spill] sm:$0xff]  ;;  %v5157_v29 = vld [vmem:[%s6550_s3 + $0x90] sm:$0xff]  }
  0x9d   : > { %4758 = vmatmul.mubr.msk.bf16.gmra.mrb[4].mxu0 %vm538_vm3, %v6226_v44  ;;  %4607 = vmatprep.subr.bf16.mxu1 %v5149_v50  ;;  %v6279_v31 = vcombine.low %v6265_v52, %v6269_v17  ;;  %v5159_v33 = vld [vmem:[%s6550_s3 + $0x168] sm:$0xff]   ;;  %v4289_v32 = vcombine.low %v5927_v0, %v6620_v15  ;;  %v1426_v0 = vsel %vm5535_vm6, %v4149_v43, %v1425_v24  ;;  %v6626_v42 = vld [vmem:[#allocation12_spill] sm:$0xff]  ;;  %v5192_v24 = vld [vmem:[%s5402_s15 + $0x38] sm:$0xf] }
  0x9e   : > { %4765 = vmatprep.mubr.msk.bf16.mxu0 %vm538_vm3, %v4276_v57  ;;  %v1322_v57 = vrot.slane %v1321_v8, 4  ;;  %v4150_v47 = vcombine.low %v6157_v48, %v1426_v0  ;;  %v5167_v48 = vld [vmem:[%s6550_s3 + $0x180] sm:$0xff]   ;;  %v4308_v61 = vcombine.low %v6257_v12, %v6265_v52  ;;  %v4309_v54 = vcombine.low %v6269_v17, %v6296_v2  ;;  %v5171_v12 = vld [vmem:[%s6550_s3 + $0x190] sm:$0xff]   ;;  %v5170_v8 = vld [vmem:[%s6550_s3 + $0xb8] sm:$0xff]  }
  0x9f   : > { %v5184_v52 = vld [vmem:[%s5402_s15 + $0x4] sm:$0x1]  ;;  %v6639_v0 = vld [vmem:[#allocation17_spill] sm:$0xff] }
  0xa0   : > { %4608 = vmatpush3.bf16.msra.mxu1 %v5149_v50  ;;  %v6303_v50 = vcombine.low %v6296_v2, %v6057_v51  ;;  %v1327_v16 = vsel %vm5384_vm2, %v1322_v57, %v1326_v30  ;;  %v1897_v17 = vrot.slane %v5184_v52, 5  ;;  %v6628_v2 = vld [vmem:[#allocation16_spill] sm:$0xff] }
  0xa1   : > { %4617 = vmatprep.subr.bf16.mxu1 %v5151_v59  ;;  %v4142_v22 = vcombine.low %v5972_v19, %v1327_v16  ;;  %v5162_v19 = vld [vmem:[%s6550_s3 + $0x170] sm:$0xff]   ;;  %v6632_v16 = vld [vmem:[#allocation21_spill] sm:$0xff] }
  0xa2   : > { %v6630_v57 = vld [vmem:[#allocation20_spill] sm:$0xff]  ;;  %v1898_v30 = vsel %vm5535_vm6, %v4177_v1, %v1897_v17 }
  0xa3   : > { %4602 = vmatmul.mubr.msk.bf16.gmra.mrb[4].mxu1 %vm538_vm3, %v4135_v11  ;;  %v6361_v11 = vld [vmem:[%s5402_s15 + $0x8] sm:$0xf] }
  0xa4   : > { %4609 = vmatprep.mubr.msk.bf16.mxu1 %vm538_vm3, %v6617_v58  ;;  %v4157_v37 = vcombine.low %v5183_v7, %v6361_v11  ;;  %v6627_v58 = vld [vmem:[#allocation3_spill] sm:$0xff] }
  0xa5   : > { %4766 = vmatmul.mubr.msk.bf16.vlgmr.msra.gmra.mrb[0].mxu0 %vm538_vm3, %v6275_v63 }
  0xa6   : > { %4774 = vmatpush3.bf16.msra.mxu0 %v5150_v10  ;;  %4769 = vmatprep.mubr.msk.bf16.mxu0 %vm538_vm3, %v6279_v31  ;;  %v5153_v10 = vld [vmem:[%s6550_s3 + $0x88] sm:$0xff]  }
  0xa7   : > { %4775 = vmatprep.subr.bf16.mxu0 %v5152_v23 }
  0xaa   : > { %4776 = vmatpush3.bf16.msra.mxu0 %v5152_v23  ;;  %v5168_v23 = vld [vmem:[%s6550_s3 + $0xb0] sm:$0xff]  }
  0xab   : > { %4785 = vmatprep.subr.bf16.mxu0 %v5155_v28  ;;  %4610 = vmatmul.mubr.msk.bf16.vlgmr.msra.gmra.mrb[0].mxu1 %vm538_vm3, %v6618_v35 }
  0xac   : > { %4618 = vmatpush3.bf16.msra.mxu1 %v5151_v59  ;;  %4613 = vmatprep.mubr.msk.bf16.mxu1 %vm538_vm3, %v6619_v53  ;;  %v5164_v59 = vld [vmem:[%s6550_s3 + $0xa0] sm:$0xff]  }
  0xad   : > { %4770 = vmatmul.mubr.msk.bf16.gmra.mrb[4].mxu0 %vm538_vm3, %v6303_v50  ;;  %4619 = vmatprep.subr.bf16.mxu1 %v5153_v10  ;;  %v6633_v53 = vld [vmem:[#allocation22_spill] sm:$0xff] }
  0xae   : > { %4777 = vmatprep.mubr.msk.bf16.mxu0 %vm538_vm3, %v4286_v39  ;;  %v6631_v39 = vld [vmem:[#allocation4_spill] sm:$0xff] }
  0xaf   : > { %v4185_v35 = vcombine.low %v1898_v30, %v6631_v39 }
  0xb0   : > { %4620 = vmatpush3.bf16.msra.mxu1 %v5153_v10  ;;  %v5172_v10 = vld [vmem:[%s6550_s3 + $0xc0] sm:$0xff]  }
  0xb1   : > { %4629 = vmatprep.subr.bf16.mxu1 %v5157_v29 }
  0xb3   : > { %4614 = vmatmul.mubr.msk.bf16.gmra.mrb[4].mxu1 %vm538_vm3, %v4142_v22 }
  0xb4   : > { %4621 = vmatprep.mubr.msk.bf16.mxu1 %vm538_vm3, %v5794_v55  ;;  %v5161_v55 = vld [vmem:[%s6550_s3 + $0x98] sm:$0xff]  }
  0xb5   : > { %4778 = vmatmul.mubr.msk.bf16.vlgmr.msra.gmra.mrb[0].mxu0 %vm538_vm3, %v4287_v60  ;;  %v5179_v60 = vld [vmem:[%s6550_s3 + $0x1a8] sm:$0xff]  }
  0xb6   : > { %4786 = vmatpush3.bf16.msra.mxu0 %v5155_v28  ;;  %4781 = vmatprep.mubr.msk.bf16.mxu0 %vm538_vm3, %v4288_v34  ;;  %v6629_v28 = vcombine.low %v6057_v51, %v6061_v56  ;;  %v5173_v51 = vld [vmem:[%s6550_s3 + $0x198] sm:$0xff]   ;;  %v6636_v34 = vld [vmem:[#allocation24_spill] sm:$0xff]  ;;  %v4339_v56 = vld [vmem:[%s6551_s4] ss:$0 sm:$0xff] }
  0xb7   : > { %4787 = vmatprep.subr.bf16.mxu0 %v5159_v33 }
  0xba   : > { %4788 = vmatpush3.bf16.msra.mxu0 %v5159_v33  ;;  %v5188_v33 = vld [vmem:[%s5402_s15 + $0x20] sm:$0xf] }
  0xbb   : > { %4797 = vmatprep.subr.bf16.mxu0 %v5162_v19  ;;  %4622 = vmatmul.mubr.msk.bf16.vlgmr.msra.gmra.mrb[0].mxu1 %vm538_vm3, %v6621_v25  ;;  %v6638_v25 = vld [vmem:[#allocation18_spill] sm:$0xff] }
  0xbc   : > { %4630 = vmatpush3.bf16.msra.mxu1 %v5157_v29  ;;  %4625 = vmatprep.mubr.msk.bf16.mxu1 %vm538_vm3, %v6622_v21  ;;  %v5185_v29 = vld [vmem:[%s5402_s15 + $0x10] sm:$0xf]  ;;  %v4207_v21 = vcombine.low %v6639_v0, %v6638_v25 }
  0xbd   : > { %4782 = vmatmul.mubr.msk.bf16.gmra.mrb[4].mxu0 %vm538_vm3, %v4289_v32  ;;  %4631 = vmatprep.subr.bf16.mxu1 %v5161_v55  ;;  %v4195_v22 = vcombine.low %v6361_v11, %v5185_v29  ;;  %v5190_v32 = vld [vmem:[%s5402_s15 + $0x30] sm:$0xf] }
  0xbe   : > { %4789 = vmatprep.mubr.msk.bf16.mxu0 %vm538_vm3, %v4296_v20 }
  0xc0   : > { %4632 = vmatpush3.bf16.msra.mxu1 %v5161_v55  ;;  %v5193_v55 = vld [vmem:[%s5402_s15 + $0x40] sm:$0xf] }
  0xc1   : > { %4641 = vmatprep.subr.bf16.mxu1 %v5164_v59  ;;  %v4198_v20 = vcombine.low %v5192_v24, %v5193_v55 }
  0xc3   : > { %4626 = vmatmul.mubr.msk.bf16.gmra.mrb[4].mxu1 %vm538_vm3, %v4150_v47 }
  0xc4   : > { %4633 = vmatprep.mubr.msk.bf16.mxu1 %vm538_vm3, %v4157_v37 }
  0xc5   : > { %4790 = vmatmul.mubr.msk.bf16.vlgmr.msra.gmra.mrb[0].mxu0 %vm538_vm3, %v4297_v5 }
  0xc6   : > { %4798 = vmatpush3.bf16.msra.mxu0 %v5162_v19  ;;  %4793 = vmatprep.mubr.msk.bf16.mxu0 %vm538_vm3, %v4298_v13 }
  0xc7   : > { %4799 = vmatprep.subr.bf16.mxu0 %v5165_v27 }
  0xca   : > { %4800 = vmatpush3.bf16.msra.mxu0 %v5165_v27 }
  0xcb   : > { %4809 = vmatprep.subr.bf16.mxu0 %v5167_v48  ;;  %4634 = vmatmul.mubr.msk.bf16.vlgmr.msra.gmra.mrb[0].mxu1 %vm538_vm3, %v6623_v4 }
  0xcc   : > { %4642 = vmatpush3.bf16.msra.mxu1 %v5164_v59  ;;  %4637 = vmatprep.mubr.msk.bf16.mxu1 %vm538_vm3, %v6625_v14  ;;  %v6641_v59 = vld [vmem:[#allocation14_spill] sm:$0xff] }
  0xcd   : > { %4794 = vmatmul.mubr.msk.bf16.gmra.mrb[4].mxu0 %vm538_vm3, %v6624_v6  ;;  %4643 = vmatprep.subr.bf16.mxu1 %v5166_v36 }
  0xce   : > { %4801 = vmatprep.mubr.msk.bf16.mxu0 %vm538_vm3, %v4307_v41 }
  0xd0   : > { %4644 = vmatpush3.bf16.msra.mxu1 %v5166_v36 }
  0xd1   : > { %4653 = vmatprep.subr.bf16.mxu1 %v5168_v23 }
  0xd3   : > { %4638 = vmatmul.mubr.msk.bf16.gmra.mrb[4].mxu1 %vm538_vm3, %v6626_v42 }
  0xd4   : > { %4645 = vmatprep.mubr.msk.bf16.mxu1 %vm538_vm3, %v6627_v58 }
  0xd5   : > { %4802 = vmatmul.mubr.msk.bf16.vlgmr.msra.gmra.mrb[0].mxu0 %vm538_vm3, %v4308_v61 }
  0xd6   : > { %4810 = vmatpush3.bf16.msra.mxu0 %v5167_v48  ;;  %4805 = vmatprep.mubr.msk.bf16.mxu0 %vm538_vm3, %v4309_v54 }
  0xd7   : > { %4811 = vmatprep.subr.bf16.mxu0 %v5169_v49 }
  0xda   : > { %4812 = vmatpush3.bf16.msra.mxu0 %v5169_v49 }
  0xdb   : > { %4821 = vmatprep.subr.bf16.mxu0 %v5171_v12  ;;  %4646 = vmatmul.mubr.msk.bf16.vlgmr.msra.gmra.mrb[0].mxu1 %vm538_vm3, %v6628_v2 }
  0xdc   : > { %4654 = vmatpush3.bf16.msra.mxu1 %v5168_v23  ;;  %4649 = vmatprep.mubr.msk.bf16.mxu1 %vm538_vm3, %v6630_v57 }
  0xdd   : > { %4806 = vmatmul.mubr.msk.bf16.gmra.mrb[4].mxu0 %vm538_vm3, %v6629_v28  ;;  %4655 = vmatprep.subr.bf16.mxu1 %v5170_v8 }
  0xde   : > { %4813 = vmatprep.mubr.msk.bf16.mxu0 %vm538_vm3, %v6000_v26  ;;  %v5175_v26 = vld [vmem:[%s6550_s3 + $0xc8] sm:$0xff]  }
  0xe0   : > { %4656 = vmatpush3.bf16.msra.mxu1 %v5170_v8 }
  0xe1   : > { %4665 = vmatprep.subr.bf16.mxu1 %v5172_v10 }
  0xe3   : > { %4650 = vmatmul.mubr.msk.bf16.gmra.mrb[4].mxu1 %vm538_vm3, %v6632_v16 }
  0xe4   : > { %4657 = vmatprep.mubr.msk.bf16.mxu1 %vm538_vm3, %v4185_v35 }
  0xe5   : > { %4814 = vmatmul.mubr.msk.bf16.vlgmr.msra.gmra.mrb[0].mxu0 %vm538_vm3, %v6009_v9  ;;  %v6634_v9 = vcombine.low %v6620_v15, %v6030_v45  ;;  %v5186_v45 = vld [vmem:[%s6550_s3 + $0xd0] sm:$0xff]   ;;  %v5189_v15 = vld [vmem:[%s5402_s15 + $0x28] sm:$0xf] }
  0xe6   : > { %4822 = vmatpush3.bf16.msra.mxu0 %v5171_v12  ;;  %4817 = vmatprep.mubr.msk.bf16.mxu0 %vm538_vm3, %v6133_v62  ;;  %v6635_v62 = vld [vmem:[#allocation23_spill] sm:$0xff]  ;;  %v4197_v43 = vcombine.low %v5189_v15, %v5190_v32 }
  0xe7   : > { %4823 = vmatprep.subr.bf16.mxu0 %v5173_v51 }
  0xea   : > { %4824 = vmatpush3.bf16.msra.mxu0 %v5173_v51 }
  0xeb   : > { %4833 = vmatprep.subr.bf16.mxu0 %v5176_v3  ;;  %4658 = vmatmul.mubr.msk.bf16.vlgmr.msra.gmra.mrb[0].mxu1 %vm538_vm3, %v6633_v53 }
  0xec   : > { %4666 = vmatpush3.bf16.msra.mxu1 %v5172_v10  ;;  %4661 = vmatprep.mubr.msk.bf16.mxu1 %vm538_vm3, %v6635_v62 }
  0xed   : > { %4818 = vmatmul.mubr.msk.bf16.gmra.mrb[4].mxu0 %vm538_vm3, %v6634_v9  ;;  %4667 = vmatprep.subr.bf16.mxu1 %v5175_v26 }
  0xee   : > { %4825 = vmatprep.mubr.msk.bf16.mxu0 %vm538_vm3, %v6191_v40  ;;  %v5187_v40 = vld [vmem:[%s5402_s15 + $0x18] sm:$0xf]  ;;  %s4063_s15 = sshll.u32 %s6660_s21, 3 }
  0xef   : > { %v4196_v19 = vcombine.low %v5187_v40, %v5188_v33  ;;  %s367_s20 = sadd.s32 %s4064_s13, %s4063_s15 }
  0xf0   : > { %4668 = vmatpush3.bf16.msra.mxu1 %v5175_v26  ;;  %s4065_s21 = sshll.u32 %s367_s20, 2 }
  0xf1   : > { %4845 = vmatprep.subr.bf16.mxu1 %v5186_v45  ;;  %s6514_s8 = scalar_lea.vmem %s6553_s6, %s4065_s21 }
  0xf3   : > { %4662 = vmatmul.mubr.msk.bf16.gmra.mrb[4].mxu1 %vm538_vm3, %v6636_v34 }
  0xf4   : > { %4669 = vmatprep.mubr.msk.bf16.mxu1 %vm538_vm3, %v4195_v22 }
  0xf5   : > { %4826 = vmatmul.mubr.msk.bf16.vlgmr.msra.gmra.mrb[0].mxu0 %vm538_vm3, %v6195_v18  ;;  %v6637_v18 = vld [vmem:[#allocation6_spill] sm:$0xff] }
  0xf6   : > { %4834 = vmatpush3.bf16.msra.mxu0 %v5176_v3  ;;  %4829 = vmatprep.mubr.msk.bf16.mxu0 %vm538_vm3, %v6226_v44  ;;  %v5191_v44 = vld [vmem:[%s6550_s3 + $0xd8] sm:$0xff]  }
  0xf7   : > { %4835 = vmatprep.subr.bf16.mxu0 %v5179_v60 }
  0xfa   : > { %4836 = vmatpush3.bf16.msra.mxu0 %v5179_v60 }
  0xfb   : > { %4670 = vmatmul.mubr.msk.bf16.vlgmr.msra.gmra.mrb[0].mxu1 %vm538_vm3, %v4196_v19 }
  0xfc   : > { %4847 = vmatpush3.bf16.msra.mxu1 %v5186_v45  ;;  %4673 = vmatprep.mubr.msk.bf16.mxu1 %vm538_vm3, %v4197_v43 }
  0xfd   : > { %4830 = vmatmul.mubr.msk.bf16.gmra.mrb[4].mxu0 %vm538_vm3, %v6637_v18  ;;  %4846 = vmatprep.subr.bf16.mxu1 %v5191_v44 }
  0xfe   : > { %4837 = vmatprep.mubr.msk.bf16.mxu0 %vm538_vm3, %v6275_v63  ;;  %v6640_v63 = vld [vmem:[#allocation13_spill] sm:$0xff] }
  0xff   : > { %v6642_v47 = vcombine.low %v6640_v63, %v6641_v59 }
 0x100   : > { %4848 = vmatpush3.bf16.msra.mxu1 %v5191_v44 }
 0x103   : > { %4674 = vmatmul.mubr.msk.bf16.gmra.mrb[4].mxu1 %vm538_vm3, %v4198_v20 }
 0x104   : > { %4685 = vmatprep.mubr.msk.bf16.mxu1 %vm538_vm3, %v4207_v21 }
 0x105   : > { %4838 = vmatmul.mubr.msk.bf16.vlgmr.msra.gmra.mrb[0].mxu0 %vm538_vm3, %v6279_v31 }
 0x106   : > { %4841 = vmatprep.mubr.msk.bf16.mxu0 %vm538_vm3, %v6303_v50  ;;  %v4340_v50 = vld [vmem:[%s6552_s5] ss:$0 sm:$0xff] }
 0x10d   : > { %4842 = vmatmul.mubr.msk.bf16.gmra.mrb[4].mxu0 %vm538_vm3, %v4332_v46 }
 0x10f   : > { %4686 = vmatmul.mubr.msk.bf16.vlgmr.msra.gmra.mrb[4].mxu1 %vm538_vm3, %v6642_v47 }
 0x1ce   : > { %v4671_v5 = vpop.f32.mrb[0].mxu1 }
 0x1cf   : > { %v2108_v11 = vpop.f32.mrb[1].mxu1 }
 0x1d0   : > { %v4672_v7 = vpop.f32.mrb[2].mxu1 }
 0x1d1   : > { %v2111_v31 = vpop.f32.mrb[3].mxu1 }
 0x1d8   : > { %v4839_v37 = vpop.f32.mrb[0].mxu0 }
 0x1d9   : > { %v4849_v38 = vadd.f32 %v4839_v37, %v4671_v5  ;;  %v3800_v46 = vpop.f32.mrb[1].mxu0 }
 0x1da   : > { %v4850_v13 = vadd.f32 %v3800_v46, %v2108_v11  ;;  %v4840_v27 = vpop.f32.mrb[2].mxu0 }
 0x1db   : > { %v3848_v48 = vmul.f32 %v4849_v38, %v4339_v56  ;;  %v4851_v36 = vadd.f32 %v4840_v27, %v4672_v7  ;;  %v3803_v41 = vpop.f32.mrb[3].mxu0 }
 0x1dc   : > { %v3846_v4 = vmul.f32 %v4850_v13, %v4339_v56  ;;  %v4852_v6 = vadd.f32 %v3803_v41, %v2111_v31 }
 0x1dd   : > { %v3863_v14 = vadd.f32 %v4340_v50, %v3848_v48  ;;  %v3849_v23 = vmul.f32 %v4851_v36, %v4339_v56 }
 0x1de   : > { %v3861_v61 = vadd.f32 %v4340_v50, %v3846_v4  ;;  %v3847_v54 = vmul.f32 %v4852_v6, %v4339_v56 }
 0x1df   : > { %v3871_v49 = vmax.f32 %v3863_v14, 0.0  ;;  %v3864_v42 = vadd.f32 %v4340_v50, %v3849_v23 }
 0x1e0   : > { %v3869_v58 = vmax.f32 %v3861_v61, 0.0  ;;  %v3862_v12 = vadd.f32 %v4340_v50, %v3847_v54  ;;  %v4843_v52 = vpop.f32.mrb[4].mxu0 }
 0x1e1   : > { %v4353_v17 = vpack.c.bf16 %v3871_v49, %v3871_v49  ;;  %v3872_v8 = vmax.f32 %v3864_v42, 0.0  ;;  %v3816_v1 = vpop.f32.mrb[5].mxu0 }
 0x1e2   : > { %v4351_v2 = vpack.c.bf16 %v3869_v58, %v3869_v58  ;;  %v3870_v28 = vmax.f32 %v3862_v12, 0.0  ;;  %v4844_v57 = vpop.f32.mrb[6].mxu0  ;;  %v4687_v10 = vpop.f32.mrb[4].mxu1 }
 0x1e3   : > { %3912 = vst.msk [vmem:[%s6514_s8 + $0x8] sm:$0xf] %vm3909_vm7, %v4353_v17  ;;  %v4354_v30 = vpack.c.bf16 %v3872_v8, %v3872_v8  ;;  %v3819_v39 = vpop.f32.mrb[7].mxu0  ;;  %v2244_v51 = vpop.f32.mrb[5].mxu1  ;;  %v4853_v16 = vadd.f32 %v4843_v52, %v4687_v10 }
 0x1e4   : > { %3910 = vst.msk [vmem:[%s6514_s8] sm:$0xf] %vm3909_vm7, %v4351_v2  ;;  %v4352_v35 = vpack.c.bf16 %v3870_v28, %v3870_v28  ;;  %v4688_v3 = vpop.f32.mrb[6].mxu1  ;;  %v4854_v26 = vadd.f32 %v3816_v1, %v2244_v51 }
 0x1e5   : > { %3913 = vst.msk [vmem:[%s6514_s8 + $0xc] sm:$0xf] %vm3909_vm7, %v4354_v30  ;;  %v3852_v53 = vmul.f32 %v4853_v16, %v4339_v56  ;;  %v2247_v9 = vpop.f32.mrb[7].mxu1  ;;  %v4855_v62 = vadd.f32 %v4844_v57, %v4688_v3 }
 0x1e6   : > { %3911 = vst.msk [vmem:[%s6514_s8 + $0x4] sm:$0xf] %vm3909_vm7, %v4352_v35  ;;  %v3850_v29 = vmul.f32 %v4854_v26, %v4339_v56  ;;  %v4856_v22 = vadd.f32 %v3819_v39, %v2247_v9 }
 0x1e7   : > { %v3867_v45 = vadd.f32 %v4340_v50, %v3852_v53  ;;  %v3853_v60 = vmul.f32 %v4855_v62, %v4339_v56 }
 0x1e8   : > { %v3865_v34 = vadd.f32 %v4340_v50, %v3850_v29  ;;  %v3851_v40 = vmul.f32 %v4856_v22, %v4339_v56 }
 0x1e9   : > { %v3875_v33 = vmax.f32 %v3867_v45, 0.0  ;;  %v3868_v19 = vadd.f32 %v4340_v50, %v3853_v60 }
 0x1ea   : > { %v3873_v15 = vmax.f32 %v3865_v34, 0.0  ;;  %v3866_v32 = vadd.f32 %v4340_v50, %v3851_v40 }
 0x1eb   : > { %v4357_v43 = vpack.c.bf16 %v3875_v33, %v3875_v33  ;;  %v3876_v18 = vmax.f32 %v3868_v19, 0.0 }
 0x1ec   : > { %v4355_v44 = vpack.c.bf16 %v3873_v15, %v3873_v15  ;;  %v3874_v24 = vmax.f32 %v3866_v32, 0.0 }
 0x1ed   : > { %3916 = vst.msk [vmem:[%s6514_s8 + $0x18] sm:$0xf] %vm3909_vm7, %v4357_v43  ;;  %v4358_v55 = vpack.c.bf16 %v3876_v18, %v3876_v18 }
 0x1ee   : > { %3914 = vst.msk [vmem:[%s6514_s8 + $0x10] sm:$0xf] %vm3909_vm7, %v4355_v44  ;;  %v4356_v20 = vpack.c.bf16 %v3874_v24, %v3874_v24 }
 0x1ef   : > { %3917 = vst.msk [vmem:[%s6514_s8 + $0x1c] sm:$0xf] %vm3909_vm7, %v4358_v55 }
 0x1f0   : > { %3915 = vst.msk [vmem:[%s6514_s8 + $0x14] sm:$0xf] %vm3909_vm7, %v4356_v20 }
 0x1f1 PF: > { %s16_s25 = sadd.s32 1, %s5232_s25   ;;  %s6643_s21 = smov %s5224_s23 }
 0x1f2   : > { %p13_p10 = scmp.ge.s32.totalorder %s16_s25, 10   ;;  %s6644_s22 = smov %s5228_s24 }
 0x1f3   : > { %s6645_s23 = smov %s6648_s26  ;;  %s6646_s24 = smov %s6652_s27 }
 0x1f4   :  { %15 = sbr.rel (!%p13_p10) target bundleno = 3 (0x3), region = 80 }

// kernel: cbam_forward.5
= control target key start
LH: loop header
LB: loop body
LE: loop exit
PB: predicated region body
PF: predicated region fallthrough
CT: control target
= control target key end

     0   :  { %s5517_s30 = smov 0   ;;  %s5519_s10 = smov 0   ;;  %s6843_s0 = inlined_call_operand.vmem [shape: bf16[2,6,10,10,32], index: 0, kind: input, shape index: {}, may-alias: {0,1,2}]   ;;  %s6844_s1 = inlined_call_operand.vmem [shape: bf16[2,6,10,10,32], index: 1, kind: input, shape index: {}, may-alias: {0,1,2}]   ;;  %s6845_s2 = inlined_call_operand.vmem [shape: bf16[2,6,10,10,32], index: 2, kind: input, shape index: {}, may-alias: {0,1,2}]   ;;  %s6846_s3 = inlined_call_operand.vmem [shape: bf16[864,32], index: 3, kind: input, shape index: {}]   ;;  %s6847_s4 = inlined_call_operand.vmem [shape: f32[1,32], index: 4, kind: input, shape index: {}]   ;;  %s6848_s5 = inlined_call_operand.vmem [shape: f32[1,32], index: 5, kind: input, shape index: {}]   ;;  %s6849_s6 = inlined_call_operand.vmem [shape: f32[2,32], index: 6, kind: input, shape index: {}]   ;;  %s6850_s7 = inlined_call_operand.vmem [shape: f32[2,32], index: 7, kind: input, shape index: {}]   ;;  %s6851_s8 = inlined_call_operand.vmem [shape: bf16[2,4,64,32], index: 8, kind: output, shape index: {0}]   ;;  %s6852_s9 = inlined_call_operand.vmem [shape: f32[2,1,32], index: 9, kind: output, shape index: {1}]  }
   0x1   :  { %s5521_s11 = smov 0   ;;  %s5523_s12 = smov 0  }
   0x2   :  { %s5525_s13 = smov 0  }
   0x3 LB: > { %s29_s14 = sadd.s32 1, %s5457_s11  ;;  %s32_s15 = sadd.s32 1, %s5461_s12  ;;  %s5465_s13 = sphi %s5525_s13, %s20_s13   ;;  %s5461_s12 = sphi %s5523_s12, %s6945_s12   ;;  %s5457_s11 = sphi %s5521_s11, %s6944_s11   ;;  %s5453_s10 = sphi %s5519_s10, %s6943_s10   ;;  %s5449_s30 = sphi %s5517_s30, %s6942_s30  }
   0x4   : > { %p30_p0 = scmp.ge.s32.totalorder %s29_s14, 4  ;;  %p4283_p1 = scmp.ge.s32.totalorder %s5465_s13, 1 }
   0x5   : > { %p350_p2 = scmp.lt.s32.totalorder %s5465_s13, 9 }
   0x6   : > { %s6947_s14 = smov (%p30_p0, %s29_s14), 0  ;;  %s6949_s15 = smov (!%p30_p0, %s32_s15), %s5461_s12 }
   0x7   : > { %p351_p3 = pnand %p4283_p1, %p350_p2  ;;  %p34_p4 = scmp.ge.s32.totalorder %s6949_s15, 2 }
   0x9   : > { %s6951_s15 = smov (%p34_p4, %s6949_s15), 0  ;;  %354 = sbr.rel (%p351_p3) target bundleno = 730 (0x2da), region = 52 }
  0x10   : > { %v5330_v0 = vld [vmem:[%s6846_s3 + $0x10] sm:$0xff]   ;;  %p417_p5 = scmp.lt.s32.totalorder %s5453_s10, 1  ;;  %p419_p6 = scmp.lt.s32.totalorder %s5449_s30, 5  ;;  %v5332_v2 = vld [vmem:[%s6846_s3 + $0x18] sm:$0xff]   ;;  %v5575_v4 = vld [vmem:[%s6846_s3] sm:$0xff]   ;;  %vm628_vm3 = vcmask 261120  }
  0x11   : > { %v5331_v1 = vld [vmem:[%s6846_s3 + $0xd0] sm:$0xff]   ;;  %4750 = vmatprep.subr.bf16.mxu1 %v5330_v0  ;;  %v5333_v3 = vld [vmem:[%s6846_s3 + $0xd8] sm:$0xff]   ;;  %s426_s18 = sadd.s32 1, %s5449_s30  ;;  %v5582_v5 = vld [vmem:[%s6846_s3 + $0xe0] sm:$0xff]   ;;  %vm485_vm0 = vsmask.f32 3328 }
  0x12   : > { %s6953_s10 = smov (!%p417_p5, %s5453_s10), 1  ;;  %4906 = vmatprep.subr.bf16.mxu0 %v5331_v1  ;;  %4751 = vmatpush3.bf16.msra.mxu1 %v5330_v0  ;;  %p5590_p7 = scmp.lt.s32.totalorder %s426_s18, 5  ;;  %vm486_vm1 = vsmask.f32 7440  ;;  %v5337_v63 = vld [vmem:[%s6846_s3 + $0x8] sm:$0xff]   ;;  %vm823_vm4 = vcmask 1042432  }
  0x13   : > { %s420_s24 = scalar_select %p419_p6, %s5449_s30, 5  ;;  %4907 = vmatpush3.bf16.msra.mxu0 %v5331_v1  ;;  %4752 = vmatprep.subr.bf16.mxu1 %v5332_v2  ;;  %vm5636_vm2 = vmor %vm485_vm0, %vm486_vm1  ;;  %vm824_vm5 = vcmask 1046532   ;;  %vm3991_vm7 = vcmask 257024  }
  0x14   : > { %s5566_s25 = smul.u32 120, %s6953_s10  ;;  %s459_s28 = scalar_lea.vmem %s6852_s9, %s6953_s10  ;;  %4908 = vmatprep.subr.bf16.mxu0 %v5333_v3  ;;  %vm5787_vm6 = vmor %vm823_vm4, %vm824_vm5 }
  0x15   : > { %s5286_s29 = smul.u32 20, %s420_s24  ;;  %s6955_s18 = smov (!%p5590_p7, %s426_s18), 5 }
  0x16   : > { %4753 = vmatpush3.bf16.msra.mxu1 %v5332_v2  ;;  %p450_p9 = scmp.lt.s32.totalorder %s5449_s30, 3  ;;  %p4573_p10 = scmp.ne.s32.totalorder %s5449_s30, 0 }
  0x17   : > { %s423_s19 = sadd.s32 %s5566_s25, %s5286_s29  ;;  %4909 = vmatpush3.bf16.msra.mxu0 %v5333_v3  ;;  %4762 = vmatprep.subr.bf16.mxu1 %v5575_v4  ;;  %s5288_s29 = smul.u32 20, %s6955_s18  ;;  %vm4046_vm8 = vcmask (!%p4573_p10), 253952  }
  0x18   : > { %s4284_s22 = sshll.u32 %s423_s19, 2  ;;  %4918 = vmatprep.subr.bf16.mxu0 %v5582_v5  ;;  %s4288_s19 = sshll.u32 %s6953_s10, 5 }
  0x19   : > { %s5588_s24 = scalar_lea.vmem %s6843_s0, %s4284_s22  ;;  %s433_s16 = sadd.s32 %s5288_s29, %s5566_s25 }
  0x1a   : > { %v5596_v6 = vld [vmem:[%s5588_s24] sm:$0xf]  ;;  %v5599_v7 = vld [vmem:[%s5588_s24 + $0x4] sm:$0x1]  ;;  %v5602_v8 = vld [vmem:[%s5588_s24 + $0x8] sm:$0xf] }
  0x1b   : > { %v5605_v9 = vld [vmem:[%s5588_s24 + $0xc] sm:$0x1]  ;;  %v5608_v10 = vld [vmem:[%s5588_s24 + $0x10] sm:$0xf]  ;;  %v5611_v11 = vld [vmem:[%s5588_s24 + $0x14] sm:$0x1] }
  0x1c   : > { %v5616_v13 = vld [vmem:[%s5588_s24 + $0x18] sm:$0xf]  ;;  %v489_v14 = vshrl.u32 %v5596_v6, 16  ;;  %v492_v15 = vshll.u32 %v5596_v6, 16  ;;  %v498_v16 = vshll.u32 %v5599_v7, 16  ;;  %v503_v17 = vshrl.u32 %v5602_v8, 16 }
  0x1d   : > { %v506_v18 = vshll.u32 %v5602_v8, 16  ;;  %v512_v19 = vshll.u32 %v5605_v9, 16  ;;  %v517_v20 = vshrl.u32 %v5608_v10, 16  ;;  %v520_v21 = vshll.u32 %v5608_v10, 16  ;;  %v5629_v22 = vld [vmem:[%s5588_s24 + $0x1c] sm:$0x1] }
  0x1e   : > { %v491_v23 = vrot.slane %v489_v14, 4  ;;  %v494_v24 = vrot.slane %v492_v15, 5  ;;  %v505_v25 = vrot.slane %v503_v17, 4  ;;  %v500_v26 = vrot.slane %v498_v16, 5  ;;  %s4285_s17 = sshll.u32 %s433_s16, 2  ;;  %s437_s16 = sadd.s32 2, %s5449_s30 }
  0x1f   : > { %v508_v27 = vrot.slane %v506_v18, 5  ;;  %v519_v28 = vrot.slane %v517_v20, 4  ;;  %v522_v29 = vrot.slane %v520_v21, 5  ;;  %v526_v31 = vshll.u32 %v5611_v11, 16  ;;  %v5643_v45 = vld [vmem:[%s5588_s24 + $0x20] sm:$0xf]  ;;  %s5654_s20 = scalar_lea.vmem %s6844_s1, %s4285_s17 }
  0x20   : > { %v495_v30 = vor.u32 %v494_v24, %v491_v23  ;;  %v531_v32 = vshrl.u32 %v5616_v13, 16  ;;  %v534_v33 = vshll.u32 %v5616_v13, 16  ;;  %v514_v36 = vrot.slane %v512_v19, 5  ;;  %v1612_v56 = vld [vmem:[%s5654_s20 + $0x4] sm:$0x1]  ;;  %p5991_p8 = scmp.lt.s32.totalorder %s437_s16, 5 }
  0x21   : > { %v509_v35 = vor.u32 %v508_v27, %v505_v25  ;;  %v523_v37 = vor.u32 %v522_v29, %v519_v28  ;;  %v540_v38 = vshll.u32 %v5629_v22, 16  ;;  %v528_v40 = vrot.slane %v526_v31, 5  ;;  %v5671_v57 = vld [vmem:[%s5654_s20 + $0x8] sm:$0xf]  ;;  %v5674_v58 = vld [vmem:[%s5654_s20 + $0xc] sm:$0x1] }
  0x22   : > { %v496_v39 = vrot.slane %v495_v30, 4  ;;  %v533_v41 = vrot.slane %v531_v32, 4  ;;  %v536_v42 = vrot.slane %v534_v33, 5  ;;  %v545_v53 = vshrl.u32 %v5643_v45, 16  ;;  %v1611_v61 = vld [vmem:[%s5654_s20] sm:$0xf] }
  0x23   : > { %v510_v43 = vrot.slane %v509_v35, 4  ;;  %v524_v44 = vrot.slane %v523_v37, 4  ;;  %v542_v48 = vrot.slane %v540_v38, 5  ;;  %v548_v59 = vshll.u32 %v5643_v45, 16  ;;  %v5683_v62 = vld [vmem:[%s5654_s20 + $0x10] sm:$0xf] }
  0x24   : > { %v501_v46 = vsel %vm5636_vm2, %v496_v39, %v500_v26  ;;  %v537_v47 = vor.u32 %v536_v42, %v533_v41  ;;  %v5689_v0 = vld [vmem:[%s5654_s20 + $0x14] sm:$0x1]  ;;  %v5692_v1 = vld [vmem:[%s5654_s20 + $0x18] sm:$0xf]  ;;  %v1753_v2 = vshrl.u32 %v1611_v61, 16  ;;  %v1756_v3 = vshll.u32 %v1611_v61, 16 }
  0x25   : > { %v5649_v49 = vsel %vm5636_vm2, %v510_v43, %v514_v36  ;;  %v5658_v50 = vsel %vm5636_vm2, %v524_v44, %v528_v40  ;;  %v5697_v14 = vld [vmem:[%s5654_s20 + $0x1c] sm:$0x1]  ;;  %v5700_v15 = vld [vmem:[%s5654_s20 + $0x20] sm:$0xf]  ;;  %v1762_v16 = vshll.u32 %v1612_v56, 16  ;;  %v1767_v17 = vshrl.u32 %v5671_v57, 16 }
  0x26   : > { %v538_v51 = vrot.slane %v537_v47, 4  ;;  %v4290_v52 = vcombine.low %v501_v46, %v5649_v49  ;;  %v1770_v18 = vshll.u32 %v5671_v57, 16  ;;  %v1776_v19 = vshll.u32 %v5674_v58, 16  ;;  %v5708_v20 = vld [vmem:[%s6846_s3 + $0x20] sm:$0xff]   ;;  %s6957_s16 = smov (!%p5991_p8, %s437_s16), 5 }
  0x27   : > { %v547_v21 = vrot.slane %v545_v53, 4  ;;  %v1755_v23 = vrot.slane %v1753_v2, 4  ;;  %v1758_v24 = vrot.slane %v1756_v3, 5  ;;  %v1781_v25 = vshrl.u32 %v5683_v62, 16  ;;  %v5713_v30 = vld [vmem:[%s5588_s24 + $0x24] sm:$0x1] }
  0x28   : > { %v5664_v54 = vsel %vm5636_vm2, %v538_v51, %v542_v48  ;;  %4754 = vmatprep.mubr.msk.bf16.mxu1 %vm628_vm3, %v4290_v52  ;;  %v550_v26 = vrot.slane %v548_v59, 5  ;;  %v1764_v27 = vrot.slane %v1762_v16, 5  ;;  %v1769_v28 = vrot.slane %v1767_v17, 4  ;;  %v5717_v36 = vld [vmem:[%s5654_s20 + $0x24] sm:$0x1]  ;;  %s5289_s27 = smul.u32 20, %s6957_s16 }
  0x29   : > { %v5679_v60 = vcombine.low %v5658_v50, %v5664_v54  ;;  %v1772_v29 = vrot.slane %v1770_v18, 5  ;;  %v1759_v31 = vor.u32 %v1758_v24, %v1755_v23  ;;  %v1778_v32 = vrot.slane %v1776_v19, 5  ;;  %v5733_v18 = vld [vmem:[%s5588_s24 + $0x28] sm:$0xf] }
  0x2a   : > { %v1783_v33 = vrot.slane %v1781_v25, 4  ;;  %v1784_v35 = vshll.u32 %v5683_v62, 16  ;;  %v1790_v38 = vshll.u32 %v5689_v0, 16  ;;  %v1795_v39 = vshrl.u32 %v5692_v1, 16  ;;  %v5738_v25 = vld [vmem:[%s5588_s24 + $0x2c] sm:$0x1]  ;;  %s444_s17 = sadd.s32 %s5289_s27, %s5566_s25 }
  0x2b   : > { %6881 = vst [vmem:[#allocation4_spill] sm:$0xff] %v5679_v60  ;;  %4755 = vmatmul.mubr.msk.bf16.vlgmr.msra.gmra.mrb[0].mxu1 %vm628_vm3, %v5679_v60  ;;  %v1773_v37 = vor.u32 %v1772_v29, %v1769_v28  ;;  %v1760_v40 = vrot.slane %v1759_v31, 4  ;;  %v1804_v42 = vshll.u32 %v5697_v14, 16  ;;  %v1809_v43 = vshrl.u32 %v5700_v15, 16  ;;  %v5745_v28 = vld [vmem:[%s5588_s24 + $0x30] sm:$0xf] }
  0x2c   : > { %4763 = vmatpush3.bf16.msra.mxu1 %v5575_v4  ;;  %v1798_v4 = vshll.u32 %v5692_v1, 16  ;;  %v1786_v41 = vrot.slane %v1784_v35, 5  ;;  %v1797_v46 = vrot.slane %v1795_v39, 4  ;;  %v554_v48 = vshll.u32 %v5713_v30, 16  ;;  %s4286_s25 = sshll.u32 %s444_s17, 2 }
  0x2d   : > { %4764 = vmatprep.subr.bf16.mxu1 %v5337_v63  ;;  %v1774_v44 = vrot.slane %v1773_v37, 4  ;;  %v1765_v51 = vsel %vm5636_vm2, %v1760_v40, %v1764_v27  ;;  %v1792_v53 = vrot.slane %v1790_v38, 5  ;;  %v1811_v59 = vrot.slane %v1809_v43, 4  ;;  %v5759_v40 = vld [vmem:[%s5588_s24 + $0x38] sm:$0xf]  ;;  %s6141_s27 = scalar_lea.vmem %s6845_s2, %s4286_s25 }
  0x2e   : > { %v1800_v47 = vrot.slane %v1798_v4, 5  ;;  %v1787_v52 = vor.u32 %v1786_v41, %v1783_v33  ;;  %v1812_v61 = vshll.u32 %v5700_v15, 16  ;;  %v551_v2 = vor.u32 %v550_v26, %v547_v21  ;;  %v5748_v21 = vld [vmem:[%s5588_s24 + $0x34] sm:$0x1] }
  0x2f   : > { %v1779_v3 = vsel %vm5636_vm2, %v1774_v44, %v1778_v32  ;;  %v1806_v17 = vrot.slane %v1804_v42, 5  ;;  %v556_v26 = vrot.slane %v554_v48, 5  ;;  %v1991_v35 = vrot.slane %v5674_v58, 5  ;;  %v5765_v44 = vld [vmem:[%s5588_s24 + $0x3c] sm:$0x1] }
  0x30   : > { %4765 = vmatpush3.bf16.msra.mxu1 %v5337_v63  ;;  %v1801_v56 = vor.u32 %v1800_v47, %v1797_v46  ;;  %v1818_v63 = vshll.u32 %v5717_v36, 16  ;;  %v1788_v16 = vrot.slane %v1787_v52, 4  ;;  %v1814_v23 = vrot.slane %v1812_v61, 5 }
  0x31   : > { %4774 = vmatprep.subr.bf16.mxu1 %v5708_v20  ;;  %v5735_v24 = vcombine.low %v1765_v51, %v1779_v3  ;;  %v552_v32 = vrot.slane %v551_v2, 4  ;;  %v1995_v38 = vrot.slane %v5689_v0, 5  ;;  %v559_v4 = vshrl.u32 %v5733_v18, 16  ;;  %v5336_v0 = vld [vmem:[%s6846_s3 + $0xe8] sm:$0xff]  }
  0x32   : > { %v1802_v19 = vrot.slane %v1801_v56, 4  ;;  %v5742_v27 = vsel %vm5636_vm2, %v1788_v16, %v1792_v53  ;;  %v1815_v29 = vor.u32 %v1814_v23, %v1811_v59  ;;  %v1820_v31 = vrot.slane %v1818_v63, 5  ;;  %v5792_v16 = vld [vmem:[%s5654_s20 + $0x28] sm:$0xf] }
  0x33   : > { %6882 = vst [vmem:[#allocation5_spill] sm:$0xff] %v5735_v24  ;;  %v4429_v39 = vcombine.low %v1779_v3, %v5742_v27  ;;  %v1999_v41 = vrot.slane %v5697_v14, 5  ;;  %v562_v42 = vshll.u32 %v5733_v18, 16  ;;  %v568_v43 = vshll.u32 %v5738_v25, 16  ;;  %v5405_v3 = vld [vmem:[%s6846_s3 + $0x1a0] sm:$0xff]  }
  0x34   : > { %v5752_v33 = vsel %vm5636_vm2, %v1802_v19, %v1806_v17  ;;  %v1816_v37 = vrot.slane %v1815_v29, 4  ;;  %v573_v46 = vshrl.u32 %v5745_v28, 16  ;;  %v561_v14 = vrot.slane %v559_v4, 4  ;;  %v5795_v17 = vld [vmem:[%s5654_s20 + $0x2c] sm:$0x1] }
  0x35   : > { %4910 = vmatprep.mubr.msk.bf16.mxu0 %vm628_vm3, %v4429_v39  ;;  %v576_v47 = vshll.u32 %v5745_v28, 16  ;;  %v582_v48 = vshll.u32 %v5748_v21, 16  ;;  %v5780_v51 = vsel %vm5636_vm2, %v552_v32, %v556_v26  ;;  %v2003_v52 = vrot.slane %v5717_v36, 5  ;;  %v5809_v4 = vld [vmem:[%s5654_s20 + $0x30] sm:$0xf] }
  0x36   : > { %v5770_v58 = vsel %vm5636_vm2, %v1816_v37, %v1820_v31  ;;  %v564_v56 = vrot.slane %v562_v42, 5  ;;  %v570_v59 = vrot.slane %v568_v43, 5  ;;  %v575_v61 = vrot.slane %v573_v46, 4  ;;  %v5338_v37 = vld [vmem:[%s6846_s3 + $0xf0] sm:$0xff]  }
  0x37   : > { %v4430_v53 = vcombine.low %v5752_v33, %v5770_v58  ;;  %v578_v63 = vrot.slane %v576_v47, 5  ;;  %v584_v2 = vrot.slane %v582_v48, 5  ;;  %v587_v19 = vshrl.u32 %v5759_v40, 16  ;;  %v5812_v42 = vld [vmem:[%s5654_s20 + $0x34] sm:$0x1] }
  0x38   : > { %v565_v36 = vor.u32 %v564_v56, %v561_v14  ;;  %v590_v23 = vshll.u32 %v5759_v40, 16  ;;  %v596_v26 = vshll.u32 %v5765_v44, 16  ;;  %v4402_v31 = vrot.slane %v5671_v57, 9  ;;  %v5827_v56 = vld [vmem:[%s5654_s20 + $0x38] sm:$0xf] }
  0x39   : > { %4911 = vmatmul.mubr.msk.bf16.vlgmr.msra.gmra.mrb[0].mxu0 %vm628_vm3, %v4430_v53  ;;  %v579_v29 = vor.u32 %v578_v63, %v575_v61  ;;  %v4403_v32 = vrot.slane %v5683_v62, 9  ;;  %v4404_v39 = vrot.slane %v5692_v1, 9  ;;  %v589_v43 = vrot.slane %v587_v19, 4  ;;  %v5830_v61 = vld [vmem:[%s5654_s20 + $0x3c] sm:$0x1] }
  0x3a   : > { %4919 = vmatpush3.bf16.msra.mxu0 %v5582_v5  ;;  %v566_v5 = vrot.slane %v565_v36, 4  ;;  %v592_v46 = vrot.slane %v590_v23, 5  ;;  %v598_v57 = vrot.slane %v596_v26, 5  ;;  %v5816_v47 = vsel %vm5787_vm6, %v4402_v31, %v1991_v35  ;;  %v5843_v23 = vld [vmem:[%s5654_s20 + $0x44] sm:$0x1] }
  0x3b   : > { %4920 = vmatprep.subr.bf16.mxu0 %v5336_v0  ;;  %v580_v14 = vrot.slane %v579_v29, 4  ;;  %6885 = vst [vmem:[#allocation6_spill] sm:$0xff] %v5816_v47  ;;  %v5820_v48 = vsel %vm5787_vm6, %v4403_v32, %v1995_v38  ;;  %v5824_v53 = vsel %vm5787_vm6, %v4404_v39, %v1999_v41  ;;  %v4405_v19 = vrot.slane %v5700_v15, 9  ;;  %v5840_v38 = vld [vmem:[%s5654_s20 + $0x40] sm:$0xf] }
  0x3c   : > { %v5834_v63 = vsel %vm5636_vm2, %v566_v5, %v570_v59  ;;  %v593_v36 = vor.u32 %v592_v46, %v589_v43  ;;  %v4440_v35 = vcombine.low %v5816_v47, %v5820_v48  ;;  %v4406_v59 = vrot.slane %v5792_v16, 9 }
  0x3d   : > { %v5847_v41 = vcombine.low %v5780_v51, %v5834_v63  ;;  %v5851_v26 = vsel %vm5636_vm2, %v580_v14, %v584_v2  ;;  %v2007_v29 = vrot.slane %v5795_v17, 5  ;;  %v5858_v32 = vsel %vm5787_vm6, %v4405_v19, %v2003_v52 }
  0x3e   : > { %4921 = vmatpush3.bf16.msra.mxu0 %v5336_v0  ;;  %v594_v31 = vrot.slane %v593_v36, 4  ;;  %4922 = vmatprep.mubr.msk.bf16.mxu0 %vm628_vm3, %v4440_v35  ;;  %v4407_v39 = vrot.slane %v5809_v4, 9  ;;  %v2011_v0 = vrot.slane %v5812_v42, 5  ;;  %v4441_v2 = vcombine.low %v5824_v53, %v5858_v32 }
  0x3f   : > { %6886 = vst [vmem:[#allocation7_spill] sm:$0xff] %v5847_v41  ;;  %4930 = vmatprep.subr.bf16.mxu0 %v5338_v37  ;;  %4758 = vmatprep.mubr.msk.bf16.mxu1 %vm628_vm3, %v5847_v41  ;;  %v4300_v5 = vcombine.low %v5596_v6, %v5602_v8  ;;  %v5870_v43 = vsel %vm5787_vm6, %v4406_v59, %v2007_v29  ;;  %v4408_v14 = vrot.slane %v5827_v56, 9  ;;  %v2015_v36 = vrot.slane %v5830_v61, 5  ;;  %v5342_v29 = vld [vmem:[%s6846_s3 + $0xf8] sm:$0xff]  }
  0x40   : > { %v5874_v52 = vsel %vm5636_vm2, %v594_v31, %v598_v57  ;;  %v5878_v46 = vsel %vm5787_vm6, %v4407_v39, %v2011_v0  ;;  %v4439_v59 = vrot.slane %v5840_v38, 9  ;;  %v2360_v57 = vrot.slane %v5843_v23, 5 }
  0x41   : > { %6887 = vst [vmem:[#allocation8_spill] sm:$0xff] %v5874_v52  ;;  %v5884_v35 = vcombine.low %v5851_v26, %v5874_v52  ;;  %v4442_v19 = vcombine.low %v5870_v43, %v5878_v46  ;;  %v5900_v31 = vsel %vm5787_vm6, %v4408_v14, %v2015_v36  ;;  %v828_v0 = vrot.slane %v5599_v7, 5 }
  0x42   : > { %v5904_v39 = vsel %vm5787_vm6, %v4439_v59, %v2360_v57  ;;  %v4310_v14 = vrot.slane %v5596_v6, 9  ;;  %v4311_v36 = vrot.slane %v5602_v8, 9  ;;  %v836_v7 = vrot.slane %v5611_v11, 5  ;;  %v5345_v6 = vld [vmem:[%s6846_s3 + $0x28] sm:$0xff]  }
  0x43   : > { %6888 = vst [vmem:[#allocation9_spill] sm:$0xff] %v5884_v35  ;;  %4759 = vmatmul.mubr.msk.bf16.gmra.mrb[4].mxu1 %vm628_vm3, %v5884_v35  ;;  %6889 = vst [vmem:[#allocation10_spill] sm:$0xff] %v5904_v39  ;;  %v4443_v59 = vcombine.low %v5900_v31, %v5904_v39  ;;  %v4313_v57 = vrot.slane %v5616_v13, 9  ;;  %v1823_v55 = vshrl.u32 %v5792_v16, 16  ;;  %v5928_v12 = vcombine.low %v5643_v45, %v5733_v18 }
  0x44   : > { %4766 = vmatprep.mubr.msk.bf16.mxu1 %vm628_vm3, %v4300_v5  ;;  %v5915_v5 = vcombine.low %v5608_v10, %v5616_v13  ;;  %v840_v11 = vrot.slane %v5629_v22, 5  ;;  %v5936_v47 = vcombine.low %v5683_v62, %v5692_v1  ;;  %v1851_v24 = vshrl.u32 %v5827_v56, 16 }
  0x45   : > { %4923 = vmatmul.mubr.msk.bf16.vlgmr.msra.gmra.mrb[0].mxu0 %vm628_vm3, %v4441_v2  ;;  %v5910_v2 = vld [vmem:[%s6846_s3 + $0x100] sm:$0xff]   ;;  %v829_v35 = vsel %vm5787_vm6, %v4310_v14, %v828_v0  ;;  %v1860_v22 = vshll.u32 %v5830_v61, 16  ;;  %v2238_v62 = vshrl.u32 %v5840_v38, 16  ;;  %v2241_v52 = vshll.u32 %v5840_v38, 16 }
  0x46   : > { %4931 = vmatpush3.bf16.msra.mxu0 %v5338_v37  ;;  %4926 = vmatprep.mubr.msk.bf16.mxu0 %vm628_vm3, %v4442_v19  ;;  %v832_v37 = vrot.slane %v5605_v9, 5  ;;  %6890 = vst [vmem:[#allocation11_spill] sm:$0xff] %v5915_v5  ;;  %v4312_v19 = vrot.slane %v5608_v10, 9  ;;  %v1826_v9 = vshll.u32 %v5792_v16, 16  ;;  %6891 = vst [vmem:[#allocation12_spill] sm:$0xff] %v5936_v47  ;;  %v1853_v1 = vrot.slane %v1851_v24, 4 }
  0x47   : > { %4932 = vmatprep.subr.bf16.mxu0 %v5342_v29  ;;  %v1825_v39 = vrot.slane %v1823_v55, 4  ;;  %v2240_v24 = vrot.slane %v2238_v62, 4  ;;  %v1837_v61 = vshrl.u32 %v5809_v4, 16  ;;  %v1840_v55 = vshll.u32 %v5809_v4, 16 }
  0x48   : > { %v5947_v41 = vsel %vm5787_vm6, %v4311_v36, %v832_v37  ;;  %v1828_v0 = vrot.slane %v1826_v9, 5  ;;  %v1832_v37 = vshll.u32 %v5795_v17, 16  ;;  %v2243_v14 = vrot.slane %v2241_v52, 5 }
  0x49   : > { %v5969_v17 = vcombine.low %v5745_v28, %v5759_v40  ;;  %v5973_v36 = vcombine.low %v5700_v15, %v5792_v16  ;;  %v4314_v9 = vrot.slane %v5643_v45, 9  ;;  %v1862_v62 = vrot.slane %v1860_v22, 5 }
  0x4a   : > { %4933 = vmatpush3.bf16.msra.mxu0 %v5342_v29  ;;  %v1854_v29 = vshll.u32 %v5827_v56, 16  ;;  %v5981_v52 = vcombine.low %v5809_v4, %v5827_v56  ;;  %v844_v15 = vrot.slane %v5713_v30, 5  ;;  %v4315_v16 = vrot.slane %v5733_v18, 9 }
  0x4b   : > { %4942 = vmatprep.subr.bf16.mxu0 %v5910_v2  ;;  %4767 = vmatmul.mubr.msk.bf16.vlgmr.msra.gmra.mrb[0].mxu1 %vm628_vm3, %v5915_v5  ;;  %v2247_v5 = vshll.u32 %v5843_v23, 16  ;;  %6892 = vst [vmem:[#allocation13_spill] sm:$0xff] %v5973_v36  ;;  %v1839_v22 = vrot.slane %v1837_v61, 4  ;;  %v5997_v4 = vsel %vm5787_vm6, %v4312_v19, %v836_v7  ;;  %v6003_v30 = vsel %vm5787_vm6, %v4313_v57, %v840_v11 }
  0x4c   : > { %4775 = vmatpush3.bf16.msra.mxu1 %v5708_v20  ;;  %v1856_v60 = vrot.slane %v1854_v29, 5  ;;  %4770 = vmatprep.mubr.msk.bf16.mxu1 %vm628_vm3, %v5928_v12  ;;  %v5961_v20 = vld [vmem:[%s6846_s3 + $0x30] sm:$0xff]   ;;  %6893 = vst [vmem:[#allocation14_spill] sm:$0xff] %v5981_v52  ;;  %v1829_v7 = vor.u32 %v1828_v0, %v1825_v39  ;;  %v1846_v61 = vshll.u32 %v5812_v42, 16  ;;  %v856_v42 = vrot.slane %v5765_v44, 5 }
  0x4d   : > { %4927 = vmatmul.mubr.msk.bf16.gmra.mrb[4].mxu0 %vm628_vm3, %v4443_v59  ;;  %4776 = vmatprep.subr.bf16.mxu1 %v5345_v6  ;;  %v4318_v59 = vcombine.low %v829_v35, %v5947_v41  ;;  %v5351_v35 = vld [vmem:[%s6846_s3 + $0x108] sm:$0xff]  }
  0x4e   : > { %4934 = vmatprep.mubr.msk.bf16.mxu0 %vm628_vm3, %v5936_v47  ;;  %v1857_v23 = vor.u32 %v1856_v60, %v1853_v1  ;;  %v2244_v47 = vor.u32 %v2243_v14, %v2240_v24  ;;  %v2249_v60 = vrot.slane %v2247_v5, 5  ;;  %v1842_v1 = vrot.slane %v1840_v55, 5  ;;  %v6066_v44 = vld [vmem:[%s5654_s20 + $0x4c] sm:$0x1] }
  0x4f   : > { %v6028_v24 = vsel %vm5787_vm6, %v4314_v9, %v844_v15  ;;  %v6046_v55 = vcombine.low %v5997_v4, %v6003_v30  ;;  %v852_v14 = vrot.slane %v5748_v21, 5  ;;  %v4317_v9 = vrot.slane %v5759_v40, 9 }
  0x50   : > { %4777 = vmatpush3.bf16.msra.mxu1 %v5345_v6  ;;  %v1858_v29 = vrot.slane %v1857_v23, 4  ;;  %v848_v6 = vrot.slane %v5738_v25, 5  ;;  %v2245_v5 = vrot.slane %v2244_v47, 4  ;;  %v1834_v25 = vrot.slane %v1832_v37, 5  ;;  %v6009_v47 = vld [vmem:[%s5654_s20 + $0x48] sm:$0xf] }
  0x51   : > { %4786 = vmatprep.subr.bf16.mxu1 %v5961_v20  ;;  %v2564_v57 = vshrl.u32 %v6009_v47, 16  ;;  %v2567_v11 = vshll.u32 %v6009_v47, 16  ;;  %v1843_v0 = vor.u32 %v1842_v1, %v1839_v22  ;;  %v4316_v23 = vrot.slane %v5745_v28, 9 }
  0x52   : > { %v6013_v56 = vsel %vm5636_vm2, %v1858_v29, %v1862_v62  ;;  %v6017_v19 = vsel %vm5636_vm2, %v2245_v5, %v2249_v60  ;;  %v6032_v39 = vsel %vm5787_vm6, %v4315_v16, %v848_v6  ;;  %v1830_v29 = vrot.slane %v1829_v7, 4  ;;  %v5353_v60 = vld [vmem:[%s6846_s3 + $0x38] sm:$0xff]  }
  0x53   : > { %4771 = vmatmul.mubr.msk.bf16.gmra.mrb[4].mxu1 %vm628_vm3, %v5969_v17  ;;  %6895 = vst [vmem:[#allocation15_spill] sm:$0xff] %v6013_v56  ;;  %6896 = vst [vmem:[#allocation16_spill] sm:$0xff] %v6017_v19  ;;  %v6056_v62 = vcombine.low %v6028_v24, %v6032_v39  ;;  %v2566_v15 = vrot.slane %v2564_v57, 4  ;;  %v2569_v21 = vrot.slane %v2567_v11, 5  ;;  %v6063_v16 = vcombine.low %v5742_v27, %v5752_v33 }
  0x54   : > { %4778 = vmatprep.mubr.msk.bf16.mxu1 %vm628_vm3, %v4318_v59  ;;  %v4450_v59 = vcombine.low %v5840_v38, %v6009_v47  ;;  %v1844_v38 = vrot.slane %v1843_v0, 4  ;;  %v1848_v6 = vrot.slane %v1846_v61, 5  ;;  %v6079_v27 = vsel %vm5787_vm6, %v4317_v9, %v856_v42  ;;  %v5358_v61 = vld [vmem:[%s6846_s3 + $0x118] sm:$0xff]   ;;  %v6133_v42 = vld [vmem:[%s6846_s3 + $0x120] sm:$0xff]  }
  0x55   : > { %4935 = vmatmul.mubr.msk.bf16.vlgmr.msra.gmra.mrb[0].mxu0 %vm628_vm3, %v5973_v36  ;;  %6897 = vst [vmem:[#allocation17_spill] sm:$0xff] %v6056_v62  ;;  %6898 = vst [vmem:[#allocation18_spill] sm:$0xff] %v6063_v16  ;;  %v6083_v33 = vsel %vm5636_vm2, %v1830_v29, %v1834_v25  ;;  %v2570_v22 = vor.u32 %v2569_v21, %v2566_v15  ;;  %v2573_v1 = vshll.u32 %v6066_v44, 16  ;;  %v6136_v29 = vld [vmem:[%s5588_s24 + $0x44] sm:$0x1]  ;;  %v5361_v21 = vld [vmem:[%s6846_s3 + $0x48] sm:$0xff]  }
  0x56   : > { %4943 = vmatpush3.bf16.msra.mxu0 %v5910_v2  ;;  %4938 = vmatprep.mubr.msk.bf16.mxu0 %vm628_vm3, %v5981_v52  ;;  %v5354_v2 = vld [vmem:[%s6846_s3 + $0x110] sm:$0xff]   ;;  %6899 = vst [vmem:[#allocation19_spill] sm:$0xff] %v6083_v33  ;;  %v6095_v5 = vsel %vm5636_vm2, %v1844_v38, %v1848_v6  ;;  %v6104_v7 = vcombine.low %v5770_v58, %v6083_v33  ;;  %v1088_v38 = vshll.u32 %v6136_v29, 16  ;;  %v6153_v6 = vld [vmem:[%s6141_s27] sm:$0xf] }
  0x57   : > { %4944 = vmatprep.subr.bf16.mxu0 %v5351_v35  ;;  %6900 = vst [vmem:[#allocation20_spill] sm:$0xff] %v6095_v5  ;;  %v6108_v57 = vcombine.low %v6095_v5, %v6013_v56  ;;  %v2571_v11 = vrot.slane %v2570_v22, 4  ;;  %v2575_v0 = vrot.slane %v2573_v1, 5  ;;  %v4330_v15 = vcombine.low %v5733_v18, %v5745_v28  ;;  %v6165_v22 = vld [vmem:[%s6141_s27 + $0x8] sm:$0xf] }
  0x58   : > { %6902 = vst [vmem:[#allocation22_spill] sm:$0xff] %v6104_v7  ;;  %v2915_v18 = vshll.u32 %v6153_v6, 16  ;;  %v6168_v1 = vld [vmem:[%s6141_s27 + $0x4] sm:$0x1]  ;;  %v6290_v52 = vld [vmem:[%s6141_s27 + $0x4c] sm:$0x1] }
  0x59   : > { %6903 = vst [vmem:[#allocation23_spill] sm:$0xff] %v6108_v57  ;;  %v2576_v9 = vsel %vm5636_vm2, %v2571_v11, %v2575_v0  ;;  %v2674_v11 = vrot.slane %v6066_v44, 5  ;;  %v6179_v0 = vld [vmem:[%s6141_s27 + $0x38] sm:$0xf] }
  0x5a   : > { %4945 = vmatpush3.bf16.msra.mxu0 %v5351_v35  ;;  %v6075_v35 = vsel %vm5787_vm6, %v4316_v23, %v852_v14  ;;  %v6114_v23 = vld [vmem:[%s5588_s24 + $0x40] sm:$0xf] }
  0x5b   : > { %4954 = vmatprep.subr.bf16.mxu0 %v5354_v2  ;;  %4779 = vmatmul.mubr.msk.bf16.vlgmr.msra.gmra.mrb[0].mxu1 %vm628_vm3, %v6046_v55  ;;  %v6099_v25 = vcombine.low %v6075_v35, %v6079_v27  ;;  %v1079_v58 = vshrl.u32 %v6114_v23, 16  ;;  %v1082_v14 = vshll.u32 %v6114_v23, 16  ;;  %v4331_v44 = vcombine.low %v5759_v40, %v6114_v23 }
  0x5c   : > { %4787 = vmatpush3.bf16.msra.mxu1 %v5961_v20  ;;  %4782 = vmatprep.mubr.msk.bf16.mxu1 %vm628_vm3, %v6056_v62  ;;  %v5357_v20 = vld [vmem:[%s6846_s3 + $0x40] sm:$0xff]   ;;  %v3013_v40 = vshll.u32 %v6179_v0, 16 }
  0x5d   : > { %4939 = vmatmul.mubr.msk.bf16.gmra.mrb[4].mxu0 %vm628_vm3, %v4450_v59  ;;  %4788 = vmatprep.subr.bf16.mxu1 %v5353_v60  ;;  %6901 = vst [vmem:[#allocation21_spill] sm:$0xff] %v6099_v25  ;;  %v6904_v59 = vcombine.low %v5602_v8, %v5608_v10  ;;  %v4329_v8 = vcombine.low %v5616_v13, %v5643_v45  ;;  %v1081_v10 = vrot.slane %v1079_v58, 4  ;;  %v2912_v45 = vshrl.u32 %v6153_v6, 16 }
  0x5e   : > { %4946 = vmatprep.mubr.msk.bf16.mxu0 %vm628_vm3, %v6063_v16  ;;  %v6157_v13 = vcombine.low %v5820_v48, %v5824_v53  ;;  %v6174_v48 = vld [vmem:[%s6846_s3 + $0x50] sm:$0xff]   ;;  %v4464_v53 = vrot.slane %v6009_v47, 9  ;;  %v2929_v47 = vshll.u32 %v6165_v22, 16 }
  0x5f   : > { %v2914_v58 = vrot.slane %v2912_v45, 4  ;;  %v6209_v45 = vcombine.low %v5878_v46, %v5900_v31 }
  0x60   : > { %4789 = vmatpush3.bf16.msra.mxu1 %v5353_v60  ;;  %v4457_v60 = vcombine.low %v6017_v19, %v2576_v9  ;;  %6905 = vst [vmem:[#allocation24_spill] sm:$0xff] %v6157_v13  ;;  %v2931_v37 = vrot.slane %v2929_v47, 5  ;;  %v6910_v47 = vld [vmem:[#allocation8_spill] sm:$0xff] }
  0x61   : > { %4798 = vmatprep.subr.bf16.mxu1 %v5357_v20  ;;  %6907 = vst [vmem:[#allocation26_spill] sm:$0xff] %v6209_v45 }
  0x63   : > { %4783 = vmatmul.mubr.msk.bf16.gmra.mrb[4].mxu1 %vm628_vm3, %v6099_v25 }
  0x64   : > { %4790 = vmatprep.mubr.msk.bf16.mxu1 %vm628_vm3, %v6904_v59  ;;  %v2926_v59 = vshrl.u32 %v6165_v22, 16 }
  0x65   : > { %4947 = vmatmul.mubr.msk.bf16.vlgmr.msra.gmra.mrb[0].mxu0 %vm628_vm3, %v6104_v7 }
  0x66   : > { %4955 = vmatpush3.bf16.msra.mxu0 %v5354_v2  ;;  %4950 = vmatprep.mubr.msk.bf16.mxu0 %vm628_vm3, %v6108_v57  ;;  %v1084_v2 = vrot.slane %v1082_v14, 5  ;;  %v2917_v14 = vrot.slane %v2915_v18, 5  ;;  %v2675_v18 = vsel %vm5787_vm6, %v4464_v53, %v2674_v11  ;;  %v6239_v53 = vld [vmem:[%s6846_s3 + $0x130] sm:$0xff]  }
  0x67   : > { %4956 = vmatprep.subr.bf16.mxu0 %v5358_v61 }
  0x68   : > { %v1085_v28 = vor.u32 %v1084_v2, %v1081_v10  ;;  %v6193_v10 = vcombine.low %v5858_v32, %v5870_v43  ;;  %v5364_v2 = vld [vmem:[%s6846_s3 + $0x128] sm:$0xff]   ;;  %v6212_v32 = vld [vmem:[%s6141_s27 + $0x20] sm:$0xf]  ;;  %v2918_v46 = vor.u32 %v2917_v14, %v2914_v58  ;;  %v3015_v14 = vrot.slane %v3013_v40, 5 }
  0x69   : > { %v6215_v43 = vld [vmem:[%s6141_s27 + $0x28] sm:$0xf] }
  0x6a   : > { %4957 = vmatpush3.bf16.msra.mxu0 %v5358_v61  ;;  %v6184_v61 = vld [vmem:[%s6141_s27 + $0xc] sm:$0x1]  ;;  %v1086_v9 = vrot.slane %v1085_v28, 4  ;;  %6906 = vst [vmem:[#allocation25_spill] sm:$0xff] %v6193_v10  ;;  %v2928_v28 = vrot.slane %v2926_v59, 4 }
  0x6b   : > { %4966 = vmatprep.subr.bf16.mxu0 %v6133_v42  ;;  %4791 = vmatmul.mubr.msk.bf16.vlgmr.msra.gmra.mrb[0].mxu1 %vm628_vm3, %v4329_v8  ;;  %v2921_v8 = vshll.u32 %v6168_v1, 16  ;;  %v2935_v31 = vshll.u32 %v6184_v61, 16  ;;  %v2787_v59 = vld [vmem:[%s6141_s27 + $0x44] sm:$0x1] }
  0x6c   : > { %4799 = vmatpush3.bf16.msra.mxu1 %v5357_v20  ;;  %4794 = vmatprep.mubr.msk.bf16.mxu1 %vm628_vm3, %v4330_v15  ;;  %v1090_v20 = vrot.slane %v1088_v38, 5  ;;  %v6202_v15 = vld [vmem:[%s6141_s27 + $0x18] sm:$0xf]  ;;  %v3010_v38 = vshrl.u32 %v6179_v0, 16  ;;  %v3519_v25 = vrot.slane %v2787_v59, 5 }
  0x6d   : > { %4951 = vmatmul.mubr.msk.bf16.gmra.mrb[4].mxu0 %vm628_vm3, %v4457_v60  ;;  %4800 = vmatprep.subr.bf16.mxu1 %v5361_v21  ;;  %v6199_v60 = vld [vmem:[%s6141_s27 + $0x10] sm:$0xf]  ;;  %v6241_v11 = vrot.slane %v2921_v8, 5  ;;  %v2932_v8 = vor.u32 %v2931_v37, %v2928_v28  ;;  %v6265_v40 = vrot.slane %v2935_v31, 5  ;;  %v2957_v33 = vshll.u32 %v6202_v15, 16 }
  0x6e   : > { %4958 = vmatprep.mubr.msk.bf16.mxu0 %vm628_vm3, %v6157_v13  ;;  %v6224_v19 = vsel %vm5636_vm2, %v1086_v9, %v1090_v20  ;;  %v2940_v56 = vshrl.u32 %v6199_v60, 16  ;;  %v2785_v20 = vld [vmem:[%s6141_s27 + $0x3c] sm:$0x1]  ;;  %v3012_v58 = vrot.slane %v3010_v38, 4  ;;  %v6261_v9 = vcombine.low %v6212_v32, %v6215_v43  ;;  %v6276_v37 = vld [vmem:[%s6141_s27 + $0x40] sm:$0xf] }
  0x6f   : > { %v6263_v38 = vrot.slane %v2918_v46, 4  ;;  %v2968_v28 = vshrl.u32 %v6212_v32, 16  ;;  %v3400_v46 = vshll.u32 %v6276_v37, 16  ;;  %v3406_v31 = vshll.u32 %v2787_v59, 16 }
  0x70   : > { %4801 = vmatpush3.bf16.msra.mxu1 %v5361_v21  ;;  %v4339_v21 = vcombine.low %v5664_v54, %v5780_v51  ;;  %v6908_v54 = vcombine.low %v5649_v49, %v5658_v50  ;;  %v4340_v51 = vcombine.low %v5834_v63, %v5851_v26  ;;  %v6909_v49 = vld [vmem:[#allocation10_spill] sm:$0xff]  ;;  %v4472_v63 = vcombine.low %v6153_v6, %v6165_v22 }
  0x71   : > { %4810 = vmatprep.subr.bf16.mxu1 %v6174_v48  ;;  %v4465_v50 = vcombine.low %v6909_v49, %v2675_v18  ;;  %v6252_v26 = vcombine.low %v6199_v60, %v6202_v15  ;;  %v6267_v18 = vrot.slane %v2940_v56, 4  ;;  %v5365_v49 = vld [vmem:[%s6846_s3 + $0x58] sm:$0xff]   ;;  %v3016_v5 = vor.u32 %v3015_v14, %v3012_v58  ;;  %6911 = vst [vmem:[#allocation10_spill] sm:$0xff] %v6276_v37 }
  0x72   : > { %v3397_v56 = vshrl.u32 %v6276_v37, 16  ;;  %v2971_v13 = vshll.u32 %v6212_v32, 16  ;;  %v4499_v58 = vrot.slane %v6179_v0, 9  ;;  %v3174_v14 = vrot.slane %v2785_v20, 5 }
  0x73   : > { %4795 = vmatmul.mubr.msk.bf16.gmra.mrb[4].mxu1 %vm628_vm3, %v4331_v44  ;;  %v2943_v44 = vshll.u32 %v6199_v60, 16  ;;  %v3402_v16 = vrot.slane %v3400_v46, 5  ;;  %v3017_v36 = vrot.slane %v3016_v5, 4  ;;  %v2985_v59 = vshll.u32 %v6215_v43, 16 }
  0x74   : > { %4802 = vmatprep.mubr.msk.bf16.mxu1 %vm628_vm3, %v6908_v54  ;;  %v3019_v54 = vshll.u32 %v2785_v20, 16  ;;  %v3399_v7 = vrot.slane %v3397_v56, 4  ;;  %v6319_v20 = vld [vmem:[%s6141_s27 + $0x14] sm:$0x1] }
  0x75   : > { %4959 = vmatmul.mubr.msk.bf16.vlgmr.msra.gmra.mrb[0].mxu0 %vm628_vm3, %v6193_v10  ;;  %v2933_v10 = vrot.slane %v2932_v8, 4  ;;  %v4530_v8 = vrot.slane %v6276_v37, 9  ;;  %v2959_v37 = vrot.slane %v2957_v33, 5  ;;  %v5371_v33 = vld [vmem:[%s6846_s3 + $0x138] sm:$0xff]  }
  0x76   : > { %4967 = vmatpush3.bf16.msra.mxu0 %v6133_v42  ;;  %4962 = vmatprep.mubr.msk.bf16.mxu0 %vm628_vm3, %v6209_v45  ;;  %v2954_v42 = vshrl.u32 %v6202_v15, 16  ;;  %v6282_v45 = vld [vmem:[%s6141_s27 + $0x48] sm:$0xf]  ;;  %v3021_v57 = vrot.slane %v3019_v54, 5  ;;  %v3403_v54 = vor.u32 %v3402_v16, %v3399_v7  ;;  %v3732_v16 = vshll.u32 %v6290_v52, 16 }
  0x77   : > { %4968 = vmatprep.subr.bf16.mxu0 %v5364_v2  ;;  %v3726_v5 = vshll.u32 %v6282_v45, 16  ;;  %v6313_v56 = vsel %vm5787_vm6, %v4530_v8, %v3519_v25  ;;  %v2945_v7 = vrot.slane %v2943_v44, 5  ;;  %v6323_v25 = vld [vmem:[%s6141_s27 + $0x1c] sm:$0x1]  ;;  %v2973_v8 = vrot.slane %v2971_v13, 5 }
  0x78   : > { %v3404_v46 = vrot.slane %v3403_v54, 4  ;;  %v2956_v62 = vrot.slane %v2954_v42, 4  ;;  %v6327_v54 = vsel %vm5636_vm2, %v3017_v36, %v3021_v57  ;;  %v6337_v42 = vld [vmem:[%s6141_s27 + $0x24] sm:$0x1]  ;;  %v4350_v36 = vcombine.low %v6003_v30, %v6028_v24  ;;  %v6362_v24 = vld [vmem:[%s6141_s27 + $0x30] sm:$0xf] }
  0x79   : > { %v6912_v57 = vcombine.low %v6910_v47, %v6224_v19  ;;  %v6913_v30 = vcombine.low %v5947_v41, %v5997_v4  ;;  %v6367_v47 = vsel %vm5636_vm2, %v2933_v10, %v6265_v40  ;;  %v2977_v4 = vshll.u32 %v6337_v42, 16  ;;  %v5374_v10 = vld [vmem:[%s6846_s3 + $0x140] sm:$0xff]  }
  0x7a   : > { %4969 = vmatpush3.bf16.msra.mxu0 %v5364_v2  ;;  %v2982_v2 = vshrl.u32 %v6215_v43, 16  ;;  %v2960_v41 = vor.u32 %v2959_v37, %v2956_v62  ;;  %v6385_v62 = vcombine.low %v6362_v24, %v6179_v0  ;;  %v4351_v37 = vcombine.low %v6032_v39, %v6075_v35 }
  0x7b   : > { %4978 = vmatprep.subr.bf16.mxu0 %v6239_v53  ;;  %4803 = vmatmul.mubr.msk.bf16.vlgmr.msra.gmra.mrb[0].mxu1 %vm628_vm3, %v4339_v21  ;;  %v6301_v21 = vld [vmem:[%s6846_s3 + $0x60] sm:$0xff]   ;;  %v4512_v34 = vcombine.low %v6215_v43, %v6362_v24 }
  0x7c   : > { %4811 = vmatpush3.bf16.msra.mxu1 %v6174_v48  ;;  %4806 = vmatprep.mubr.msk.bf16.mxu1 %vm628_vm3, %v4340_v51  ;;  %v3408_v48 = vrot.slane %v3406_v31, 5  ;;  %v6309_v51 = vsel %vm5787_vm6, %v4499_v58, %v3174_v14  ;;  %v2970_v58 = vrot.slane %v2968_v28, 4  ;;  %v3728_v14 = vrot.slane %v3726_v5, 5 }
  0x7d   : > { %4963 = vmatmul.mubr.msk.bf16.gmra.mrb[4].mxu0 %vm628_vm3, %v4465_v50  ;;  %4812 = vmatprep.subr.bf16.mxu1 %v5365_v49  ;;  %v3723_v50 = vshrl.u32 %v6282_v45, 16  ;;  %v2984_v44 = vrot.slane %v2982_v2, 4  ;;  %v2987_v28 = vrot.slane %v2985_v59, 5  ;;  %v2949_v5 = vshll.u32 %v6319_v20, 16  ;;  %v6353_v59 = vld [vmem:[%s6141_s27 + $0x2c] sm:$0x1] }
  0x7e   : > { %4970 = vmatprep.mubr.msk.bf16.mxu0 %vm628_vm3, %v4472_v63  ;;  %v2974_v40 = vor.u32 %v2973_v8, %v2970_v58  ;;  %v1201_v58 = vrot.slane %v6136_v29, 5  ;;  %v4555_v29 = vrot.slane %v6282_v45, 9 }
  0x7f   : > { %v3725_v63 = vrot.slane %v3723_v50, 4  ;;  %v3734_v50 = vrot.slane %v3732_v16, 5 }
  0x80   : > { %4813 = vmatpush3.bf16.msra.mxu1 %v5365_v49  ;;  %v6331_v49 = vsel %vm5636_vm2, %v3404_v46, %v3408_v48  ;;  %v2924_v48 = vsel %vm5636_vm2, %v6263_v38, %v6241_v11  ;;  %v2946_v11 = vor.u32 %v2945_v7, %v6267_v18  ;;  %v2963_v38 = vshll.u32 %v6323_v25, 16 }
  0x81   : > { %4822 = vmatprep.subr.bf16.mxu1 %v6301_v21  ;;  %v3729_v2 = vor.u32 %v3728_v14, %v3725_v63  ;;  %v2996_v46 = vshrl.u32 %v6362_v24, 16  ;;  %v2999_v63 = vshll.u32 %v6362_v24, 16  ;;  %v2988_v18 = vor.u32 %v2987_v28, %v2984_v44 }
  0x82   : > { %v2991_v7 = vshll.u32 %v6353_v59, 16  ;;  %v4348_v14 = vrot.slane %v6114_v23, 9  ;;  %v2947_v8 = vrot.slane %v2946_v11, 4  ;;  %v2951_v44 = vrot.slane %v2949_v5, 5 }
  0x83   : > { %4807 = vmatmul.mubr.msk.bf16.gmra.mrb[4].mxu1 %vm628_vm3, %v6912_v57  ;;  %v3730_v16 = vrot.slane %v3729_v2, 4  ;;  %v2965_v28 = vrot.slane %v2963_v38, 5  ;;  %v4482_v57 = vcombine.low %v2924_v48, %v6367_v47  ;;  %v2998_v39 = vrot.slane %v2996_v46, 4 }
  0x84   : > { %4814 = vmatprep.mubr.msk.bf16.mxu1 %vm628_vm3, %v6913_v30  ;;  %v2961_v30 = vrot.slane %v2960_v41, 4  ;;  %v3001_v35 = vrot.slane %v2999_v63, 5  ;;  %v2989_v31 = vrot.slane %v2988_v18, 4  ;;  %v2993_v13 = vrot.slane %v2991_v7, 5 }
  0x85   : > { %4971 = vmatmul.mubr.msk.bf16.vlgmr.msra.gmra.mrb[0].mxu0 %vm628_vm3, %v6252_v26  ;;  %v6409_v48 = vsel %vm5787_vm6, %v4348_v14, %v1201_v58  ;;  %v6413_v5 = vsel %vm5636_vm2, %v2947_v8, %v2951_v44  ;;  %v4493_v14 = vrot.slane %v6165_v22, 9  ;;  %v3150_v58 = vrot.slane %v6184_v61, 5  ;;  %v6915_v8 = vld [vmem:[#allocation11_spill] sm:$0xff] }
  0x86   : > { %4979 = vmatpush3.bf16.msra.mxu0 %v6239_v53  ;;  %4974 = vmatprep.mubr.msk.bf16.mxu0 %vm628_vm3, %v6261_v9  ;;  %v3735_v53 = vsel %vm5636_vm2, %v3730_v16, %v3734_v50  ;;  %v5373_v50 = vld [vmem:[%s6846_s3 + $0x68] sm:$0xff]   ;;  %v2975_v16 = vrot.slane %v2974_v40, 4  ;;  %v4352_v63 = vcombine.low %v6079_v27, %v6409_v48  ;;  %v3146_v27 = vrot.slane %v6168_v1, 5 }
  0x87   : > { %4980 = vmatprep.subr.bf16.mxu0 %v5371_v33  ;;  %v6391_v2 = vcombine.low %v6331_v49, %v3735_v53  ;;  %v2979_v53 = vrot.slane %v2977_v4, 5  ;;  %v6435_v4 = vsel %vm5636_vm2, %v2989_v31, %v2993_v13  ;;  %v5376_v31 = vld [vmem:[%s6846_s3 + $0x148] sm:$0xff]   ;;  %v4492_v13 = vrot.slane %v6153_v6, 9 }
  0x88   : > { %v6471_v61 = vsel %vm5787_vm6, %v4493_v14, %v3150_v58  ;;  %v480_v14 = vld [vmem:[%s5588_s24 + $0x4c] sm:$0x1]  ;;  %v6916_v58 = vld [vmem:[#allocation4_spill] sm:$0xff] }
  0x89   : > { %6914 = vst [vmem:[#allocation8_spill] sm:$0xff] %v6391_v2  ;;  %v6399_v2 = vld [vmem:[%s6141_s27 + $0x34] sm:$0x1]  ;;  %v6431_v41 = vsel %vm5636_vm2, %v2975_v16, %v2979_v53  ;;  %v3147_v1 = vsel %vm5787_vm6, %v4492_v13, %v3146_v27  ;;  %v4496_v16 = vrot.slane %v6212_v32, 9  ;;  %v3162_v53 = vrot.slane %v6337_v42, 5 }
  0x8a   : > { %4981 = vmatpush3.bf16.msra.mxu0 %v5371_v33  ;;  %v3833_v33 = vrot.slane %v6290_v52, 5  ;;  %v5375_v52 = vld [vmem:[%s6846_s3 + $0x70] sm:$0xff]   ;;  %v3005_v11 = vshll.u32 %v6399_v2, 16  ;;  %v6447_v18 = vcombine.low %v6431_v41, %v6435_v4  ;;  %v4498_v13 = vrot.slane %v6362_v24, 9 }
  0x8b   : > { %4990 = vmatprep.subr.bf16.mxu0 %v5374_v10  ;;  %4815 = vmatmul.mubr.msk.bf16.vlgmr.msra.gmra.mrb[0].mxu1 %vm628_vm3, %v4350_v36  ;;  %v6418_v36 = vsel %vm5636_vm2, %v2961_v30, %v2965_v28  ;;  %v4494_v28 = vrot.slane %v6199_v60, 9  ;;  %v3154_v30 = vrot.slane %v6319_v20, 5  ;;  %v3170_v27 = vrot.slane %v6399_v2, 5 }
  0x8c   : > { %4823 = vmatpush3.bf16.msra.mxu1 %v6301_v21  ;;  %4818 = vmatprep.mubr.msk.bf16.mxu1 %vm628_vm3, %v4351_v37  ;;  %v3002_v21 = vor.u32 %v3001_v35, %v2998_v39  ;;  %v6426_v38 = vsel %vm5787_vm6, %v4555_v29, %v3833_v33  ;;  %v6443_v40 = vcombine.low %v6413_v5, %v6418_v36  ;;  %v3007_v37 = vrot.slane %v3005_v11, 5 }
  0x8d   : > { %4975 = vmatmul.mubr.msk.bf16.gmra.mrb[4].mxu0 %vm628_vm3, %v6385_v62  ;;  %4824 = vmatprep.subr.bf16.mxu1 %v5373_v50  ;;  %v4556_v46 = vcombine.low %v6313_v56, %v6426_v38  ;;  %v4495_v39 = vrot.slane %v6202_v15, 9  ;;  %v3158_v35 = vrot.slane %v6323_v25, 5  ;;  %v4497_v29 = vrot.slane %v6215_v43, 9 }
  0x8e   : > { %4982 = vmatprep.mubr.msk.bf16.mxu0 %vm628_vm3, %v4482_v57  ;;  %v3003_v7 = vrot.slane %v3002_v21, 4  ;;  %v4500_v57 = vcombine.low %v3147_v1, %v6471_v61  ;;  %v3166_v33 = vrot.slane %v6353_v59, 5  ;;  %v6495_v21 = vld [vmem:[%s5588_s24 + $0x48] sm:$0xf]  ;;  %v6505_v42 = vsel %vm5787_vm6, %v4494_v28, %v3154_v30  ;;  %v5380_v59 = vld [vmem:[%s6846_s3 + $0x80] sm:$0xff]  }
  0x8f   : > { %v1405_v20 = vshrl.u32 %v6495_v21, 16  ;;  %v1408_v25 = vshll.u32 %v6495_v21, 16  ;;  %v4359_v11 = vcombine.low %v6114_v23, %v6495_v21  ;;  %v5381_v23 = vld [vmem:[%s6846_s3 + $0x158] sm:$0xff]   ;;  %v1414_v1 = vshll.u32 %v480_v14, 16  ;;  %v5384_v28 = vld [vmem:[%s6846_s3 + $0x160] sm:$0xff]  }
  0x90   : > { %4825 = vmatpush3.bf16.msra.mxu1 %v5373_v50  ;;  %v6465_v6 = vsel %vm5636_vm2, %v3003_v7, %v3007_v37  ;;  %v5378_v50 = vld [vmem:[%s6846_s3 + $0x78] sm:$0xff]   ;;  %v6548_v2 = vsel %vm5787_vm6, %v4498_v13, %v3170_v27  ;;  %v4373_v43 = vrot.slane %v6495_v21, 9  ;;  %v1515_v24 = vrot.slane %v480_v14, 5  ;;  %v6921_v21 = vld [vmem:[#allocation21_spill] sm:$0xff] }
  0x91   : > { %4834 = vmatprep.subr.bf16.mxu1 %v5375_v52  ;;  %v6478_v44 = vcombine.low %v6465_v6, %v6327_v54  ;;  %v1407_v7 = vrot.slane %v1405_v20, 4  ;;  %v1410_v37 = vrot.slane %v1408_v25, 5  ;;  %v1416_v30 = vrot.slane %v1414_v1, 5  ;;  %v6920_v25 = vld [vmem:[#allocation17_spill] sm:$0xff]  ;;  %v5394_v27 = vld [vmem:[%s6846_s3 + $0x178] sm:$0xff]  }
  0x92   : > { %v4520_v20 = vcombine.low %v6367_v47, %v6413_v5  ;;  %v4521_v5 = vcombine.low %v6418_v36, %v6431_v41  ;;  %v4522_v13 = vcombine.low %v6435_v4, %v6465_v6  ;;  %v5395_v36 = vld [vmem:[%s6846_s3 + $0xa8] sm:$0xff]   ;;  %v4531_v41 = vcombine.low %v6471_v61, %v6505_v42 }
  0x93   : > { %4819 = vmatmul.mubr.msk.bf16.gmra.mrb[4].mxu1 %vm628_vm3, %v4352_v63  ;;  %v6922_v4 = vld [vmem:[#allocation12_spill] sm:$0xff]  ;;  %v6923_v6 = vcombine.low %v6327_v54, %v6331_v49  ;;  %v6924_v14 = vld [vmem:[#allocation13_spill] sm:$0xff] }
  0x94   : > { %4826 = vmatprep.mubr.msk.bf16.mxu1 %vm628_vm3, %v6915_v8  ;;  %v1411_v8 = vor.u32 %v1410_v37, %v1407_v7  ;;  %v5412_v7 = vld [vmem:[%s5654_s20] sm:$0xf]  ;;  %v5398_v49 = vld [vmem:[%s6846_s3 + $0x188] sm:$0xff]  }
  0x95   : > { %4983 = vmatmul.mubr.msk.bf16.vlgmr.msra.gmra.mrb[0].mxu0 %vm628_vm3, %v6443_v40  ;;  %v4401_v1 = vrot.slane %v5412_v7, 9 }
  0x96   : > { %4991 = vmatpush3.bf16.msra.mxu0 %v5374_v10  ;;  %4986 = vmatprep.mubr.msk.bf16.mxu0 %vm628_vm3, %v6447_v18  ;;  %v5379_v10 = vld [vmem:[%s6846_s3 + $0x150] sm:$0xff]  }
  0x97   : > { %4992 = vmatprep.subr.bf16.mxu0 %v5376_v31 }
  0x9a   : > { %4993 = vmatpush3.bf16.msra.mxu0 %v5376_v31 }
  0x9b   : > { %5002 = vmatprep.subr.bf16.mxu0 %v5379_v10  ;;  %4827 = vmatmul.mubr.msk.bf16.vlgmr.msra.gmra.mrb[0].mxu1 %vm628_vm3, %v5928_v12  ;;  %v6509_v12 = vsel %vm5787_vm6, %v4495_v39, %v3158_v35  ;;  %v4510_v39 = vcombine.low %v6165_v22, %v6199_v60  ;;  %v6917_v35 = vld [vmem:[#allocation7_spill] sm:$0xff]  ;;  %v4511_v60 = vcombine.low %v6202_v15, %v6212_v32  ;;  %v6919_v15 = vld [vmem:[#allocation10_spill] sm:$0xff] }
  0x9c   : > { %4835 = vmatpush3.bf16.msra.mxu1 %v5375_v52  ;;  %4830 = vmatprep.mubr.msk.bf16.mxu1 %vm628_vm3, %v5969_v17  ;;  %v6517_v52 = vsel %vm5787_vm6, %v4496_v16, %v3162_v53  ;;  %v6521_v17 = vsel %vm5787_vm6, %v4497_v29, %v3166_v33  ;;  %v6527_v63 = vcombine.low %v6505_v42, %v6509_v12  ;;  %v6918_v53 = vld [vmem:[#allocation9_spill] sm:$0xff]  ;;  %v6925_v42 = vld [vmem:[#allocation14_spill] sm:$0xff] }
  0x9d   : > { %4987 = vmatmul.mubr.msk.bf16.gmra.mrb[4].mxu0 %vm628_vm3, %v6478_v44  ;;  %4836 = vmatprep.subr.bf16.mxu1 %v5378_v50  ;;  %v6531_v31 = vcombine.low %v6517_v52, %v6521_v17  ;;  %v5386_v29 = vld [vmem:[%s6846_s3 + $0x90] sm:$0xff]   ;;  %v5388_v33 = vld [vmem:[%s6846_s3 + $0x168] sm:$0xff]   ;;  %v4513_v32 = vcombine.low %v6179_v0, %v6919_v15  ;;  %v1516_v0 = vsel %vm5787_vm6, %v4373_v43, %v1515_v24  ;;  %v5421_v24 = vld [vmem:[%s5654_s20 + $0x38] sm:$0xf] }
  0x9e   : > { %4994 = vmatprep.mubr.msk.bf16.mxu0 %vm628_vm3, %v4500_v57  ;;  %v1412_v57 = vrot.slane %v1411_v8, 4  ;;  %v4374_v47 = vcombine.low %v6409_v48, %v1516_v0  ;;  %v5396_v48 = vld [vmem:[%s6846_s3 + $0x180] sm:$0xff]   ;;  %v4532_v61 = vcombine.low %v6509_v12, %v6517_v52  ;;  %v4533_v54 = vcombine.low %v6521_v17, %v6548_v2  ;;  %v5400_v12 = vld [vmem:[%s6846_s3 + $0x190] sm:$0xff]   ;;  %v5399_v8 = vld [vmem:[%s6846_s3 + $0xb8] sm:$0xff]  }
  0x9f   : > { %v5413_v52 = vld [vmem:[%s5654_s20 + $0x4] sm:$0x1]  ;;  %v6938_v0 = vld [vmem:[#allocation19_spill] sm:$0xff] }
  0xa0   : > { %4837 = vmatpush3.bf16.msra.mxu1 %v5378_v50  ;;  %v6555_v50 = vcombine.low %v6548_v2, %v6309_v51  ;;  %v1417_v16 = vsel %vm5636_vm2, %v1412_v57, %v1416_v30  ;;  %v1987_v17 = vrot.slane %v5413_v52, 5  ;;  %v6927_v2 = vld [vmem:[#allocation18_spill] sm:$0xff] }
  0xa1   : > { %4846 = vmatprep.subr.bf16.mxu1 %v5380_v59  ;;  %v4366_v22 = vcombine.low %v6224_v19, %v1417_v16  ;;  %v5391_v19 = vld [vmem:[%s6846_s3 + $0x170] sm:$0xff]   ;;  %v6931_v16 = vld [vmem:[#allocation23_spill] sm:$0xff] }
  0xa2   : > { %v6929_v57 = vld [vmem:[#allocation22_spill] sm:$0xff]  ;;  %v1988_v30 = vsel %vm5787_vm6, %v4401_v1, %v1987_v17 }
  0xa3   : > { %4831 = vmatmul.mubr.msk.bf16.gmra.mrb[4].mxu1 %vm628_vm3, %v4359_v11  ;;  %v6613_v11 = vld [vmem:[%s5654_s20 + $0x8] sm:$0xf] }
  0xa4   : > { %4838 = vmatprep.mubr.msk.bf16.mxu1 %vm628_vm3, %v6916_v58  ;;  %v4381_v37 = vcombine.low %v5412_v7, %v6613_v11  ;;  %v6926_v58 = vld [vmem:[#allocation5_spill] sm:$0xff] }
  0xa5   : > { %4995 = vmatmul.mubr.msk.bf16.vlgmr.msra.gmra.mrb[0].mxu0 %vm628_vm3, %v6527_v63 }
  0xa6   : > { %5003 = vmatpush3.bf16.msra.mxu0 %v5379_v10  ;;  %4998 = vmatprep.mubr.msk.bf16.mxu0 %vm628_vm3, %v6531_v31  ;;  %v5382_v10 = vld [vmem:[%s6846_s3 + $0x88] sm:$0xff]  }
  0xa7   : > { %5004 = vmatprep.subr.bf16.mxu0 %v5381_v23 }
  0xaa   : > { %5005 = vmatpush3.bf16.msra.mxu0 %v5381_v23  ;;  %v5397_v23 = vld [vmem:[%s6846_s3 + $0xb0] sm:$0xff]  }
  0xab   : > { %5014 = vmatprep.subr.bf16.mxu0 %v5384_v28  ;;  %4839 = vmatmul.mubr.msk.bf16.vlgmr.msra.gmra.mrb[0].mxu1 %vm628_vm3, %v6917_v35 }
  0xac   : > { %4847 = vmatpush3.bf16.msra.mxu1 %v5380_v59  ;;  %4842 = vmatprep.mubr.msk.bf16.mxu1 %vm628_vm3, %v6918_v53  ;;  %v5393_v59 = vld [vmem:[%s6846_s3 + $0xa0] sm:$0xff]  }
  0xad   : > { %4999 = vmatmul.mubr.msk.bf16.gmra.mrb[4].mxu0 %vm628_vm3, %v6555_v50  ;;  %4848 = vmatprep.subr.bf16.mxu1 %v5382_v10  ;;  %v6932_v53 = vld [vmem:[#allocation24_spill] sm:$0xff] }
  0xae   : > { %5006 = vmatprep.mubr.msk.bf16.mxu0 %vm628_vm3, %v4510_v39  ;;  %v6930_v39 = vld [vmem:[#allocation6_spill] sm:$0xff] }
  0xaf   : > { %v4409_v35 = vcombine.low %v1988_v30, %v6930_v39 }
  0xb0   : > { %4849 = vmatpush3.bf16.msra.mxu1 %v5382_v10  ;;  %v5401_v10 = vld [vmem:[%s6846_s3 + $0xc0] sm:$0xff]  }
  0xb1   : > { %4858 = vmatprep.subr.bf16.mxu1 %v5386_v29 }
  0xb3   : > { %4843 = vmatmul.mubr.msk.bf16.gmra.mrb[4].mxu1 %vm628_vm3, %v4366_v22 }
  0xb4   : > { %4850 = vmatprep.mubr.msk.bf16.mxu1 %vm628_vm3, %v6046_v55  ;;  %v5390_v55 = vld [vmem:[%s6846_s3 + $0x98] sm:$0xff]  }
  0xb5   : > { %5007 = vmatmul.mubr.msk.bf16.vlgmr.msra.gmra.mrb[0].mxu0 %vm628_vm3, %v4511_v60  ;;  %v5408_v60 = vld [vmem:[%s6846_s3 + $0x1a8] sm:$0xff]  }
  0xb6   : > { %5015 = vmatpush3.bf16.msra.mxu0 %v5384_v28  ;;  %5010 = vmatprep.mubr.msk.bf16.mxu0 %vm628_vm3, %v4512_v34  ;;  %v6928_v28 = vcombine.low %v6309_v51, %v6313_v56  ;;  %v5402_v51 = vld [vmem:[%s6846_s3 + $0x198] sm:$0xff]   ;;  %v4563_v56 = vld [vmem:[%s6847_s4] ss:$0 sm:$0xff] }
  0xb7   : > { %5016 = vmatprep.subr.bf16.mxu0 %v5388_v33  ;;  %v6935_v34 = vld [vmem:[#allocation26_spill] sm:$0xff] }
  0xba   : > { %5017 = vmatpush3.bf16.msra.mxu0 %v5388_v33  ;;  %v5417_v33 = vld [vmem:[%s5654_s20 + $0x20] sm:$0xf] }
  0xbb   : > { %5026 = vmatprep.subr.bf16.mxu0 %v5391_v19  ;;  %4851 = vmatmul.mubr.msk.bf16.vlgmr.msra.gmra.mrb[0].mxu1 %vm628_vm3, %v6920_v25  ;;  %v6937_v25 = vld [vmem:[#allocation20_spill] sm:$0xff] }
  0xbc   : > { %4859 = vmatpush3.bf16.msra.mxu1 %v5386_v29  ;;  %4854 = vmatprep.mubr.msk.bf16.mxu1 %vm628_vm3, %v6921_v21  ;;  %v5414_v29 = vld [vmem:[%s5654_s20 + $0x10] sm:$0xf]  ;;  %v4431_v21 = vcombine.low %v6938_v0, %v6937_v25 }
  0xbd   : > { %5011 = vmatmul.mubr.msk.bf16.gmra.mrb[4].mxu0 %vm628_vm3, %v4513_v32  ;;  %4860 = vmatprep.subr.bf16.mxu1 %v5390_v55  ;;  %v4419_v22 = vcombine.low %v6613_v11, %v5414_v29  ;;  %v5419_v32 = vld [vmem:[%s5654_s20 + $0x30] sm:$0xf] }
  0xbe   : > { %5018 = vmatprep.mubr.msk.bf16.mxu0 %vm628_vm3, %v4520_v20 }
  0xc0   : > { %4861 = vmatpush3.bf16.msra.mxu1 %v5390_v55  ;;  %v5422_v55 = vld [vmem:[%s5654_s20 + $0x40] sm:$0xf] }
  0xc1   : > { %4870 = vmatprep.subr.bf16.mxu1 %v5393_v59  ;;  %v4422_v20 = vcombine.low %v5421_v24, %v5422_v55 }
  0xc3   : > { %4855 = vmatmul.mubr.msk.bf16.gmra.mrb[4].mxu1 %vm628_vm3, %v4374_v47 }
  0xc4   : > { %4862 = vmatprep.mubr.msk.bf16.mxu1 %vm628_vm3, %v4381_v37  ;;  %v6763_v37 = vld [vmem:[%s6848_s5] ss:$0 sm:$0xff] }
  0xc5   : > { %5019 = vmatmul.mubr.msk.bf16.vlgmr.msra.gmra.mrb[0].mxu0 %vm628_vm3, %v4521_v5 }
  0xc6   : > { %5027 = vmatpush3.bf16.msra.mxu0 %v5391_v19  ;;  %5022 = vmatprep.mubr.msk.bf16.mxu0 %vm628_vm3, %v4522_v13 }
  0xc7   : > { %5028 = vmatprep.subr.bf16.mxu0 %v5394_v27 }
  0xca   : > { %5029 = vmatpush3.bf16.msra.mxu0 %v5394_v27 }
  0xcb   : > { %5038 = vmatprep.subr.bf16.mxu0 %v5396_v48  ;;  %4863 = vmatmul.mubr.msk.bf16.vlgmr.msra.gmra.mrb[0].mxu1 %vm628_vm3, %v6922_v4 }
  0xcc   : > { %4871 = vmatpush3.bf16.msra.mxu1 %v5393_v59  ;;  %4866 = vmatprep.mubr.msk.bf16.mxu1 %vm628_vm3, %v6924_v14  ;;  %v6940_v59 = vld [vmem:[#allocation16_spill] sm:$0xff] }
  0xcd   : > { %5023 = vmatmul.mubr.msk.bf16.gmra.mrb[4].mxu0 %vm628_vm3, %v6923_v6  ;;  %4872 = vmatprep.subr.bf16.mxu1 %v5395_v36 }
  0xce   : > { %5030 = vmatprep.mubr.msk.bf16.mxu0 %vm628_vm3, %v4531_v41 }
  0xd0   : > { %4873 = vmatpush3.bf16.msra.mxu1 %v5395_v36 }
  0xd1   : > { %4882 = vmatprep.subr.bf16.mxu1 %v5397_v23 }
  0xd3   : > { %4867 = vmatmul.mubr.msk.bf16.gmra.mrb[4].mxu1 %vm628_vm3, %v6925_v42 }
  0xd4   : > { %4874 = vmatprep.mubr.msk.bf16.mxu1 %vm628_vm3, %v6926_v58 }
  0xd5   : > { %5031 = vmatmul.mubr.msk.bf16.vlgmr.msra.gmra.mrb[0].mxu0 %vm628_vm3, %v4532_v61 }
  0xd6   : > { %5039 = vmatpush3.bf16.msra.mxu0 %v5396_v48  ;;  %5034 = vmatprep.mubr.msk.bf16.mxu0 %vm628_vm3, %v4533_v54 }
  0xd7   : > { %5040 = vmatprep.subr.bf16.mxu0 %v5398_v49 }
  0xda   : > { %5041 = vmatpush3.bf16.msra.mxu0 %v5398_v49 }
  0xdb   : > { %5050 = vmatprep.subr.bf16.mxu0 %v5400_v12  ;;  %4875 = vmatmul.mubr.msk.bf16.vlgmr.msra.gmra.mrb[0].mxu1 %vm628_vm3, %v6927_v2 }
  0xdc   : > { %4883 = vmatpush3.bf16.msra.mxu1 %v5397_v23  ;;  %4878 = vmatprep.mubr.msk.bf16.mxu1 %vm628_vm3, %v6929_v57 }
  0xdd   : > { %5035 = vmatmul.mubr.msk.bf16.gmra.mrb[4].mxu0 %vm628_vm3, %v6928_v28  ;;  %4884 = vmatprep.subr.bf16.mxu1 %v5399_v8 }
  0xde   : > { %5042 = vmatprep.mubr.msk.bf16.mxu0 %vm628_vm3, %v6252_v26  ;;  %v5404_v26 = vld [vmem:[%s6846_s3 + $0xc8] sm:$0xff]  }
  0xe0   : > { %4885 = vmatpush3.bf16.msra.mxu1 %v5399_v8 }
  0xe1   : > { %4894 = vmatprep.subr.bf16.mxu1 %v5401_v10 }
  0xe3   : > { %4879 = vmatmul.mubr.msk.bf16.gmra.mrb[4].mxu1 %vm628_vm3, %v6931_v16 }
  0xe4   : > { %4886 = vmatprep.mubr.msk.bf16.mxu1 %vm628_vm3, %v4409_v35 }
  0xe5   : > { %5043 = vmatmul.mubr.msk.bf16.vlgmr.msra.gmra.mrb[0].mxu0 %vm628_vm3, %v6261_v9  ;;  %v6933_v9 = vcombine.low %v6919_v15, %v6282_v45  ;;  %v5415_v45 = vld [vmem:[%s6846_s3 + $0xd0] sm:$0xff]   ;;  %v5418_v15 = vld [vmem:[%s5654_s20 + $0x28] sm:$0xf] }
  0xe6   : > { %5051 = vmatpush3.bf16.msra.mxu0 %v5400_v12  ;;  %5046 = vmatprep.mubr.msk.bf16.mxu0 %vm628_vm3, %v6385_v62  ;;  %v6934_v62 = vld [vmem:[#allocation25_spill] sm:$0xff]  ;;  %v4421_v43 = vcombine.low %v5418_v15, %v5419_v32 }
  0xe7   : > { %5052 = vmatprep.subr.bf16.mxu0 %v5402_v51 }
  0xea   : > { %5053 = vmatpush3.bf16.msra.mxu0 %v5402_v51 }
  0xeb   : > { %5062 = vmatprep.subr.bf16.mxu0 %v5405_v3  ;;  %4887 = vmatmul.mubr.msk.bf16.vlgmr.msra.gmra.mrb[0].mxu1 %vm628_vm3, %v6932_v53 }
  0xec   : > { %4895 = vmatpush3.bf16.msra.mxu1 %v5401_v10  ;;  %4890 = vmatprep.mubr.msk.bf16.mxu1 %vm628_vm3, %v6934_v62 }
  0xed   : > { %5047 = vmatmul.mubr.msk.bf16.gmra.mrb[4].mxu0 %vm628_vm3, %v6933_v9  ;;  %4896 = vmatprep.subr.bf16.mxu1 %v5404_v26 }
  0xee   : > { %5054 = vmatprep.mubr.msk.bf16.mxu0 %vm628_vm3, %v6443_v40  ;;  %v5416_v40 = vld [vmem:[%s5654_s20 + $0x18] sm:$0xf]  ;;  %s451_s20 = scalar_select %p450_p9, %s5449_s30, 3 }
  0xef   : > { %v4420_v19 = vcombine.low %v5416_v40, %v5417_v33 }
  0xf0   : > { %4897 = vmatpush3.bf16.msra.mxu1 %v5404_v26  ;;  %s4287_s18 = sshll.u32 %s451_s20, 3 }
  0xf1   : > { %5074 = vmatprep.subr.bf16.mxu1 %v5415_v45  ;;  %s454_s25 = sadd.s32 %s4288_s19, %s4287_s18 }
  0xf2   : > { %s4289_s23 = sshll.u32 %s454_s25, 2 }
  0xf3   : > { %4891 = vmatmul.mubr.msk.bf16.gmra.mrb[4].mxu1 %vm628_vm3, %v6935_v34  ;;  %s6769_s16 = scalar_lea.vmem %s6851_s8, %s4289_s23 }
  0xf4   : > { %4898 = vmatprep.mubr.msk.bf16.mxu1 %vm628_vm3, %v4419_v22 }
  0xf5   : > { %5055 = vmatmul.mubr.msk.bf16.vlgmr.msra.gmra.mrb[0].mxu0 %vm628_vm3, %v6447_v18  ;;  %v6936_v18 = vld [vmem:[#allocation8_spill] sm:$0xff] }
  0xf6   : > { %5063 = vmatpush3.bf16.msra.mxu0 %v5405_v3  ;;  %5058 = vmatprep.mubr.msk.bf16.mxu0 %vm628_vm3, %v6478_v44  ;;  %v5420_v44 = vld [vmem:[%s6846_s3 + $0xd8] sm:$0xff]  }
  0xf7   : > { %5064 = vmatprep.subr.bf16.mxu0 %v5408_v60 }
  0xfa   : > { %5065 = vmatpush3.bf16.msra.mxu0 %v5408_v60 }
  0xfb   : > { %4899 = vmatmul.mubr.msk.bf16.vlgmr.msra.gmra.mrb[0].mxu1 %vm628_vm3, %v4420_v19 }
  0xfc   : > { %5076 = vmatpush3.bf16.msra.mxu1 %v5415_v45  ;;  %4902 = vmatprep.mubr.msk.bf16.mxu1 %vm628_vm3, %v4421_v43 }
  0xfd   : > { %5059 = vmatmul.mubr.msk.bf16.gmra.mrb[4].mxu0 %vm628_vm3, %v6936_v18  ;;  %5075 = vmatprep.subr.bf16.mxu1 %v5420_v44 }
  0xfe   : > { %5066 = vmatprep.mubr.msk.bf16.mxu0 %vm628_vm3, %v6527_v63  ;;  %v6939_v63 = vld [vmem:[#allocation15_spill] sm:$0xff] }
  0xff   : > { %v6941_v47 = vcombine.low %v6939_v63, %v6940_v59 }
 0x100   : > { %5077 = vmatpush3.bf16.msra.mxu1 %v5420_v44 }
 0x103   : > { %4903 = vmatmul.mubr.msk.bf16.gmra.mrb[4].mxu1 %vm628_vm3, %v4422_v20 }
 0x104   : > { %4914 = vmatprep.mubr.msk.bf16.mxu1 %vm628_vm3, %v4431_v21 }
 0x105   : > { %5067 = vmatmul.mubr.msk.bf16.vlgmr.msra.gmra.mrb[0].mxu0 %vm628_vm3, %v6531_v31 }
 0x106   : > { %5070 = vmatprep.mubr.msk.bf16.mxu0 %vm628_vm3, %v6555_v50 }
 0x10d   : > { %5071 = vmatmul.mubr.msk.bf16.gmra.mrb[4].mxu0 %vm628_vm3, %v4556_v46 }
 0x10f   : > { %4915 = vmatmul.mubr.msk.bf16.vlgmr.msra.gmra.mrb[4].mxu1 %vm628_vm3, %v6941_v47 }
 0x1ce   : > { %v4900_v5 = vpop.f32.mrb[0].mxu1 }
 0x1cf   : > { %v2198_v11 = vpop.f32.mrb[1].mxu1 }
 0x1d0   : > { %v4901_v7 = vpop.f32.mrb[2].mxu1 }
 0x1d1   : > { %v2201_v31 = vpop.f32.mrb[3].mxu1 }
 0x1d8   : > { %v5068_v50 = vpop.f32.mrb[0].mxu0 }
 0x1d9   : > { %v5078_v38 = vadd.f32 %v5068_v50, %v4900_v5  ;;  %v3890_v46 = vpop.f32.mrb[1].mxu0 }
 0x1da   : > { %v5079_v13 = vadd.f32 %v3890_v46, %v2198_v11  ;;  %v5069_v27 = vpop.f32.mrb[2].mxu0 }
 0x1db   : > { %v3938_v48 = vmul.f32 %v5078_v38, %v4563_v56  ;;  %v5080_v36 = vadd.f32 %v5069_v27, %v4901_v7  ;;  %v3893_v41 = vpop.f32.mrb[3].mxu0 }
 0x1dc   : > { %v3936_v4 = vmul.f32 %v5079_v13, %v4563_v56  ;;  %v5081_v6 = vadd.f32 %v3893_v41, %v2201_v31 }
 0x1dd   : > { %v3953_v14 = vadd.f32 %v6763_v37, %v3938_v48  ;;  %v3939_v23 = vmul.f32 %v5080_v36, %v4563_v56 }
 0x1de   : > { %v3951_v61 = vadd.f32 %v6763_v37, %v3936_v4  ;;  %v3937_v54 = vmul.f32 %v5081_v6, %v4563_v56 }
 0x1df   : > { %v4582_v49 = vpack.c.bf16 %v3953_v14, %v3953_v14  ;;  %v3954_v42 = vadd.f32 %v6763_v37, %v3939_v23  ;;  %v4003_v35 = vsel %vm628_vm3, %v3953_v14, 0.0  ;;  %v4023_v19 = vsel %vm628_vm3, %v3953_v14, -inf }
 0x1e0   : > { %v4580_v58 = vpack.c.bf16 %v3951_v61, %v3951_v61  ;;  %v3952_v12 = vadd.f32 %v6763_v37, %v3937_v54  ;;  %v5072_v52 = vpop.f32.mrb[4].mxu0  ;;  %v4000_v1 = vsel %vm628_vm3, %v3951_v61, 0.0  ;;  %v4021_v43 = vsel %vm628_vm3, %v3951_v61, -inf }
 0x1e1   : > { %3994 = vst.msk [vmem:[%s6769_s16 + $0x8] sm:$0xf] %vm3991_vm7, %v4582_v49  ;;  %v4583_v17 = vpack.c.bf16 %v3954_v42, %v3954_v42  ;;  %v3906_v8 = vpop.f32.mrb[5].mxu0  ;;  %v4005_v9 = vsel %vm628_vm3, %v3954_v42, 0.0  ;;  %v4024_v47 = vsel %vm628_vm3, %v3954_v42, -inf }
 0x1e2   : > { %3992 = vst.msk [vmem:[%s6769_s16] sm:$0xf] %vm3991_vm7, %v4580_v58  ;;  %v4581_v2 = vpack.c.bf16 %v3952_v12, %v3952_v12  ;;  %v4001_v28 = vsel %vm628_vm3, %v3952_v12, 0.0  ;;  %v5073_v57 = vpop.f32.mrb[6].mxu0  ;;  %v4916_v10 = vpop.f32.mrb[4].mxu1  ;;  %v4022_v31 = vsel %vm628_vm3, %v3952_v12, -inf }
 0x1e3   : > { %3995 = vst.msk [vmem:[%s6769_s16 + $0xc] sm:$0xf] %vm3991_vm7, %v4583_v17  ;;  %v4002_v30 = vadd.f32 %v4001_v28, %v4000_v1  ;;  %v3909_v39 = vpop.f32.mrb[7].mxu0  ;;  %v2334_v51 = vpop.f32.mrb[5].mxu1  ;;  %v5082_v16 = vadd.f32 %v5072_v52, %v4916_v10 }
 0x1e4   : > { %3993 = vst.msk [vmem:[%s6769_s16 + $0x4] sm:$0xf] %vm3991_vm7, %v4581_v2  ;;  %v4917_v26 = vpop.f32.mrb[6].mxu1  ;;  %v5083_v53 = vadd.f32 %v3906_v8, %v2334_v51 }
 0x1e5   : > { %v4004_v3 = vadd.f32 %v4003_v35, %v4002_v30  ;;  %v3942_v62 = vmul.f32 %v5082_v16, %v4563_v56  ;;  %v2337_v29 = vpop.f32.mrb[7].mxu1  ;;  %v5084_v22 = vadd.f32 %v5073_v57, %v4917_v26 }
 0x1e6   : > { %v3940_v45 = vmul.f32 %v5083_v53, %v4563_v56  ;;  %v5085_v34 = vadd.f32 %v3909_v39, %v2337_v29 }
 0x1e7   : > { %v4006_v60 = vadd.f32 %v4005_v9, %v4004_v3  ;;  %v3957_v40 = vadd.f32 %v6763_v37, %v3942_v62  ;;  %v3943_v33 = vmul.f32 %v5084_v22, %v4563_v56 }
 0x1e8   : > { %v3955_v15 = vadd.f32 %v6763_v37, %v3940_v45  ;;  %v3941_v32 = vmul.f32 %v5085_v34, %v4563_v56 }
 0x1e9   : > { %v4586_v18 = vpack.c.bf16 %v3957_v40, %v3957_v40  ;;  %v4029_v44 = vsel %vm628_vm3, %v3957_v40, -inf  ;;  %v3958_v24 = vadd.f32 %v6763_v37, %v3943_v33  ;;  %v4011_v48 = vsel %vm628_vm3, %v3957_v40, 0.0 }
 0x1ea   : > { %v4030_v55 = vmax.f32 %v4023_v19, %v4029_v44  ;;  %v4584_v20 = vpack.c.bf16 %v3955_v15, %v3955_v15  ;;  %v4007_v25 = vsel %vm628_vm3, %v3955_v15, 0.0  ;;  %v4025_v0 = vsel %vm628_vm3, %v3955_v15, -inf }
 0x1eb   : > { %3998 = vst.msk [vmem:[%s6769_s16 + $0x18] sm:$0xf] %vm3991_vm7, %v4586_v18  ;;  %v4008_v21 = vadd.f32 %v4007_v25, %v4006_v60  ;;  %v4026_v63 = vmax.f32 %v4021_v43, %v4025_v0  ;;  %v4587_v59 = vpack.c.bf16 %v3958_v24, %v3958_v24  ;;  %v4031_v5 = vsel %vm628_vm3, %v3958_v24, -inf }
 0x1ec   : > { %3996 = vst.msk [vmem:[%s6769_s16 + $0x10] sm:$0xf] %vm3991_vm7, %v4584_v20  ;;  %v3956_v11 = vadd.f32 %v6763_v37, %v3941_v32  ;;  %v4032_v7 = vmax.f32 %v4024_v47, %v4031_v5  ;;  %v4013_v37 = vsel %vm628_vm3, %v3958_v24, 0.0 }
 0x1ed   : > { %3999 = vst.msk [vmem:[%s6769_s16 + $0x1c] sm:$0xf] %vm3991_vm7, %v4587_v59 }
 0x1ee   : > { %v4585_v50 = vpack.c.bf16 %v3956_v11, %v3956_v11  ;;  %v4009_v56 = vsel %vm628_vm3, %v3956_v11, 0.0  ;;  %v4027_v38 = vsel %vm628_vm3, %v3956_v11, -inf  ;;  %v4034_v46 = vmax.f32 %v4030_v55, %v4032_v7 }
 0x1ef   : > { %v4010_v13 = vadd.f32 %v4009_v56, %v4008_v21  ;;  %v4028_v27 = vmax.f32 %v4022_v31, %v4027_v38 }
 0x1f0   : > { %3997 = vst.msk [vmem:[%s6769_s16 + $0x14] sm:$0xf] %vm3991_vm7, %v4585_v50 }
 0x1f1   : > { %v4012_v36 = vadd.f32 %v4011_v48, %v4010_v13  ;;  %v4033_v41 = vmax.f32 %v4026_v63, %v4028_v27 }
 0x1f3   : > { %v4014_v4 = vadd.f32 %v4013_v37, %v4012_v36  ;;  %v4035_v6 = vmax.f32 %v4033_v41, %v4034_v46 }
 0x1f5   : > { %v4015_v14 = vrot.slane %v4014_v4, 4  ;;  %v4036_v23 = vrot.slane %v4035_v6, 4 }
 0x1f7   : > { %v4016_v61 = vadd.f32 %v4015_v14, %v4014_v4  ;;  %v4037_v54 = vmax.f32 %v4035_v6, %v4036_v23 }
 0x1f9   : > { %v4017_v49 = vrot.slane %v4016_v61, 2  ;;  %v4038_v42 = vrot.slane %v4037_v54, 2  ;;  %4045 = sbr.rel (%p4573_p10) target bundleno = 514 (0x202), region = 56 }
 0x1fb   : > { %v4018_v58 = vadd.f32 %v4017_v49, %v4016_v61  ;;  %v4039_v12 = vmax.f32 %v4037_v54, %v4038_v42 }
 0x1fd   : > { %v4019_v52 = vrot.slane %v4018_v58, 1  ;;  %v4040_v17 = vrot.slane %v4039_v12, 1 }
 0x1ff   : > { %v4020_v8 = vadd.f32 %v4019_v52, %v4018_v58  ;;  %v4041_v1 = vmax.f32 %v4039_v12, %v4040_v17 }
 0x201   : > { %4047 = vst.msk [vmem:[#allocation2] sm:$0x1] %vm4046_vm8, %v4020_v8  ;;  %4048 = vst.msk [vmem:[#allocation3] sm:$0x1] %vm4046_vm8, %v4041_v1 }
 0x202 PF: > { %p4574_p11 = scmp.eq.s32.totalorder %s5449_s30, 0 }
 0x203   : > { %vm4055_vm9 = vcmask (!%p4574_p11), 253952  }
 0x204   : > { %4052 = sbr.rel (%p4574_p11) target bundleno = 524 (0x20c), region = 60 }
 0x208   : > { %v4053_v2 = vld [vmem:[#allocation2] sm:$0x1] (!%p4574_p11)  ;;  %v4057_v28 = vld [vmem:[#allocation3] sm:$0x1] (!%p4574_p11) }
 0x209   : > { %v4054_v57 = vadd.f32 (!%p4574_p11), %v4053_v2, %v4020_v8  ;;  %v4058_v30 = vmax.f32 (!%p4574_p11), %v4057_v28, %v4041_v1 }
 0x20b   : > { %4056 = vst.msk [vmem:[#allocation2] sm:$0x1] %vm4055_vm9, %v4054_v57  ;;  %4059 = vst.msk [vmem:[#allocation3] sm:$0x1] %vm4055_vm9, %v4058_v30 }
 0x20c PF: > { %p4575_p12 = scmp.ne.s32.totalorder %s5449_s30, 3 }
 0x20d   : > { %v4069_v39 = vlaneseq (!%p4575_p12)  ;;  %v4067_v3 = vld [vmem:[%s6849_s6] sm:$0x3] (!%p4575_p12)  ;;  %vm4075_vm10 = vcmask (!%p4575_p12), 254976   ;;  %vm4115_vm11 = vcmask (!%p4575_p12), 253952  }
 0x20e   : > { %4063 = sbr.rel (%p4575_p12) target bundleno = 730 (0x2da), region = 64  ;;  %v4080_v45 = vld [vmem:[%s6850_s7] sm:$0x3] (!%p4575_p12) }
 0x20f   : > { %v4070_v51 = vshrl.u32 (!%p4575_p12), %v4069_v39, 7 }
 0x211   : > { %v4071_v16 = vsub.s32 (!%p4575_p12), 0, %v4070_v51 }
 0x212   : > { %v4064_v10 = vld [vmem:[#allocation2] sm:$0x1] (!%p4575_p12)  ;;  %v4576_v26 = vld [vmem:[#allocation3] ss:$0 sm:$0xff] (!%p4575_p12) }
 0x213   : > { %v4065_v35 = vmul.f32 (!%p4575_p12), 0.00390625, %v4064_v10  ;;  %v4095_v62 = vmul.f32 (!%p4575_p12), %v4576_v26, %v4067_v3 }
 0x215   : > { %v4072_v53 = vrot.slane %v4065_v35, %v4071_v16  ;;  %v4096_v22 = vsel %vm4075_vm10, %v4095_v62, 0.0 }
 0x217   : > { %v4074_v9 = vmul.f32 %v4072_v53, %v4067_v3 }
 0x219   : > { %v4076_v29 = vsel %vm4075_vm10, %v4074_v9, 0.0 }
 0x21a   : > { %4077 = vadd.xlane.f32.xlu0 %v4076_v29 }
 0x21e   : > { %4097 = vadd.xlane.f32.xlu0 %v4096_v22 }
 0x2a7   : > { %v4078_v60 = vpop.xlane.xlu0 %4077 }
 0x2a8   : > { %v4079_v34 = vmax.f32 %v4078_v60, 0.0 }
 0x2aa   : > { %v4081_v40 = vmul.f32 %v4080_v45, %v4079_v34 }
 0x2ab   : > { %v4098_v33 = vpop.xlane.xlu0 %4097 }
 0x2ac   : > { %v4082_v19 = vsel %vm4075_vm10, %v4081_v40, 0.0  ;;  %v4099_v15 = vmax.f32 %v4098_v33, 0.0 }
 0x2ad   : > { %v4083_v32 = vrot.slane %v4082_v19, 4 }
 0x2ae   : > { %v4100_v43 = vmul.f32 %v4099_v15, %v4080_v45 }
 0x2af   : > { %v4084_v18 = vadd.f32 %v4083_v32, %v4082_v19 }
 0x2b0   : > { %v4101_v44 = vsel %vm4075_vm10, %v4100_v43, 0.0 }
 0x2b1   : > { %v4085_v24 = vrot.slane %v4084_v18, 2  ;;  %v4102_v55 = vrot.slane %v4101_v44, 4 }
 0x2b3   : > { %v4086_v20 = vadd.f32 %v4085_v24, %v4084_v18  ;;  %v4103_v25 = vadd.f32 %v4102_v55, %v4101_v44 }
 0x2b5   : > { %v4104_v0 = vrot.slane %v4103_v25, 2  ;;  %v4087_v21 = vrot.slane %v4086_v20, 1 }
 0x2b7   : > { %v4105_v63 = vadd.f32 %v4104_v0, %v4103_v25  ;;  %v4088_v47 = vadd.f32 %v4087_v21, %v4086_v20 }
 0x2b9   : > { %v4106_v59 = vrot.slane %v4105_v63, 1 }
 0x2bb   : > { %v4107_v5 = vadd.f32 %v4106_v59, %v4105_v63 }
 0x2bd   : > { %v4108_v11 = vadd.f32 %v4107_v5, %v4088_v47 }
 0x2bf   : > { %v4577_v7 = vmul.f32 -1.442695, %v4108_v11 }
 0x2c1   : > { %5423 = vpow2.f32 %v4577_v7 }
 0x2cb   : > { %v5424_v31 = vpop.eup %5423 }
 0x2cc   : > { %v4112_v50 = vadd.f32 1.0, %v5424_v31 }
 0x2ce   : > { %5425 = vrcp.f32 %v4112_v50 }
 0x2d8   : > { %v5426_v56 = vpop.eup %5425 }
 0x2d9   : > { %4116 = vst.msk [vmem:[%s459_s28] sm:$0x1] %vm4115_vm11, %v5426_v56 }
 0x2da PF: > { %s20_s13 = sadd.s32 1, %s5465_s13   ;;  %s6942_s30 = smov %s5457_s11 }
 0x2db   : > { %p17_p13 = scmp.ge.s32.totalorder %s20_s13, 10   ;;  %s6943_s10 = smov %s5461_s12 }
 0x2dc   : > { %s6944_s11 = smov %s6947_s14  ;;  %s6945_s12 = smov %s6951_s15 }
 0x2dd   :  { %19 = sbr.rel (!%p17_p13) target bundleno = 3 (0x3), region = 112 }

// kernel: cbam_forward.7
= control target key start
LH: loop header
LB: loop body
LE: loop exit
PB: predicated region body
PF: predicated region fallthrough
CT: control target
= control target key end

     0   :  { %9 = vsyncpa [#allocation3], 0  ;;  %s1108_s0 = inlined_call_operand.vmem [shape: bf16[2,4,64,32], index: 0, kind: input, shape index: {}]   ;;  %s1109_s1 = inlined_call_operand.vmem [shape: f32[2,1,32], index: 1, kind: input, shape index: {}]   ;;  %s1110_s2 = inlined_call_operand.vmem [shape: f32[2,4,64,1], index: 2, kind: input, shape index: {}]   ;;  %s1111_s3 = inlined_call_operand.vmem [shape: f32[2,4,64,32], index: 3, kind: input, shape index: {}]   ;;  %s1112_s4 = inlined_call_operand.hbm [shape: f32[2,4,64,32], index: 4, kind: output, shape index: {}]  }
   0x1   :  { %11 = vsyncpa [#allocation3 + $0x1], 0  ;;  %s908_s15 = smov 0   ;;  %s910_s16 = smov 0  }
   0x2   :  { %s912_s17 = smov 0   ;;  %s914_s18 = smov 0  }
   0x3   :  { %s916_s19 = smov 0   ;;  %s918_s20 = smov 0  }
   0x4   :  { %s920_s21 = smov 0   ;;  %s922_s22 = smov 0  }
   0x5 LB: > { %s626_s23 = sadd.s32 4294967295, %s877_s22   ;;  %s627_s24 = sadd.s32 4294967294, %s877_s22   ;;  %s877_s22 = sphi %s922_s22, %s17_s22   ;;  %s873_s21 = sphi %s920_s21, %s1121_s21   ;;  %s869_s20 = sphi %s918_s20, %s1120_s20   ;;  %s865_s19 = sphi %s916_s19, %s1119_s19   ;;  %s861_s18 = sphi %s914_s18, %s1118_s18   ;;  %s857_s17 = sphi %s912_s17, %s1117_s17   ;;  %s853_s16 = sphi %s910_s16, %s1116_s16   ;;  %s849_s15 = sphi %s908_s15, %s1115_s15  }
   0x6   : > { %s26_s25 = sadd.s32 1, %s869_s20  ;;  %s29_s26 = sadd.s32 1, %s873_s21 }
   0x7   : > { %p27_p0 = scmp.ge.s32.totalorder %s26_s25, 4  ;;  %p158_p1 = scmp.ne.s32.totalorder %s857_s17, %s853_s16 }
   0x8   : > { %p159_p2 = scmp.eq.s32.totalorder %s626_s23, 7  ;;  %p164_p5 = scmp.ne.s32.totalorder %s853_s16, %s849_s15 }
   0x9   : > { %s1123_s25 = smov (%p27_p0, %s26_s25), 0  ;;  %s1125_s26 = smov (!%p27_p0, %s29_s26), %s873_s21 }
   0xa   : > { %s144_s27 = ssub.s32 %s869_s20, %s1123_s25  ;;  %p959_p3 = por %p159_p2, %p158_p1 }
   0xb   : > { %p31_p4 = scmp.ge.s32.totalorder %s1125_s26, 2  ;;  %p165_p6 = scmp.eq.s32.totalorder %s627_s24, 7 }
   0xc   : > { %p630_p7 = scmp.ge.s32.totalorder %s877_s22, 1  ;;  %p225_p9 = scmp.lt.s32.totalorder %s877_s22, 9 }
   0xd   : > { %s1127_s26 = smov (%p31_p4, %s1125_s26), 0  ;;  %p968_p8 = por %p165_p6, %p164_p5 }
   0xe   : > { %s143_s30 = ssub.s32 %s873_s21, %s1127_s26  ;;  %s148_s5 = sadd.s32 1, %s857_s17 }
   0xf   : > { %s145_s6 = sor.u32 %s144_s27, %s143_s30  ;;  %p226_p10 = pnand %p630_p7, %p225_p9 }
  0x10   : > { %p146_p11 = scmp.eq.s32.totalorder %s145_s6, 0  ;;  %p276_p12 = scmp.lt.s32.totalorder (!%p226_p10), %s865_s19, 1  ;;  %v879_v0 = vmov (!%p226_p10), 0   ;;  %vm465_vm0 = vcmask (!%p226_p10), 261120  }
  0x11   : > { %229 = sbr.rel (%p226_p10) target bundleno = 220 (0xdc), region = 36  ;;  %p278_p13 = scmp.lt.s32.totalorder (!%p226_p10), %s861_s18, 3  ;;  %750 = vset.pattern.permute.xlu1 (!%p226_p10), %v879_v0  ;;  %749 = vset.pattern.permute.xlu0 (!%p226_p10), %v879_v0 }
  0x12   : > { %s977_s7 = scalar_select %p146_p11, %s857_s17, %s148_s5  }
  0x13   : > { %s652_s30 = sshll.u32 (!%p226_p10), %s865_s19, 5  ;;  %s880_s14 = smov (!%p226_p10), [#allocation2]  }
  0x18   : > { %s982_s8 = scalar_select %p276_p12, %s865_s19, 1 }
  0x19   : > { %s279_s9 = scalar_select %p278_p13, %s861_s18, 3 }
  0x1a   : > { %s633_s10 = sshll.u32 %s982_s8, 5  ;;  %s287_s5 = scalar_lea.vmem %s1109_s1, %s982_s8 }
  0x1b   : > { %s632_s11 = sshll.u32 %s279_s9, 3  ;;  %v649_v33 = vld [vmem:[%s287_s5] ss:$0 sm:$0xff] }
  0x1c   : > { %s986_s12 = sadd.s32 %s633_s10, %s632_s11 }
  0x1d   : > { %s637_s13 = sshll.u32 %s986_s12, 3  ;;  %s634_s6 = sshll.u32 %s986_s12, 2 }
  0x1e   : > { %s296_s24 = scalar_lea.vmem %s1110_s2, %s637_s13  ;;  %s1002_s11 = scalar_lea.vmem %s1108_s0, %s634_s6 }
  0x1f   : > { %v324_v1 = vld [vmem:[%s296_s24 + $0x10] sm:$0xff]  ;;  %v322_v2 = vld [vmem:[%s296_s24] sm:$0xff]  ;;  %v325_v3 = vld [vmem:[%s296_s24 + $0x18] sm:$0xff]  ;;  %s1013_s23 = scalar_lea.vmem %s1111_s3, %s637_s13  ;;  %s651_s13 = sshll.u32 %s861_s18, 3 }
  0x20   : > { %v643_v4 = vmul.f32 -1.442695, %v324_v1  ;;  %v641_v5 = vmul.f32 -1.442695, %v322_v2  ;;  %v644_v6 = vmul.f32 -1.442695, %v325_v3  ;;  %s487_s5 = sadd.s32 %s652_s30, %s651_s13 }
  0x21   : > { %v323_v7 = vld [vmem:[%s296_s24 + $0x8] sm:$0xff]  ;;  %v326_v9 = vld [vmem:[%s296_s24 + $0x20] sm:$0xff]  ;;  %v329_v13 = vld [vmem:[%s296_s24 + $0x38] sm:$0xff]  ;;  %s653_s18 = sshll.u32 %s487_s5, 7 }
  0x22   : > { %v327_v8 = vld [vmem:[%s296_s24 + $0x28] sm:$0xff]  ;;  %751 = vpow2.f32 %v643_v4  ;;  %v642_v10 = vmul.f32 -1.442695, %v323_v7  ;;  %v645_v12 = vmul.f32 -1.442695, %v326_v9  ;;  %v328_v14 = vld [vmem:[%s296_s24 + $0x30] sm:$0xff]  ;;  %s1046_s10 = scalar_lea.hbm %s1112_s4, %s653_s18 }
  0x23   : > { %v646_v11 = vmul.f32 -1.442695, %v327_v8  ;;  %753 = vpow2.f32 %v641_v5  ;;  %v648_v15 = vmul.f32 -1.442695, %v329_v13  ;;  %v647_v16 = vmul.f32 -1.442695, %v328_v14 }
  0x24   : > { %755 = vpow2.f32 %v644_v6  ;;  %v672_v34 = vld [vmem:[%s1002_s11 + $0x8] sm:$0xff]   ;;  %v657_v35 = vld [vmem:[%s1002_s11] sm:$0xff]   ;;  %v673_v48 = vld [vmem:[%s1002_s11 + $0x10] sm:$0xff]   ;;  %s273_s24 = sand.u32 1, %s853_s16  }
  0x25   : > { %757 = vpow2.f32 %v642_v10  ;;  %v662_v36 = vunpack.c.l.bf16 %v672_v34  ;;  %v658_v37 = vunpack.c.l.bf16 %v657_v35  ;;  %v663_v43 = vunpack.c.h.bf16 %v672_v34  ;;  %v674_v55 = vld [vmem:[%s1002_s11 + $0x18] sm:$0xff]   ;;  %v443_v62 = vld [vmem:[%s1013_s23 + $0x10] sm:$0xff]  ;;  %s631_s27 = sshll.u32 %s273_s24, 6  ;;  %v441_v1 = vld [vmem:[%s1013_s23] sm:$0xff]  ;;  %s1056_s11 = scalar_lea.sflag [#allocation3], %s273_s24 }
  0x26   : > { %759 = vpow2.f32 %v646_v11  ;;  %v659_v44 = vunpack.c.h.bf16 %v657_v35  ;;  %v667_v50 = vunpack.c.h.bf16 %v673_v48  ;;  %v666_v51 = vunpack.c.l.bf16 %v673_v48  ;;  %v444_v6 = vld [vmem:[%s1013_s23 + $0x18] sm:$0xff]  ;;  %v442_v10 = vld [vmem:[%s1013_s23 + $0x8] sm:$0xff]  ;;  %s1022_s12 = scalar_lea.vmem [#allocation2], %s631_s27 }
  0x27   : > { %761 = vpow2.f32 %v645_v12  ;;  %v387_v39 = vmul.f32 %v662_v36, %v649_v33  ;;  %v385_v40 = vmul.f32 %v658_v37, %v649_v33  ;;  %v388_v46 = vmul.f32 %v663_v43, %v649_v33  ;;  %s490_s19 = sshll.u32 %s1022_s12, 4  ;;  %s1048_s19 = int_to_ptr.vmem [resolvable:$true] %s490_s19 }
  0x28   : > { %763 = vpow2.f32 %v648_v15  ;;  %v386_v47 = vmul.f32 %v659_v44, %v649_v33  ;;  %v390_v53 = vmul.f32 %v667_v50, %v649_v33  ;;  %v389_v54 = vmul.f32 %v666_v51, %v649_v33  ;;  %s783_s8 = scalar_lea.vmem %s1048_s19, 1024 }
  0x29   : > { %765 = vpow2.f32 %v647_v16  ;;  %v671_v57 = vunpack.c.h.bf16 %v674_v55  ;;  %v670_v58 = vunpack.c.l.bf16 %v674_v55  ;;  %v446_v16 = vld [vmem:[%s1013_s23 + $0x28] sm:$0xff]  ;;  %p784_p0 = scmp.ne.s32.totalorder %s1048_s19, %s783_s8 }
  0x2b   : > { %v392_v60 = vmul.f32 %v671_v57, %v649_v33  ;;  %v391_v61 = vmul.f32 %v670_v58, %v649_v33  ;;  %p785_p1 = pnand %p784_p0, %p959_p3 }
  0x2c   : > { %v752_v17 = vpop.eup %751 }
  0x2d   : > { %v754_v18 = vpop.eup %753  ;;  %v356_v19 = vadd.f32 1.0, %v752_v17  ;;  %p786_p2 = pneg %p785_p1 }
  0x2e   : > { %v756_v20 = vpop.eup %755  ;;  %v354_v21 = vadd.f32 1.0, %v754_v18 }
  0x2f   : > { %v758_v22 = vpop.eup %757  ;;  %767 = vrcp.f32 %v356_v19  ;;  %v357_v23 = vadd.f32 1.0, %v756_v20  ;;  %v445_v20 = vld [vmem:[%s1013_s23 + $0x20] sm:$0xff] }
  0x30   : > { %v760_v24 = vpop.eup %759  ;;  %769 = vrcp.f32 %v354_v21  ;;  %v355_v25 = vadd.f32 1.0, %v758_v22 }
  0x31   : > { %v762_v26 = vpop.eup %761  ;;  %771 = vrcp.f32 %v357_v23  ;;  %v359_v27 = vadd.f32 1.0, %v760_v24 }
  0x32   : > { %v764_v28 = vpop.eup %763  ;;  %773 = vrcp.f32 %v355_v25  ;;  %v358_v29 = vadd.f32 1.0, %v762_v26  ;;  %v448_v26 = vld [vmem:[%s1013_s23 + $0x38] sm:$0xff] }
  0x33   : > { %v766_v30 = vpop.eup %765  ;;  %775 = vrcp.f32 %v359_v27  ;;  %v361_v31 = vadd.f32 1.0, %v764_v28 }
  0x34   : > { %777 = vrcp.f32 %v358_v29  ;;  %v360_v32 = vadd.f32 1.0, %v766_v30  ;;  %v447_v30 = vld [vmem:[%s1013_s23 + $0x30] sm:$0xff]  ;;  %s787_s23 = sshll.u32 %s880_s14, 4  ;;  %s788_s23 = int_to_ptr.vmem [resolvable:$false] %s787_s23 }
  0x35   : > { %779 = vrcp.f32 %v361_v31  ;;  %s789_s27 = scalar_lea.vmem %s788_s23, 2048  ;;  %p790_p4 = scmp.lt.s32.totalorder %s1048_s19, %s788_s23 }
  0x36   : > { %781 = vrcp.f32 %v360_v32  ;;  %p791_p5 = scmp.lt.s32.totalorder %s789_s27, %s783_s8 }
  0x38   : > { %p792_p6 = por %p791_p5, %p790_p4 }
  0x39   : > { %v768_v38 = vpop.eup %767 }
  0x3a   : > { %v770_v41 = vpop.eup %769  ;;  %405 = vperm.xlu1 %750, %v768_v38   ;;  %p793_p7 = pnand %p792_p6, %p786_p2 }
  0x3b   : > { %v772_v42 = vpop.eup %771  ;;  %395 = vperm.xlu0 %749, %v770_v41  }
  0x3c   : > { %v774_v45 = vpop.eup %773 }
  0x3d   : > { %v776_v49 = vpop.eup %775 }
  0x3e   : > { %410 = vperm.xlu1 %750, %v772_v42   ;;  %v778_v52 = vpop.eup %777 }
  0x3f   : > { %400 = vperm.xlu0 %749, %v774_v45   ;;  %v780_v56 = vpop.eup %779 }
  0x40   : > { %v782_v59 = vpop.eup %781 }
  0x42   : > { %420 = vperm.xlu1 %750, %v776_v49  }
  0x43   : > { %415 = vperm.xlu0 %749, %v778_v52  }
  0x46   : > { %430 = vperm.xlu1 %750, %v780_v56  }
  0x47   : > { %425 = vperm.xlu0 %749, %v782_v59  }
  0xb9   : > { %v406_v63 = vpop.permute.xlu1 %405 }
  0xba   : > { %v435_v0 = vmul.f32 %v406_v63, %v387_v39  ;;  %v396_v2 = vpop.permute.xlu0 %395 }
  0xbb   : > { %v433_v3 = vmul.f32 %v396_v2, %v385_v40 }
  0xbc   : > { %v451_v4 = vadd.f32 %v443_v62, %v435_v0 }
  0xbd   : > { %v449_v5 = vadd.f32 %v441_v1, %v433_v3  ;;  %v411_v7 = vpop.permute.xlu1 %410 }
  0xbe   : > { %v459_v8 = vmax.f32 %v451_v4, 0.0  ;;  %v436_v9 = vmul.f32 %v411_v7, %v388_v46  ;;  %v401_v11 = vpop.permute.xlu0 %400 }
  0xbf   : > { %v457_v12 = vmax.f32 %v449_v5, 0.0  ;;  %v434_v13 = vmul.f32 %v401_v11, %v386_v47 }
  0xc0   : > { %468 = vst.msk [vmem:[%s1022_s12 + $0x10] sm:$0xff] %vm465_vm0, %v459_v8  ;;  %v452_v14 = vadd.f32 %v444_v6, %v436_v9 }
  0xc1   : > { %466 = vst.msk [vmem:[%s1022_s12] sm:$0xff] %vm465_vm0, %v457_v12  ;;  %v450_v15 = vadd.f32 %v442_v10, %v434_v13  ;;  %v421_v17 = vpop.permute.xlu1 %420 }
  0xc2   : > { %v460_v18 = vmax.f32 %v452_v14, 0.0  ;;  %v438_v19 = vmul.f32 %v421_v17, %v390_v53  ;;  %v416_v21 = vpop.permute.xlu0 %415 }
  0xc3   : > { %v458_v22 = vmax.f32 %v450_v15, 0.0  ;;  %v437_v23 = vmul.f32 %v416_v21, %v389_v54 }
  0xc4   : > { %469 = vst.msk [vmem:[%s1022_s12 + $0x18] sm:$0xff] %vm465_vm0, %v460_v18  ;;  %v454_v24 = vadd.f32 %v446_v16, %v438_v19 }
  0xc5   : > { %467 = vst.msk [vmem:[%s1022_s12 + $0x8] sm:$0xff] %vm465_vm0, %v458_v22  ;;  %v453_v25 = vadd.f32 %v445_v20, %v437_v23  ;;  %v431_v27 = vpop.permute.xlu1 %430 }
  0xc6   : > { %v462_v28 = vmax.f32 %v454_v24, 0.0  ;;  %v440_v29 = vmul.f32 %v431_v27, %v392_v60  ;;  %v426_v31 = vpop.permute.xlu0 %425 }
  0xc7   : > { %v461_v32 = vmax.f32 %v453_v25, 0.0  ;;  %v439_v33 = vmul.f32 %v426_v31, %v391_v61 }
  0xc8   : > { %471 = vst.msk [vmem:[%s1022_s12 + $0x28] sm:$0xff] %vm465_vm0, %v462_v28  ;;  %v456_v34 = vadd.f32 %v448_v26, %v440_v29 }
  0xc9   : > { %470 = vst.msk [vmem:[%s1022_s12 + $0x20] sm:$0xff] %vm465_vm0, %v461_v32  ;;  %v455_v35 = vadd.f32 %v447_v30, %v439_v33 }
  0xca   : > { %v464_v36 = vmax.f32 %v456_v34, 0.0 }
  0xcb   : > { %v463_v37 = vmax.f32 %v455_v35, 0.0 }
  0xcc   : > { %473 = vst.msk [vmem:[%s1022_s12 + $0x38] sm:$0xff] %vm465_vm0, %v464_v36 }
  0xcd   : > { %472 = vst.msk [vmem:[%s1022_s12 + $0x30] sm:$0xff] %vm465_vm0, %v463_v37 }
  0xce   : > { %796 = shalt.err (!%p793_p7)
}
  0xcf   : > { %s797_s24 = scalar_lea.hbm %s1046_s10, 1024  ;;  %s801_s30 = scalar_lea.hbm %s1112_s4, 8192 }
  0xd0   : > { %p798_p9 = scmp.ne.s32.totalorder %s1046_s10, %s797_s24  ;;  %p802_p12 = scmp.lt.u32.totalorder %s1046_s10, %s1112_s4 }
  0xd1   : > { %p803_p13 = scmp.lt.u32.totalorder %s801_s30, %s797_s24  ;;  %p805_p1 = scmp.lt.u32.totalorder %s797_s24, %s1046_s10 }
  0xd2   : > { %p799_p10 = pnand %p798_p9, %p959_p3 }
  0xd3   : > { %p804_p0 = por %p803_p13, %p802_p12 }
  0xd4   : > { %p800_p11 = pneg %p799_p10 }
  0xd5   : > { %p806_p2 = por %p805_p1, %p804_p0 }
  0xd7   : > { %p807_p4 = pnand %p806_p2, %p800_p11 }
  0xd9   : > { %810 = shalt.err (!%p807_p4)
}
  0xda   : > { %s881_s6 = smov 128   ;;  %s882_s9 = smov 8  }
  0xdb   : > { %675 = dma.vmem_to_hbm [thread:$0]  (%p959_p3), %s1048_s19, 1024, %s1046_s10, %s1056_s11, %s881_s6, %s881_s6, %s882_s9  }
  0xdc PF: > { %p681_p5 = scmp.ge.s32.totalorder %s877_s22, 2  ;;  %s505_s8 = sand.u32 1, %s849_s15  }
  0xdd   : > { %s506_s14 = scalar_lea.sflag [#allocation3], %s505_s8 }
  0xde   : > { %p678_p6 = pnand %p681_p5, %p968_p8 }
  0xe0   : > { %844 = dma.done.wait (!%p678_p6), %s506_s14, 1024  }
  0xe1   : > { %846 = vsyncadd (!%p678_p6), %s506_s14, 4294966272  ;;  %s17_s22 = sadd.s32 1, %s877_s22   ;;  %s1115_s15 = smov %s853_s16 }
  0xe2   : > { %p14_p7 = scmp.ge.s32.totalorder %s17_s22, 10   ;;  %s1116_s16 = smov %s857_s17 }
  0xe3   : > { %s1117_s17 = smov %s977_s7  ;;  %s1118_s18 = smov %s869_s20 }
  0xe4   : > { %s1119_s19 = smov %s873_s21  ;;  %s1120_s20 = smov %s1123_s25 }
  0xe5   : > { %s1121_s21 = smov %s1127_s26  ;;  %16 = sbr.rel (!%p14_p7) target bundleno = 5 (0x5), region = 80 }
  0xec   :  { %511 = vsyncpa [#allocation3], 1 }
  0xed   :  { %513 = vsyncpa [#allocation3 + $0x1], 1 }

</bundles_post_ra>
